<compile_context>
chip_gen: v7x
topology: tpu7x:2x2x1
jax: 0.10.0
libtpu: 0.0.40
codegen_flags: <defaults>
</compile_context>

<pallas_src>
import functools

import jax
import jax.numpy as jnp
from jax import lax
from jax.experimental import pallas as pl
from jax.experimental.pallas import tpu as pltpu

_PI = 3.141592653589793


def _round_up(x, m):
    return (x + m - 1) // m * m


# ----------------------------------------------------------------------------
# Fused flux + RK4 time-integration kernel (time loop fully unrolled)
# ----------------------------------------------------------------------------
def _make_burger_rk4_kernel(layer_sizes, bias, sigmoid, Nx, NP, T):
    num_layers = len(layer_sizes) - 1
    n_param_refs = num_layers * (2 if bias else 1)

    def kernel(*refs):
        u0_ref = refs[0]                              # (1, NP) VMEM
        p_refs = refs[1:1 + n_param_refs]             # MLP weights (+ biases)
        scal_ref = refs[1 + n_param_refs]             # (6,)  SMEM
        dts_ref = refs[2 + n_param_refs]              # (T-1,) SMEM
        out_ref = refs[3 + n_param_refs]              # (T, NP) VMEM

        # ---- loop-invariant constants (hoisted; the unrolled time loop below
        # never re-materializes anything from this block) ----
        D = scal_ref[0]
        s0 = scal_ref[1]
        s1 = scal_ref[2]
        bc_left = scal_ref[3]                         # BC[0, 0]
        bc_right = scal_ref[4]                        # BC[1, 0]
        inv_dx = scal_ref[5]

        col = lax.broadcasted_iota(jnp.int32, (1, NP), 1)
        is_left = col == 0
        is_right = col == Nx - 1
        valid = (col < Nx).astype(jnp.float32)

        # pre-splat the SMEM scalars into (1, NP) vregs once
        ones = jnp.ones((1, NP), jnp.float32)
        s0_v = s0 * ones
        s1_v = s1 * ones
        d_v = D * ones
        inv_dx_v = inv_dx * ones
        bc_left_v = bc_left * ones
        bc_right_v = bc_right * ones

        # load + pre-broadcast / pre-cast the MLP parameters once
        params = [r[...] for r in p_refs]
        prepped = []
        idx = 0
        for l in range(num_layers):
            in_f, out_f = layer_sizes[l], layer_sizes[l + 1]
            w = params[idx]
            idx += 1
            if in_f == 1:
                # K=1 layer: (out,1) -> (out,NP) lane broadcast, VPU multiply.
                w = jnp.broadcast_to(w, (out_f, NP))
            elif out_f == 1:
                # M=1 layer: (in,1) -> (in,NP), VPU multiply + sublane reduce.
                w = jnp.broadcast_to(w, (in_f, NP))
            else:
                # (H,H) layer: single-pass bf16 MXU matmul, f32 accumulate.
                w = w.astype(jnp.bfloat16)
            b = None
            if bias:
                b = jnp.broadcast_to(params[idx], (out_f, NP))
                idx += 1
            prepped.append((in_f, out_f, w, b))

        def func_nn(c):                               # c: (1, NP) f32
            h = c
            for l, (in_f, out_f, w, b) in enumerate(prepped):
                if in_f == 1:
                    h = w * h                         # VPU broadcast multiply
                elif out_f == 1:
                    h = jnp.sum(w * h, axis=0, keepdims=True)   # sublane reduce
                else:
                    h = jnp.dot(w, h.astype(jnp.bfloat16),
                                preferred_element_type=jnp.float32)
                if b is not None:
                    h = h + b
                if l < num_layers - 1 or not sigmoid:
                    h = jnp.tanh(h)
                else:
                    h = jax.nn.sigmoid(h)
            return h                                  # (1, NP)

        def flux(c):
            a = func_nn(c)
            c_m1 = pltpu.roll(c, shift=1, axis=1)         # c[i-1] (i=0 masked)
            c_p1 = pltpu.roll(c, shift=NP - 1, axis=1)    # c[i+1] (i=Nx-1 masked)
            left_nb = jnp.where(is_left, bc_left_v, c_m1)
            right_nb = jnp.where(is_right, bc_right_v, c_p1)
            s0c = s0_v * c
            li = s0c + s1_v * left_nb
            ri = s0c + s1_v * right_nb
            a_s = a * inv_dx_v
            # left: li*(D + relu(a)/dx), right: ri*(D - (-relu(-a))/dx)
            lf = li * (d_v + jnp.maximum(a_s, 0.0))
            rf = ri * (d_v - jnp.minimum(a_s, 0.0))
            return (lf + rf) * valid                      # zero the padded lanes

        # ---- fully unrolled RK4 time loop ----
        u0 = u0_ref[...]
        rows = [u0]
        y = u0
        for step in range(T - 1):
            dt = dts_ref[step]
            half_dt = 0.5 * dt
            k1 = flux(y)
            k2 = flux(y + half_dt * k1)
            k3 = flux(y + half_dt * k2)
            k4 = flux(y + dt * k3)
            y = y + (dt / 6.0) * (k1 + 2.0 * (k2 + k3) + k4)
            rows.append(y)

        # single dense (T, NP) = one-tile store
        out_ref[...] = jnp.concatenate(rows, axis=0)

    return kernel


# ----------------------------------------------------------------------------
# forward(t, u): one pallas_call integrating u[0] through all time points
# ----------------------------------------------------------------------------
@functools.partial(jax.jit, static_argnames=("layer_sizes", "bias", "sigmoid"))
def finn_burger_forward(u, t, weights, biases, scal, *, layer_sizes,
                        bias=False, sigmoid=False):
    """u: (T, Nx) f32, t: (T,) f32  ->  pred: (T, Nx) f32."""
    T, Nx = u.shape
    NP = _round_up(max(Nx, 128), 128)                 # lane-dense padded width
    num_layers = len(layer_sizes) - 1

    u0 = jnp.zeros((1, NP), jnp.float32).at[0, :Nx].set(u[0].astype(jnp.float32))
    dts = (t[1:] - t[:-1]).astype(jnp.float32)

    vmem = pl.BlockSpec(memory_space=pltpu.MemorySpace.VMEM)
    smem = pl.BlockSpec(memory_space=pltpu.MemorySpace.SMEM)

    args = [u0]
    in_specs = [vmem]
    for l in range(num_layers):
        in_f, out_f = layer_sizes[l], layer_sizes[l + 1]
        w = weights[l].astype(jnp.float32)
        if in_f == 1:
            w = w.reshape(out_f, 1)                   # column for VPU broadcast
        elif out_f == 1:
            w = w.reshape(out_f, in_f).T              # (in, 1) pre-transposed
        args.append(w)
        in_specs.append(vmem)
        if bias:
            args.append(biases[l].astype(jnp.float32).reshape(out_f, 1))
            in_specs.append(vmem)
    args.append(scal.astype(jnp.float32))
    in_specs.append(smem)
    args.append(dts)
    in_specs.append(smem)

    kernel = _make_burger_rk4_kernel(layer_sizes, bias, sigmoid, Nx, NP, T)
    traj = pl.pallas_call(
        kernel,
        out_shape=jax.ShapeDtypeStruct((T, NP), jnp.float32),
        in_specs=in_specs,
        out_specs=vmem,
    )(*args)
    return traj[:, :Nx]


# ----------------------------------------------------------------------------
# Pure-JAX reference (mirrors the PyTorch flux_kernel / RK4 loop 1:1)
# ----------------------------------------------------------------------------
def _flux_ref(u, weights, biases, D, stencil, BC, dx, bias, sigmoid):
    a = u[:, None]
    for l, w in enumerate(weights):
        a = a @ w.T
        if bias:
            a = a + biases[l]
        if l < len(weights) - 1 or not sigmoid:
            a = jnp.tanh(a)
        else:
            a = jax.nn.sigmoid(a)
    a = a[:, 0]
    a_plus = jnp.maximum(a, 0.0)
    a_min = -jnp.maximum(-a, 0.0)
    s0, s1 = stencil[0], stencil[1]

    left_bound = (D * (s0 * u[0] + s1 * BC[0, 0])
                  - a_plus[0] / dx * (-s0 * u[0] - s1 * BC[0, 0]))
    left_neigh = (D * (s0 * u[1:] + s1 * u[:-1])
                  - a_plus[1:] / dx * (-s0 * u[1:] - s1 * u[:-1]))
    left_flux = jnp.concatenate([left_bound[None], left_neigh])

    right_bound = (D * (s0 * u[-1] + s1 * BC[1, 0])
                   - a_min[-1] / dx * (s0 * u[-1] + s1 * BC[1, 0]))
    right_neigh = (D * (s0 * u[:-1] + s1 * u[1:])
                   - a_min[:-1] / dx * (s0 * u[:-1] + s1 * u[1:]))
    right_flux = jnp.concatenate([right_neigh, right_bound[None]])

    return left_flux + right_flux


def _forward_ref(u, t, weights, biases, D, stencil, BC, dx, bias, sigmoid):
    y0 = u[0]
    f = lambda y: _flux_ref(y, weights, biases, D, stencil, BC, dx, bias, sigmoid)

    def step(carry, dt):
        k1 = f(carry)
        k2 = f(carry + 0.5 * dt * k1)
        k3 = f(carry + 0.5 * dt * k2)
        k4 = f(carry + dt * k3)
        nxt = carry + (dt / 6.0) * (k1 + 2.0 * k2 + 2.0 * k3 + k4)
        return nxt, nxt

    _, traj = lax.scan(step, y0, t[1:] - t[:-1])
    return jnp.concatenate([y0[None], traj], axis=0)


# ----------------------------------------------------------------------------
if __name__ == "__main__":
    Nx = 49                              # spatial points (Burger setup)
    T = 8                                # time points
    layer_sizes = (1, 32, 32, 1)
    bias = False                         # FINN_Burger default
    sigmoid = False                      # FINN_Burger default (Tanh everywhere)

    key = jax.random.PRNGKey(0)

    # nn.Linear-style uniform(-1/sqrt(fan_in), 1/sqrt(fan_in)) init, bias=False.
    weights = []
    biases = []
    for i in range(len(layer_sizes) - 1):
        key, kw = jax.random.split(key)
        bound = 1.0 / float(layer_sizes[i]) ** 0.5
        w = jax.random.uniform(kw, (layer_sizes[i + 1], layer_sizes[i]),
                               jnp.float32, -bound, bound)
        weights.append(w)
    weights = tuple(weights)
    biases = tuple(biases)

    D = 0.01 / _PI                        # Burger viscosity
    stencil = jnp.array([-1.0, 1.0], jnp.float32)
    BC = jnp.zeros((2, 1), jnp.float32)   # Dirichlet u=0 at both ends
    dx = 2.0 / (Nx - 1)

    x = jnp.linspace(-1.0, 1.0, Nx)
    u0 = (-jnp.sin(_PI * x)).astype(jnp.float32)
    u = jnp.zeros((T, Nx), jnp.float32).at[0].set(u0)   # forward() only uses u[0]
    t = jnp.linspace(0.0, 0.07, T).astype(jnp.float32)

    scal = jnp.array([D, stencil[0], stencil[1], BC[0, 0], BC[1, 0], 1.0 / dx],
                     jnp.float32)

    # --- fused Pallas forward (single launch) ---
    pred = finn_burger_forward(u, t, weights, biases, scal,
                               layer_sizes=layer_sizes, bias=bias, sigmoid=sigmoid)
    pred = jax.block_until_ready(pred)

    # --- correctness check against the pure-JAX reference ---
    pred_ref = jax.block_until_ready(
        _forward_ref(u, t, weights, biases, D, stencil, BC, dx, bias, sigmoid))

    assert pred.shape == (T, Nx)
    assert bool(jnp.all(jnp.isfinite(pred)))
    err = float(jnp.max(jnp.abs(pred - pred_ref)))
    scale = float(jnp.max(jnp.abs(pred_ref))) + 1e-12
    assert err / scale < 2e-2, f"trajectory mismatch: rel_err={err / scale:.3e}"

    print("KERNEL_OK")
</pallas_src>

<mosaic_0001>
module attributes {stable_mosaic.version = 11 : i64} {
  func.func @kernel(%arg0: memref<1x128xf32, #tpu.memory_space<vmem>>, %arg1: memref<32x1xf32, #tpu.memory_space<vmem>>, %arg2: memref<32x32xf32, #tpu.memory_space<vmem>>, %arg3: memref<32x1xf32, #tpu.memory_space<vmem>>, %arg4: memref<6xf32, #tpu.memory_space<smem>>, %arg5: memref<7xf32, #tpu.memory_space<smem>>, %arg6: memref<8x128xf32, #tpu.memory_space<vmem>>) attributes {dimension_semantics = [], scalar_prefetch = 0 : i64, scratch_operands = 0 : i64, tpu.core_type = #tpu.core_type<tc>} {
    %c0 = arith.constant 0 : index
    %0 = memref.load %arg4[%c0] : memref<6xf32, #tpu.memory_space<smem>>
    %c1 = arith.constant 1 : index
    %1 = memref.load %arg4[%c1] : memref<6xf32, #tpu.memory_space<smem>>
    %c2 = arith.constant 2 : index
    %2 = memref.load %arg4[%c2] : memref<6xf32, #tpu.memory_space<smem>>
    %c3 = arith.constant 3 : index
    %3 = memref.load %arg4[%c3] : memref<6xf32, #tpu.memory_space<smem>>
    %c4 = arith.constant 4 : index
    %4 = memref.load %arg4[%c4] : memref<6xf32, #tpu.memory_space<smem>>
    %c5 = arith.constant 5 : index
    %5 = memref.load %arg4[%c5] : memref<6xf32, #tpu.memory_space<smem>>
    %6 = tpu.iota {dimensions = array<i32: 1>} : vector<1x128xi32>
    %c0_i32 = arith.constant 0 : i32
    %7 = vector.broadcast %c0_i32 : i32 to vector<1x128xi32>
    %8 = arith.cmpi eq, %6, %7 : vector<1x128xi32>
    %c48_i32 = arith.constant 48 : i32
    %9 = vector.broadcast %c48_i32 : i32 to vector<1x128xi32>
    %10 = arith.cmpi eq, %6, %9 : vector<1x128xi32>
    %c49_i32 = arith.constant 49 : i32
    %11 = vector.broadcast %c49_i32 : i32 to vector<1x128xi32>
    %12 = arith.cmpi slt, %6, %11 : vector<1x128xi32>
    %13 = arith.extui %12 : vector<1x128xi1> to vector<1x128xi32>
    %14 = arith.sitofp %13 : vector<1x128xi32> to vector<1x128xf32>
    %cst = arith.constant 1.000000e+00 : f32
    %15 = vector.broadcast %cst : f32 to vector<1x128xf32>
    %16 = vector.broadcast %1 : f32 to vector<1x128xf32>
    %17 = arith.mulf %16, %15 : vector<1x128xf32>
    %18 = vector.broadcast %2 : f32 to vector<1x128xf32>
    %19 = arith.mulf %18, %15 : vector<1x128xf32>
    %20 = vector.broadcast %0 : f32 to vector<1x128xf32>
    %21 = arith.mulf %20, %15 : vector<1x128xf32>
    %22 = vector.broadcast %5 : f32 to vector<1x128xf32>
    %23 = arith.mulf %22, %15 : vector<1x128xf32>
    %24 = vector.broadcast %3 : f32 to vector<1x128xf32>
    %25 = arith.mulf %24, %15 : vector<1x128xf32>
    %26 = vector.broadcast %4 : f32 to vector<1x128xf32>
    %27 = arith.mulf %26, %15 : vector<1x128xf32>
    %c0_0 = arith.constant 0 : index
    %c0_1 = arith.constant 0 : index
    %28 = vector.load %arg1[%c0_0, %c0_1] : memref<32x1xf32, #tpu.memory_space<vmem>>, vector<32x1xf32>
    %c0_2 = arith.constant 0 : index
    %c0_3 = arith.constant 0 : index
    %29 = vector.load %arg2[%c0_2, %c0_3] : memref<32x32xf32, #tpu.memory_space<vmem>>, vector<32x32xf32>
    %c0_4 = arith.constant 0 : index
    %c0_5 = arith.constant 0 : index
    %30 = vector.load %arg3[%c0_4, %c0_5] : memref<32x1xf32, #tpu.memory_space<vmem>>, vector<32x1xf32>
    %31 = vector.shape_cast %28 : vector<32x1xf32> to vector<32x1xf32>
    %32 = vector.broadcast %31 : vector<32x1xf32> to vector<32x128xf32>
    %33 = arith.truncf %29 : vector<32x32xf32> to vector<32x32xbf16>
    %34 = vector.shape_cast %30 : vector<32x1xf32> to vector<32x1xf32>
    %35 = vector.broadcast %34 : vector<32x1xf32> to vector<32x128xf32>
    %c0_6 = arith.constant 0 : index
    %c0_7 = arith.constant 0 : index
    %36 = vector.load %arg0[%c0_6, %c0_7] : memref<1x128xf32, #tpu.memory_space<vmem>>, vector<1x128xf32>
    %c0_8 = arith.constant 0 : index
    %37 = memref.load %arg5[%c0_8] : memref<7xf32, #tpu.memory_space<smem>>
    %cst_9 = arith.constant 5.000000e-01 : f32
    %38 = arith.mulf %cst_9, %37 : f32
    %39 = vector.broadcast %36 : vector<1x128xf32> to vector<32x128xf32>
    %40 = arith.mulf %32, %39 : vector<32x128xf32>
    %41 = math.tanh %40 : vector<32x128xf32>
    %42 = arith.truncf %41 : vector<32x128xf32> to vector<32x128xbf16>
    %cst_10 = arith.constant dense<0.000000e+00> : vector<32x128xf32>
    %43 = tpu.matmul %33, %42, %cst_10 {dimension_numbers = #tpu.dot_dimension_numbers<[1], [0], [0], [1], [0, 0, 1, 1], [], []>} : vector<32x32xbf16>, vector<32x128xbf16>, vector<32x128xf32> -> vector<32x128xf32>
    %44 = math.tanh %43 : vector<32x128xf32>
    %45 = arith.mulf %35, %44 : vector<32x128xf32>
    %cst_11 = arith.constant dense<0.000000e+00> : vector<128xf32>
    %46 = vector.multi_reduction <add>, %45, %cst_11 [0] : vector<32x128xf32> to vector<128xf32>
    %47 = vector.shape_cast %46 : vector<128xf32> to vector<1x128xf32>
    %48 = math.tanh %47 : vector<1x128xf32>
    %c1_i32 = arith.constant 1 : i32
    %49 = tpu.dynamic_rotate %36 by %c1_i32 dim 1 : vector<1x128xf32>, i32 -> vector<1x128xf32>
    %c127_i32 = arith.constant 127 : i32
    %50 = tpu.dynamic_rotate %36 by %c127_i32 dim 1 : vector<1x128xf32>, i32 -> vector<1x128xf32>
    %51 = arith.select %8, %25, %49 : vector<1x128xi1>, vector<1x128xf32>
    %52 = arith.select %10, %27, %50 : vector<1x128xi1>, vector<1x128xf32>
    %53 = arith.mulf %17, %36 : vector<1x128xf32>
    %54 = arith.mulf %19, %51 : vector<1x128xf32>
    %55 = arith.addf %53, %54 : vector<1x128xf32>
    %56 = arith.mulf %19, %52 : vector<1x128xf32>
    %57 = arith.addf %53, %56 : vector<1x128xf32>
    %58 = arith.mulf %48, %23 : vector<1x128xf32>
    %cst_12 = arith.constant 0.000000e+00 : f32
    %59 = vector.broadcast %cst_12 : f32 to vector<1x128xf32>
    %60 = arith.maximumf %58, %59 : vector<1x128xf32>
    %61 = arith.addf %21, %60 : vector<1x128xf32>
    %62 = arith.mulf %55, %61 : vector<1x128xf32>
    %cst_13 = arith.constant 0.000000e+00 : f32
    %63 = vector.broadcast %cst_13 : f32 to vector<1x128xf32>
    %64 = arith.minimumf %58, %63 : vector<1x128xf32>
    %65 = arith.subf %21, %64 : vector<1x128xf32>
    %66 = arith.mulf %57, %65 : vector<1x128xf32>
    %67 = arith.addf %62, %66 : vector<1x128xf32>
    %68 = arith.mulf %67, %14 : vector<1x128xf32>
    %69 = vector.broadcast %38 : f32 to vector<1x128xf32>
    %70 = arith.mulf %69, %68 : vector<1x128xf32>
    %71 = arith.addf %36, %70 : vector<1x128xf32>
    %72 = vector.broadcast %71 : vector<1x128xf32> to vector<32x128xf32>
    %73 = arith.mulf %32, %72 : vector<32x128xf32>
    %74 = math.tanh %73 : vector<32x128xf32>
    %75 = arith.truncf %74 : vector<32x128xf32> to vector<32x128xbf16>
    %cst_14 = arith.constant dense<0.000000e+00> : vector<32x128xf32>
    %76 = tpu.matmul %33, %75, %cst_14 {dimension_numbers = #tpu.dot_dimension_numbers<[1], [0], [0], [1], [0, 0, 1, 1], [], []>} : vector<32x32xbf16>, vector<32x128xbf16>, vector<32x128xf32> -> vector<32x128xf32>
    %77 = math.tanh %76 : vector<32x128xf32>
    %78 = arith.mulf %35, %77 : vector<32x128xf32>
    %cst_15 = arith.constant dense<0.000000e+00> : vector<128xf32>
    %79 = vector.multi_reduction <add>, %78, %cst_15 [0] : vector<32x128xf32> to vector<128xf32>
    %80 = vector.shape_cast %79 : vector<128xf32> to vector<1x128xf32>
    %81 = math.tanh %80 : vector<1x128xf32>
    %c1_i32_16 = arith.constant 1 : i32
    %82 = tpu.dynamic_rotate %71 by %c1_i32_16 dim 1 : vector<1x128xf32>, i32 -> vector<1x128xf32>
    %c127_i32_17 = arith.constant 127 : i32
    %83 = tpu.dynamic_rotate %71 by %c127_i32_17 dim 1 : vector<1x128xf32>, i32 -> vector<1x128xf32>
    %84 = arith.select %8, %25, %82 : vector<1x128xi1>, vector<1x128xf32>
    %85 = arith.select %10, %27, %83 : vector<1x128xi1>, vector<1x128xf32>
    %86 = arith.mulf %17, %71 : vector<1x128xf32>
    %87 = arith.mulf %19, %84 : vector<1x128xf32>
    %88 = arith.addf %86, %87 : vector<1x128xf32>
    %89 = arith.mulf %19, %85 : vector<1x128xf32>
    %90 = arith.addf %86, %89 : vector<1x128xf32>
    %91 = arith.mulf %81, %23 : vector<1x128xf32>
    %cst_18 = arith.constant 0.000000e+00 : f32
    %92 = vector.broadcast %cst_18 : f32 to vector<1x128xf32>
    %93 = arith.maximumf %91, %92 : vector<1x128xf32>
    %94 = arith.addf %21, %93 : vector<1x128xf32>
    %95 = arith.mulf %88, %94 : vector<1x128xf32>
    %cst_19 = arith.constant 0.000000e+00 : f32
    %96 = vector.broadcast %cst_19 : f32 to vector<1x128xf32>
    %97 = arith.minimumf %91, %96 : vector<1x128xf32>
    %98 = arith.subf %21, %97 : vector<1x128xf32>
    %99 = arith.mulf %90, %98 : vector<1x128xf32>
    %100 = arith.addf %95, %99 : vector<1x128xf32>
    %101 = arith.mulf %100, %14 : vector<1x128xf32>
    %102 = vector.broadcast %38 : f32 to vector<1x128xf32>
    %103 = arith.mulf %102, %101 : vector<1x128xf32>
    %104 = arith.addf %36, %103 : vector<1x128xf32>
    %105 = vector.broadcast %104 : vector<1x128xf32> to vector<32x128xf32>
    %106 = arith.mulf %32, %105 : vector<32x128xf32>
    %107 = math.tanh %106 : vector<32x128xf32>
    %108 = arith.truncf %107 : vector<32x128xf32> to vector<32x128xbf16>
    %cst_20 = arith.constant dense<0.000000e+00> : vector<32x128xf32>
    %109 = tpu.matmul %33, %108, %cst_20 {dimension_numbers = #tpu.dot_dimension_numbers<[1], [0], [0], [1], [0, 0, 1, 1], [], []>} : vector<32x32xbf16>, vector<32x128xbf16>, vector<32x128xf32> -> vector<32x128xf32>
    %110 = math.tanh %109 : vector<32x128xf32>
    %111 = arith.mulf %35, %110 : vector<32x128xf32>
    %cst_21 = arith.constant dense<0.000000e+00> : vector<128xf32>
    %112 = vector.multi_reduction <add>, %111, %cst_21 [0] : vector<32x128xf32> to vector<128xf32>
    %113 = vector.shape_cast %112 : vector<128xf32> to vector<1x128xf32>
    %114 = math.tanh %113 : vector<1x128xf32>
    %c1_i32_22 = arith.constant 1 : i32
    %115 = tpu.dynamic_rotate %104 by %c1_i32_22 dim 1 : vector<1x128xf32>, i32 -> vector<1x128xf32>
    %c127_i32_23 = arith.constant 127 : i32
    %116 = tpu.dynamic_rotate %104 by %c127_i32_23 dim 1 : vector<1x128xf32>, i32 -> vector<1x128xf32>
    %117 = arith.select %8, %25, %115 : vector<1x128xi1>, vector<1x128xf32>
    %118 = arith.select %10, %27, %116 : vector<1x128xi1>, vector<1x128xf32>
    %119 = arith.mulf %17, %104 : vector<1x128xf32>
    %120 = arith.mulf %19, %117 : vector<1x128xf32>
    %121 = arith.addf %119, %120 : vector<1x128xf32>
    %122 = arith.mulf %19, %118 : vector<1x128xf32>
    %123 = arith.addf %119, %122 : vector<1x128xf32>
    %124 = arith.mulf %114, %23 : vector<1x128xf32>
    %cst_24 = arith.constant 0.000000e+00 : f32
    %125 = vector.broadcast %cst_24 : f32 to vector<1x128xf32>
    %126 = arith.maximumf %124, %125 : vector<1x128xf32>
    %127 = arith.addf %21, %126 : vector<1x128xf32>
    %128 = arith.mulf %121, %127 : vector<1x128xf32>
    %cst_25 = arith.constant 0.000000e+00 : f32
    %129 = vector.broadcast %cst_25 : f32 to vector<1x128xf32>
    %130 = arith.minimumf %124, %129 : vector<1x128xf32>
    %131 = arith.subf %21, %130 : vector<1x128xf32>
    %132 = arith.mulf %123, %131 : vector<1x128xf32>
    %133 = arith.addf %128, %132 : vector<1x128xf32>
    %134 = arith.mulf %133, %14 : vector<1x128xf32>
    %135 = vector.broadcast %37 : f32 to vector<1x128xf32>
    %136 = arith.mulf %135, %134 : vector<1x128xf32>
    %137 = arith.addf %36, %136 : vector<1x128xf32>
    %138 = vector.broadcast %137 : vector<1x128xf32> to vector<32x128xf32>
    %139 = arith.mulf %32, %138 : vector<32x128xf32>
    %140 = math.tanh %139 : vector<32x128xf32>
    %141 = arith.truncf %140 : vector<32x128xf32> to vector<32x128xbf16>
    %cst_26 = arith.constant dense<0.000000e+00> : vector<32x128xf32>
    %142 = tpu.matmul %33, %141, %cst_26 {dimension_numbers = #tpu.dot_dimension_numbers<[1], [0], [0], [1], [0, 0, 1, 1], [], []>} : vector<32x32xbf16>, vector<32x128xbf16>, vector<32x128xf32> -> vector<32x128xf32>
    %143 = math.tanh %142 : vector<32x128xf32>
    %144 = arith.mulf %35, %143 : vector<32x128xf32>
    %cst_27 = arith.constant dense<0.000000e+00> : vector<128xf32>
    %145 = vector.multi_reduction <add>, %144, %cst_27 [0] : vector<32x128xf32> to vector<128xf32>
    %146 = vector.shape_cast %145 : vector<128xf32> to vector<1x128xf32>
    %147 = math.tanh %146 : vector<1x128xf32>
    %c1_i32_28 = arith.constant 1 : i32
    %148 = tpu.dynamic_rotate %137 by %c1_i32_28 dim 1 : vector<1x128xf32>, i32 -> vector<1x128xf32>
    %c127_i32_29 = arith.constant 127 : i32
    %149 = tpu.dynamic_rotate %137 by %c127_i32_29 dim 1 : vector<1x128xf32>, i32 -> vector<1x128xf32>
    %150 = arith.select %8, %25, %148 : vector<1x128xi1>, vector<1x128xf32>
    %151 = arith.select %10, %27, %149 : vector<1x128xi1>, vector<1x128xf32>
    %152 = arith.mulf %17, %137 : vector<1x128xf32>
    %153 = arith.mulf %19, %150 : vector<1x128xf32>
    %154 = arith.addf %152, %153 : vector<1x128xf32>
    %155 = arith.mulf %19, %151 : vector<1x128xf32>
    %156 = arith.addf %152, %155 : vector<1x128xf32>
    %157 = arith.mulf %147, %23 : vector<1x128xf32>
    %cst_30 = arith.constant 0.000000e+00 : f32
    %158 = vector.broadcast %cst_30 : f32 to vector<1x128xf32>
    %159 = arith.maximumf %157, %158 : vector<1x128xf32>
    %160 = arith.addf %21, %159 : vector<1x128xf32>
    %161 = arith.mulf %154, %160 : vector<1x128xf32>
    %cst_31 = arith.constant 0.000000e+00 : f32
    %162 = vector.broadcast %cst_31 : f32 to vector<1x128xf32>
    %163 = arith.minimumf %157, %162 : vector<1x128xf32>
    %164 = arith.subf %21, %163 : vector<1x128xf32>
    %165 = arith.mulf %156, %164 : vector<1x128xf32>
    %166 = arith.addf %161, %165 : vector<1x128xf32>
    %167 = arith.mulf %166, %14 : vector<1x128xf32>
    %cst_32 = arith.constant 6.000000e+00 : f32
    %168 = arith.divf %37, %cst_32 : f32
    %169 = arith.addf %101, %134 : vector<1x128xf32>
    %cst_33 = arith.constant 2.000000e+00 : f32
    %170 = vector.broadcast %cst_33 : f32 to vector<1x128xf32>
    %171 = arith.mulf %170, %169 : vector<1x128xf32>
    %172 = arith.addf %68, %171 : vector<1x128xf32>
    %173 = arith.addf %172, %167 : vector<1x128xf32>
    %174 = vector.broadcast %168 : f32 to vector<1x128xf32>
    %175 = arith.mulf %174, %173 : vector<1x128xf32>
    %176 = arith.addf %36, %175 : vector<1x128xf32>
    %c1_34 = arith.constant 1 : index
    %177 = memref.load %arg5[%c1_34] : memref<7xf32, #tpu.memory_space<smem>>
    %cst_35 = arith.constant 5.000000e-01 : f32
    %178 = arith.mulf %cst_35, %177 : f32
    %179 = vector.broadcast %176 : vector<1x128xf32> to vector<32x128xf32>
    %180 = arith.mulf %32, %179 : vector<32x128xf32>
    %181 = math.tanh %180 : vector<32x128xf32>
    %182 = arith.truncf %181 : vector<32x128xf32> to vector<32x128xbf16>
    %cst_36 = arith.constant dense<0.000000e+00> : vector<32x128xf32>
    %183 = tpu.matmul %33, %182, %cst_36 {dimension_numbers = #tpu.dot_dimension_numbers<[1], [0], [0], [1], [0, 0, 1, 1], [], []>} : vector<32x32xbf16>, vector<32x128xbf16>, vector<32x128xf32> -> vector<32x128xf32>
    %184 = math.tanh %183 : vector<32x128xf32>
    %185 = arith.mulf %35, %184 : vector<32x128xf32>
    %cst_37 = arith.constant dense<0.000000e+00> : vector<128xf32>
    %186 = vector.multi_reduction <add>, %185, %cst_37 [0] : vector<32x128xf32> to vector<128xf32>
    %187 = vector.shape_cast %186 : vector<128xf32> to vector<1x128xf32>
    %188 = math.tanh %187 : vector<1x128xf32>
    %c1_i32_38 = arith.constant 1 : i32
    %189 = tpu.dynamic_rotate %176 by %c1_i32_38 dim 1 : vector<1x128xf32>, i32 -> vector<1x128xf32>
    %c127_i32_39 = arith.constant 127 : i32
    %190 = tpu.dynamic_rotate %176 by %c127_i32_39 dim 1 : vector<1x128xf32>, i32 -> vector<1x128xf32>
    %191 = arith.select %8, %25, %189 : vector<1x128xi1>, vector<1x128xf32>
    %192 = arith.select %10, %27, %190 : vector<1x128xi1>, vector<1x128xf32>
    %193 = arith.mulf %17, %176 : vector<1x128xf32>
    %194 = arith.mulf %19, %191 : vector<1x128xf32>
    %195 = arith.addf %193, %194 : vector<1x128xf32>
    %196 = arith.mulf %19, %192 : vector<1x128xf32>
    %197 = arith.addf %193, %196 : vector<1x128xf32>
    %198 = arith.mulf %188, %23 : vector<1x128xf32>
    %cst_40 = arith.constant 0.000000e+00 : f32
    %199 = vector.broadcast %cst_40 : f32 to vector<1x128xf32>
    %200 = arith.maximumf %198, %199 : vector<1x128xf32>
    %201 = arith.addf %21, %200 : vector<1x128xf32>
    %202 = arith.mulf %195, %201 : vector<1x128xf32>
    %cst_41 = arith.constant 0.000000e+00 : f32
    %203 = vector.broadcast %cst_41 : f32 to vector<1x128xf32>
    %204 = arith.minimumf %198, %203 : vector<1x128xf32>
    %205 = arith.subf %21, %204 : vector<1x128xf32>
    %206 = arith.mulf %197, %205 : vector<1x128xf32>
    %207 = arith.addf %202, %206 : vector<1x128xf32>
    %208 = arith.mulf %207, %14 : vector<1x128xf32>
    %209 = vector.broadcast %178 : f32 to vector<1x128xf32>
    %210 = arith.mulf %209, %208 : vector<1x128xf32>
    %211 = arith.addf %176, %210 : vector<1x128xf32>
    %212 = vector.broadcast %211 : vector<1x128xf32> to vector<32x128xf32>
    %213 = arith.mulf %32, %212 : vector<32x128xf32>
    %214 = math.tanh %213 : vector<32x128xf32>
    %215 = arith.truncf %214 : vector<32x128xf32> to vector<32x128xbf16>
    %cst_42 = arith.constant dense<0.000000e+00> : vector<32x128xf32>
    %216 = tpu.matmul %33, %215, %cst_42 {dimension_numbers = #tpu.dot_dimension_numbers<[1], [0], [0], [1], [0, 0, 1, 1], [], []>} : vector<32x32xbf16>, vector<32x128xbf16>, vector<32x128xf32> -> vector<32x128xf32>
    %217 = math.tanh %216 : vector<32x128xf32>
    %218 = arith.mulf %35, %217 : vector<32x128xf32>
    %cst_43 = arith.constant dense<0.000000e+00> : vector<128xf32>
    %219 = vector.multi_reduction <add>, %218, %cst_43 [0] : vector<32x128xf32> to vector<128xf32>
    %220 = vector.shape_cast %219 : vector<128xf32> to vector<1x128xf32>
    %221 = math.tanh %220 : vector<1x128xf32>
    %c1_i32_44 = arith.constant 1 : i32
    %222 = tpu.dynamic_rotate %211 by %c1_i32_44 dim 1 : vector<1x128xf32>, i32 -> vector<1x128xf32>
    %c127_i32_45 = arith.constant 127 : i32
    %223 = tpu.dynamic_rotate %211 by %c127_i32_45 dim 1 : vector<1x128xf32>, i32 -> vector<1x128xf32>
    %224 = arith.select %8, %25, %222 : vector<1x128xi1>, vector<1x128xf32>
    %225 = arith.select %10, %27, %223 : vector<1x128xi1>, vector<1x128xf32>
    %226 = arith.mulf %17, %211 : vector<1x128xf32>
    %227 = arith.mulf %19, %224 : vector<1x128xf32>
    %228 = arith.addf %226, %227 : vector<1x128xf32>
    %229 = arith.mulf %19, %225 : vector<1x128xf32>
    %230 = arith.addf %226, %229 : vector<1x128xf32>
    %231 = arith.mulf %221, %23 : vector<1x128xf32>
    %cst_46 = arith.constant 0.000000e+00 : f32
    %232 = vector.broadcast %cst_46 : f32 to vector<1x128xf32>
    %233 = arith.maximumf %231, %232 : vector<1x128xf32>
    %234 = arith.addf %21, %233 : vector<1x128xf32>
    %235 = arith.mulf %228, %234 : vector<1x128xf32>
    %cst_47 = arith.constant 0.000000e+00 : f32
    %236 = vector.broadcast %cst_47 : f32 to vector<1x128xf32>
    %237 = arith.minimumf %231, %236 : vector<1x128xf32>
    %238 = arith.subf %21, %237 : vector<1x128xf32>
    %239 = arith.mulf %230, %238 : vector<1x128xf32>
    %240 = arith.addf %235, %239 : vector<1x128xf32>
    %241 = arith.mulf %240, %14 : vector<1x128xf32>
    %242 = vector.broadcast %178 : f32 to vector<1x128xf32>
    %243 = arith.mulf %242, %241 : vector<1x128xf32>
    %244 = arith.addf %176, %243 : vector<1x128xf32>
    %245 = vector.broadcast %244 : vector<1x128xf32> to vector<32x128xf32>
    %246 = arith.mulf %32, %245 : vector<32x128xf32>
    %247 = math.tanh %246 : vector<32x128xf32>
    %248 = arith.truncf %247 : vector<32x128xf32> to vector<32x128xbf16>
    %cst_48 = arith.constant dense<0.000000e+00> : vector<32x128xf32>
    %249 = tpu.matmul %33, %248, %cst_48 {dimension_numbers = #tpu.dot_dimension_numbers<[1], [0], [0], [1], [0, 0, 1, 1], [], []>} : vector<32x32xbf16>, vector<32x128xbf16>, vector<32x128xf32> -> vector<32x128xf32>
    %250 = math.tanh %249 : vector<32x128xf32>
    %251 = arith.mulf %35, %250 : vector<32x128xf32>
    %cst_49 = arith.constant dense<0.000000e+00> : vector<128xf32>
    %252 = vector.multi_reduction <add>, %251, %cst_49 [0] : vector<32x128xf32> to vector<128xf32>
    %253 = vector.shape_cast %252 : vector<128xf32> to vector<1x128xf32>
    %254 = math.tanh %253 : vector<1x128xf32>
    %c1_i32_50 = arith.constant 1 : i32
    %255 = tpu.dynamic_rotate %244 by %c1_i32_50 dim 1 : vector<1x128xf32>, i32 -> vector<1x128xf32>
    %c127_i32_51 = arith.constant 127 : i32
    %256 = tpu.dynamic_rotate %244 by %c127_i32_51 dim 1 : vector<1x128xf32>, i32 -> vector<1x128xf32>
    %257 = arith.select %8, %25, %255 : vector<1x128xi1>, vector<1x128xf32>
    %258 = arith.select %10, %27, %256 : vector<1x128xi1>, vector<1x128xf32>
    %259 = arith.mulf %17, %244 : vector<1x128xf32>
    %260 = arith.mulf %19, %257 : vector<1x128xf32>
    %261 = arith.addf %259, %260 : vector<1x128xf32>
    %262 = arith.mulf %19, %258 : vector<1x128xf32>
    %263 = arith.addf %259, %262 : vector<1x128xf32>
    %264 = arith.mulf %254, %23 : vector<1x128xf32>
    %cst_52 = arith.constant 0.000000e+00 : f32
    %265 = vector.broadcast %cst_52 : f32 to vector<1x128xf32>
    %266 = arith.maximumf %264, %265 : vector<1x128xf32>
    %267 = arith.addf %21, %266 : vector<1x128xf32>
    %268 = arith.mulf %261, %267 : vector<1x128xf32>
    %cst_53 = arith.constant 0.000000e+00 : f32
    %269 = vector.broadcast %cst_53 : f32 to vector<1x128xf32>
    %270 = arith.minimumf %264, %269 : vector<1x128xf32>
    %271 = arith.subf %21, %270 : vector<1x128xf32>
    %272 = arith.mulf %263, %271 : vector<1x128xf32>
    %273 = arith.addf %268, %272 : vector<1x128xf32>
    %274 = arith.mulf %273, %14 : vector<1x128xf32>
    %275 = vector.broadcast %177 : f32 to vector<1x128xf32>
    %276 = arith.mulf %275, %274 : vector<1x128xf32>
    %277 = arith.addf %176, %276 : vector<1x128xf32>
    %278 = vector.broadcast %277 : vector<1x128xf32> to vector<32x128xf32>
    %279 = arith.mulf %32, %278 : vector<32x128xf32>
    %280 = math.tanh %279 : vector<32x128xf32>
    %281 = arith.truncf %280 : vector<32x128xf32> to vector<32x128xbf16>
    %cst_54 = arith.constant dense<0.000000e+00> : vector<32x128xf32>
    %282 = tpu.matmul %33, %281, %cst_54 {dimension_numbers = #tpu.dot_dimension_numbers<[1], [0], [0], [1], [0, 0, 1, 1], [], []>} : vector<32x32xbf16>, vector<32x128xbf16>, vector<32x128xf32> -> vector<32x128xf32>
    %283 = math.tanh %282 : vector<32x128xf32>
    %284 = arith.mulf %35, %283 : vector<32x128xf32>
    %cst_55 = arith.constant dense<0.000000e+00> : vector<128xf32>
    %285 = vector.multi_reduction <add>, %284, %cst_55 [0] : vector<32x128xf32> to vector<128xf32>
    %286 = vector.shape_cast %285 : vector<128xf32> to vector<1x128xf32>
    %287 = math.tanh %286 : vector<1x128xf32>
    %c1_i32_56 = arith.constant 1 : i32
    %288 = tpu.dynamic_rotate %277 by %c1_i32_56 dim 1 : vector<1x128xf32>, i32 -> vector<1x128xf32>
    %c127_i32_57 = arith.constant 127 : i32
    %289 = tpu.dynamic_rotate %277 by %c127_i32_57 dim 1 : vector<1x128xf32>, i32 -> vector<1x128xf32>
    %290 = arith.select %8, %25, %288 : vector<1x128xi1>, vector<1x128xf32>
    %291 = arith.select %10, %27, %289 : vector<1x128xi1>, vector<1x128xf32>
    %292 = arith.mulf %17, %277 : vector<1x128xf32>
    %293 = arith.mulf %19, %290 : vector<1x128xf32>
    %294 = arith.addf %292, %293 : vector<1x128xf32>
    %295 = arith.mulf %19, %291 : vector<1x128xf32>
    %296 = arith.addf %292, %295 : vector<1x128xf32>
    %297 = arith.mulf %287, %23 : vector<1x128xf32>
    %cst_58 = arith.constant 0.000000e+00 : f32
    %298 = vector.broadcast %cst_58 : f32 to vector<1x128xf32>
    %299 = arith.maximumf %297, %298 : vector<1x128xf32>
    %300 = arith.addf %21, %299 : vector<1x128xf32>
    %301 = arith.mulf %294, %300 : vector<1x128xf32>
    %cst_59 = arith.constant 0.000000e+00 : f32
    %302 = vector.broadcast %cst_59 : f32 to vector<1x128xf32>
    %303 = arith.minimumf %297, %302 : vector<1x128xf32>
    %304 = arith.subf %21, %303 : vector<1x128xf32>
    %305 = arith.mulf %296, %304 : vector<1x128xf32>
    %306 = arith.addf %301, %305 : vector<1x128xf32>
    %307 = arith.mulf %306, %14 : vector<1x128xf32>
    %cst_60 = arith.constant 6.000000e+00 : f32
    %308 = arith.divf %177, %cst_60 : f32
    %309 = arith.addf %241, %274 : vector<1x128xf32>
    %cst_61 = arith.constant 2.000000e+00 : f32
    %310 = vector.broadcast %cst_61 : f32 to vector<1x128xf32>
    %311 = arith.mulf %310, %309 : vector<1x128xf32>
    %312 = arith.addf %208, %311 : vector<1x128xf32>
    %313 = arith.addf %312, %307 : vector<1x128xf32>
    %314 = vector.broadcast %308 : f32 to vector<1x128xf32>
    %315 = arith.mulf %314, %313 : vector<1x128xf32>
    %316 = arith.addf %176, %315 : vector<1x128xf32>
    %c2_62 = arith.constant 2 : index
    %317 = memref.load %arg5[%c2_62] : memref<7xf32, #tpu.memory_space<smem>>
    %cst_63 = arith.constant 5.000000e-01 : f32
    %318 = arith.mulf %cst_63, %317 : f32
    %319 = vector.broadcast %316 : vector<1x128xf32> to vector<32x128xf32>
    %320 = arith.mulf %32, %319 : vector<32x128xf32>
    %321 = math.tanh %320 : vector<32x128xf32>
    %322 = arith.truncf %321 : vector<32x128xf32> to vector<32x128xbf16>
    %cst_64 = arith.constant dense<0.000000e+00> : vector<32x128xf32>
    %323 = tpu.matmul %33, %322, %cst_64 {dimension_numbers = #tpu.dot_dimension_numbers<[1], [0], [0], [1], [0, 0, 1, 1], [], []>} : vector<32x32xbf16>, vector<32x128xbf16>, vector<32x128xf32> -> vector<32x128xf32>
    %324 = math.tanh %323 : vector<32x128xf32>
    %325 = arith.mulf %35, %324 : vector<32x128xf32>
    %cst_65 = arith.constant dense<0.000000e+00> : vector<128xf32>
    %326 = vector.multi_reduction <add>, %325, %cst_65 [0] : vector<32x128xf32> to vector<128xf32>
    %327 = vector.shape_cast %326 : vector<128xf32> to vector<1x128xf32>
    %328 = math.tanh %327 : vector<1x128xf32>
    %c1_i32_66 = arith.constant 1 : i32
    %329 = tpu.dynamic_rotate %316 by %c1_i32_66 dim 1 : vector<1x128xf32>, i32 -> vector<1x128xf32>
    %c127_i32_67 = arith.constant 127 : i32
    %330 = tpu.dynamic_rotate %316 by %c127_i32_67 dim 1 : vector<1x128xf32>, i32 -> vector<1x128xf32>
    %331 = arith.select %8, %25, %329 : vector<1x128xi1>, vector<1x128xf32>
    %332 = arith.select %10, %27, %330 : vector<1x128xi1>, vector<1x128xf32>
    %333 = arith.mulf %17, %316 : vector<1x128xf32>
    %334 = arith.mulf %19, %331 : vector<1x128xf32>
    %335 = arith.addf %333, %334 : vector<1x128xf32>
    %336 = arith.mulf %19, %332 : vector<1x128xf32>
    %337 = arith.addf %333, %336 : vector<1x128xf32>
    %338 = arith.mulf %328, %23 : vector<1x128xf32>
    %cst_68 = arith.constant 0.000000e+00 : f32
    %339 = vector.broadcast %cst_68 : f32 to vector<1x128xf32>
    %340 = arith.maximumf %338, %339 : vector<1x128xf32>
    %341 = arith.addf %21, %340 : vector<1x128xf32>
    %342 = arith.mulf %335, %341 : vector<1x128xf32>
    %cst_69 = arith.constant 0.000000e+00 : f32
    %343 = vector.broadcast %cst_69 : f32 to vector<1x128xf32>
    %344 = arith.minimumf %338, %343 : vector<1x128xf32>
    %345 = arith.subf %21, %344 : vector<1x128xf32>
    %346 = arith.mulf %337, %345 : vector<1x128xf32>
    %347 = arith.addf %342, %346 : vector<1x128xf32>
    %348 = arith.mulf %347, %14 : vector<1x128xf32>
    %349 = vector.broadcast %318 : f32 to vector<1x128xf32>
    %350 = arith.mulf %349, %348 : vector<1x128xf32>
    %351 = arith.addf %316, %350 : vector<1x128xf32>
    %352 = vector.broadcast %351 : vector<1x128xf32> to vector<32x128xf32>
    %353 = arith.mulf %32, %352 : vector<32x128xf32>
    %354 = math.tanh %353 : vector<32x128xf32>
    %355 = arith.truncf %354 : vector<32x128xf32> to vector<32x128xbf16>
    %cst_70 = arith.constant dense<0.000000e+00> : vector<32x128xf32>
    %356 = tpu.matmul %33, %355, %cst_70 {dimension_numbers = #tpu.dot_dimension_numbers<[1], [0], [0], [1], [0, 0, 1, 1], [], []>} : vector<32x32xbf16>, vector<32x128xbf16>, vector<32x128xf32> -> vector<32x128xf32>
    %357 = math.tanh %356 : vector<32x128xf32>
    %358 = arith.mulf %35, %357 : vector<32x128xf32>
    %cst_71 = arith.constant dense<0.000000e+00> : vector<128xf32>
    %359 = vector.multi_reduction <add>, %358, %cst_71 [0] : vector<32x128xf32> to vector<128xf32>
    %360 = vector.shape_cast %359 : vector<128xf32> to vector<1x128xf32>
    %361 = math.tanh %360 : vector<1x128xf32>
    %c1_i32_72 = arith.constant 1 : i32
    %362 = tpu.dynamic_rotate %351 by %c1_i32_72 dim 1 : vector<1x128xf32>, i32 -> vector<1x128xf32>
    %c127_i32_73 = arith.constant 127 : i32
    %363 = tpu.dynamic_rotate %351 by %c127_i32_73 dim 1 : vector<1x128xf32>, i32 -> vector<1x128xf32>
    %364 = arith.select %8, %25, %362 : vector<1x128xi1>, vector<1x128xf32>
    %365 = arith.select %10, %27, %363 : vector<1x128xi1>, vector<1x128xf32>
    %366 = arith.mulf %17, %351 : vector<1x128xf32>
    %367 = arith.mulf %19, %364 : vector<1x128xf32>
    %368 = arith.addf %366, %367 : vector<1x128xf32>
    %369 = arith.mulf %19, %365 : vector<1x128xf32>
    %370 = arith.addf %366, %369 : vector<1x128xf32>
    %371 = arith.mulf %361, %23 : vector<1x128xf32>
    %cst_74 = arith.constant 0.000000e+00 : f32
    %372 = vector.broadcast %cst_74 : f32 to vector<1x128xf32>
    %373 = arith.maximumf %371, %372 : vector<1x128xf32>
    %374 = arith.addf %21, %373 : vector<1x128xf32>
    %375 = arith.mulf %368, %374 : vector<1x128xf32>
    %cst_75 = arith.constant 0.000000e+00 : f32
    %376 = vector.broadcast %cst_75 : f32 to vector<1x128xf32>
    %377 = arith.minimumf %371, %376 : vector<1x128xf32>
    %378 = arith.subf %21, %377 : vector<1x128xf32>
    %379 = arith.mulf %370, %378 : vector<1x128xf32>
    %380 = arith.addf %375, %379 : vector<1x128xf32>
    %381 = arith.mulf %380, %14 : vector<1x128xf32>
    %382 = vector.broadcast %318 : f32 to vector<1x128xf32>
    %383 = arith.mulf %382, %381 : vector<1x128xf32>
    %384 = arith.addf %316, %383 : vector<1x128xf32>
    %385 = vector.broadcast %384 : vector<1x128xf32> to vector<32x128xf32>
    %386 = arith.mulf %32, %385 : vector<32x128xf32>
    %387 = math.tanh %386 : vector<32x128xf32>
    %388 = arith.truncf %387 : vector<32x128xf32> to vector<32x128xbf16>
    %cst_76 = arith.constant dense<0.000000e+00> : vector<32x128xf32>
    %389 = tpu.matmul %33, %388, %cst_76 {dimension_numbers = #tpu.dot_dimension_numbers<[1], [0], [0], [1], [0, 0, 1, 1], [], []>} : vector<32x32xbf16>, vector<32x128xbf16>, vector<32x128xf32> -> vector<32x128xf32>
    %390 = math.tanh %389 : vector<32x128xf32>
    %391 = arith.mulf %35, %390 : vector<32x128xf32>
    %cst_77 = arith.constant dense<0.000000e+00> : vector<128xf32>
    %392 = vector.multi_reduction <add>, %391, %cst_77 [0] : vector<32x128xf32> to vector<128xf32>
    %393 = vector.shape_cast %392 : vector<128xf32> to vector<1x128xf32>
    %394 = math.tanh %393 : vector<1x128xf32>
    %c1_i32_78 = arith.constant 1 : i32
    %395 = tpu.dynamic_rotate %384 by %c1_i32_78 dim 1 : vector<1x128xf32>, i32 -> vector<1x128xf32>
    %c127_i32_79 = arith.constant 127 : i32
    %396 = tpu.dynamic_rotate %384 by %c127_i32_79 dim 1 : vector<1x128xf32>, i32 -> vector<1x128xf32>
    %397 = arith.select %8, %25, %395 : vector<1x128xi1>, vector<1x128xf32>
    %398 = arith.select %10, %27, %396 : vector<1x128xi1>, vector<1x128xf32>
    %399 = arith.mulf %17, %384 : vector<1x128xf32>
    %400 = arith.mulf %19, %397 : vector<1x128xf32>
    %401 = arith.addf %399, %400 : vector<1x128xf32>
    %402 = arith.mulf %19, %398 : vector<1x128xf32>
    %403 = arith.addf %399, %402 : vector<1x128xf32>
    %404 = arith.mulf %394, %23 : vector<1x128xf32>
    %cst_80 = arith.constant 0.000000e+00 : f32
    %405 = vector.broadcast %cst_80 : f32 to vector<1x128xf32>
    %406 = arith.maximumf %404, %405 : vector<1x128xf32>
    %407 = arith.addf %21, %406 : vector<1x128xf32>
    %408 = arith.mulf %401, %407 : vector<1x128xf32>
    %cst_81 = arith.constant 0.000000e+00 : f32
    %409 = vector.broadcast %cst_81 : f32 to vector<1x128xf32>
    %410 = arith.minimumf %404, %409 : vector<1x128xf32>
    %411 = arith.subf %21, %410 : vector<1x128xf32>
    %412 = arith.mulf %403, %411 : vector<1x128xf32>
    %413 = arith.addf %408, %412 : vector<1x128xf32>
    %414 = arith.mulf %413, %14 : vector<1x128xf32>
    %415 = vector.broadcast %317 : f32 to vector<1x128xf32>
    %416 = arith.mulf %415, %414 : vector<1x128xf32>
    %417 = arith.addf %316, %416 : vector<1x128xf32>
    %418 = vector.broadcast %417 : vector<1x128xf32> to vector<32x128xf32>
    %419 = arith.mulf %32, %418 : vector<32x128xf32>
    %420 = math.tanh %419 : vector<32x128xf32>
    %421 = arith.truncf %420 : vector<32x128xf32> to vector<32x128xbf16>
    %cst_82 = arith.constant dense<0.000000e+00> : vector<32x128xf32>
    %422 = tpu.matmul %33, %421, %cst_82 {dimension_numbers = #tpu.dot_dimension_numbers<[1], [0], [0], [1], [0, 0, 1, 1], [], []>} : vector<32x32xbf16>, vector<32x128xbf16>, vector<32x128xf32> -> vector<32x128xf32>
    %423 = math.tanh %422 : vector<32x128xf32>
    %424 = arith.mulf %35, %423 : vector<32x128xf32>
    %cst_83 = arith.constant dense<0.000000e+00> : vector<128xf32>
    %425 = vector.multi_reduction <add>, %424, %cst_83 [0] : vector<32x128xf32> to vector<128xf32>
    %426 = vector.shape_cast %425 : vector<128xf32> to vector<1x128xf32>
    %427 = math.tanh %426 : vector<1x128xf32>
    %c1_i32_84 = arith.constant 1 : i32
    %428 = tpu.dynamic_rotate %417 by %c1_i32_84 dim 1 : vector<1x128xf32>, i32 -> vector<1x128xf32>
    %c127_i32_85 = arith.constant 127 : i32
    %429 = tpu.dynamic_rotate %417 by %c127_i32_85 dim 1 : vector<1x128xf32>, i32 -> vector<1x128xf32>
    %430 = arith.select %8, %25, %428 : vector<1x128xi1>, vector<1x128xf32>
    %431 = arith.select %10, %27, %429 : vector<1x128xi1>, vector<1x128xf32>
    %432 = arith.mulf %17, %417 : vector<1x128xf32>
    %433 = arith.mulf %19, %430 : vector<1x128xf32>
    %434 = arith.addf %432, %433 : vector<1x128xf32>
    %435 = arith.mulf %19, %431 : vector<1x128xf32>
    %436 = arith.addf %432, %435 : vector<1x128xf32>
    %437 = arith.mulf %427, %23 : vector<1x128xf32>
    %cst_86 = arith.constant 0.000000e+00 : f32
    %438 = vector.broadcast %cst_86 : f32 to vector<1x128xf32>
    %439 = arith.maximumf %437, %438 : vector<1x128xf32>
    %440 = arith.addf %21, %439 : vector<1x128xf32>
    %441 = arith.mulf %434, %440 : vector<1x128xf32>
    %cst_87 = arith.constant 0.000000e+00 : f32
    %442 = vector.broadcast %cst_87 : f32 to vector<1x128xf32>
    %443 = arith.minimumf %437, %442 : vector<1x128xf32>
    %444 = arith.subf %21, %443 : vector<1x128xf32>
    %445 = arith.mulf %436, %444 : vector<1x128xf32>
    %446 = arith.addf %441, %445 : vector<1x128xf32>
    %447 = arith.mulf %446, %14 : vector<1x128xf32>
    %cst_88 = arith.constant 6.000000e+00 : f32
    %448 = arith.divf %317, %cst_88 : f32
    %449 = arith.addf %381, %414 : vector<1x128xf32>
    %cst_89 = arith.constant 2.000000e+00 : f32
    %450 = vector.broadcast %cst_89 : f32 to vector<1x128xf32>
    %451 = arith.mulf %450, %449 : vector<1x128xf32>
    %452 = arith.addf %348, %451 : vector<1x128xf32>
    %453 = arith.addf %452, %447 : vector<1x128xf32>
    %454 = vector.broadcast %448 : f32 to vector<1x128xf32>
    %455 = arith.mulf %454, %453 : vector<1x128xf32>
    %456 = arith.addf %316, %455 : vector<1x128xf32>
    %c3_90 = arith.constant 3 : index
    %457 = memref.load %arg5[%c3_90] : memref<7xf32, #tpu.memory_space<smem>>
    %cst_91 = arith.constant 5.000000e-01 : f32
    %458 = arith.mulf %cst_91, %457 : f32
    %459 = vector.broadcast %456 : vector<1x128xf32> to vector<32x128xf32>
    %460 = arith.mulf %32, %459 : vector<32x128xf32>
    %461 = math.tanh %460 : vector<32x128xf32>
    %462 = arith.truncf %461 : vector<32x128xf32> to vector<32x128xbf16>
    %cst_92 = arith.constant dense<0.000000e+00> : vector<32x128xf32>
    %463 = tpu.matmul %33, %462, %cst_92 {dimension_numbers = #tpu.dot_dimension_numbers<[1], [0], [0], [1], [0, 0, 1, 1], [], []>} : vector<32x32xbf16>, vector<32x128xbf16>, vector<32x128xf32> -> vector<32x128xf32>
    %464 = math.tanh %463 : vector<32x128xf32>
    %465 = arith.mulf %35, %464 : vector<32x128xf32>
    %cst_93 = arith.constant dense<0.000000e+00> : vector<128xf32>
    %466 = vector.multi_reduction <add>, %465, %cst_93 [0] : vector<32x128xf32> to vector<128xf32>
    %467 = vector.shape_cast %466 : vector<128xf32> to vector<1x128xf32>
    %468 = math.tanh %467 : vector<1x128xf32>
    %c1_i32_94 = arith.constant 1 : i32
    %469 = tpu.dynamic_rotate %456 by %c1_i32_94 dim 1 : vector<1x128xf32>, i32 -> vector<1x128xf32>
    %c127_i32_95 = arith.constant 127 : i32
    %470 = tpu.dynamic_rotate %456 by %c127_i32_95 dim 1 : vector<1x128xf32>, i32 -> vector<1x128xf32>
    %471 = arith.select %8, %25, %469 : vector<1x128xi1>, vector<1x128xf32>
    %472 = arith.select %10, %27, %470 : vector<1x128xi1>, vector<1x128xf32>
    %473 = arith.mulf %17, %456 : vector<1x128xf32>
    %474 = arith.mulf %19, %471 : vector<1x128xf32>
    %475 = arith.addf %473, %474 : vector<1x128xf32>
    %476 = arith.mulf %19, %472 : vector<1x128xf32>
    %477 = arith.addf %473, %476 : vector<1x128xf32>
    %478 = arith.mulf %468, %23 : vector<1x128xf32>
    %cst_96 = arith.constant 0.000000e+00 : f32
    %479 = vector.broadcast %cst_96 : f32 to vector<1x128xf32>
    %480 = arith.maximumf %478, %479 : vector<1x128xf32>
    %481 = arith.addf %21, %480 : vector<1x128xf32>
    %482 = arith.mulf %475, %481 : vector<1x128xf32>
    %cst_97 = arith.constant 0.000000e+00 : f32
    %483 = vector.broadcast %cst_97 : f32 to vector<1x128xf32>
    %484 = arith.minimumf %478, %483 : vector<1x128xf32>
    %485 = arith.subf %21, %484 : vector<1x128xf32>
    %486 = arith.mulf %477, %485 : vector<1x128xf32>
    %487 = arith.addf %482, %486 : vector<1x128xf32>
    %488 = arith.mulf %487, %14 : vector<1x128xf32>
    %489 = vector.broadcast %458 : f32 to vector<1x128xf32>
    %490 = arith.mulf %489, %488 : vector<1x128xf32>
    %491 = arith.addf %456, %490 : vector<1x128xf32>
    %492 = vector.broadcast %491 : vector<1x128xf32> to vector<32x128xf32>
    %493 = arith.mulf %32, %492 : vector<32x128xf32>
    %494 = math.tanh %493 : vector<32x128xf32>
    %495 = arith.truncf %494 : vector<32x128xf32> to vector<32x128xbf16>
    %cst_98 = arith.constant dense<0.000000e+00> : vector<32x128xf32>
    %496 = tpu.matmul %33, %495, %cst_98 {dimension_numbers = #tpu.dot_dimension_numbers<[1], [0], [0], [1], [0, 0, 1, 1], [], []>} : vector<32x32xbf16>, vector<32x128xbf16>, vector<32x128xf32> -> vector<32x128xf32>
    %497 = math.tanh %496 : vector<32x128xf32>
    %498 = arith.mulf %35, %497 : vector<32x128xf32>
    %cst_99 = arith.constant dense<0.000000e+00> : vector<128xf32>
    %499 = vector.multi_reduction <add>, %498, %cst_99 [0] : vector<32x128xf32> to vector<128xf32>
    %500 = vector.shape_cast %499 : vector<128xf32> to vector<1x128xf32>
    %501 = math.tanh %500 : vector<1x128xf32>
    %c1_i32_100 = arith.constant 1 : i32
    %502 = tpu.dynamic_rotate %491 by %c1_i32_100 dim 1 : vector<1x128xf32>, i32 -> vector<1x128xf32>
    %c127_i32_101 = arith.constant 127 : i32
    %503 = tpu.dynamic_rotate %491 by %c127_i32_101 dim 1 : vector<1x128xf32>, i32 -> vector<1x128xf32>
    %504 = arith.select %8, %25, %502 : vector<1x128xi1>, vector<1x128xf32>
    %505 = arith.select %10, %27, %503 : vector<1x128xi1>, vector<1x128xf32>
    %506 = arith.mulf %17, %491 : vector<1x128xf32>
    %507 = arith.mulf %19, %504 : vector<1x128xf32>
    %508 = arith.addf %506, %507 : vector<1x128xf32>
    %509 = arith.mulf %19, %505 : vector<1x128xf32>
    %510 = arith.addf %506, %509 : vector<1x128xf32>
    %511 = arith.mulf %501, %23 : vector<1x128xf32>
    %cst_102 = arith.constant 0.000000e+00 : f32
    %512 = vector.broadcast %cst_102 : f32 to vector<1x128xf32>
    %513 = arith.maximumf %511, %512 : vector<1x128xf32>
    %514 = arith.addf %21, %513 : vector<1x128xf32>
    %515 = arith.mulf %508, %514 : vector<1x128xf32>
    %cst_103 = arith.constant 0.000000e+00 : f32
    %516 = vector.broadcast %cst_103 : f32 to vector<1x128xf32>
    %517 = arith.minimumf %511, %516 : vector<1x128xf32>
    %518 = arith.subf %21, %517 : vector<1x128xf32>
    %519 = arith.mulf %510, %518 : vector<1x128xf32>
    %520 = arith.addf %515, %519 : vector<1x128xf32>
    %521 = arith.mulf %520, %14 : vector<1x128xf32>
    %522 = vector.broadcast %458 : f32 to vector<1x128xf32>
    %523 = arith.mulf %522, %521 : vector<1x128xf32>
    %524 = arith.addf %456, %523 : vector<1x128xf32>
    %525 = vector.broadcast %524 : vector<1x128xf32> to vector<32x128xf32>
    %526 = arith.mulf %32, %525 : vector<32x128xf32>
    %527 = math.tanh %526 : vector<32x128xf32>
    %528 = arith.truncf %527 : vector<32x128xf32> to vector<32x128xbf16>
    %cst_104 = arith.constant dense<0.000000e+00> : vector<32x128xf32>
    %529 = tpu.matmul %33, %528, %cst_104 {dimension_numbers = #tpu.dot_dimension_numbers<[1], [0], [0], [1], [0, 0, 1, 1], [], []>} : vector<32x32xbf16>, vector<32x128xbf16>, vector<32x128xf32> -> vector<32x128xf32>
    %530 = math.tanh %529 : vector<32x128xf32>
    %531 = arith.mulf %35, %530 : vector<32x128xf32>
    %cst_105 = arith.constant dense<0.000000e+00> : vector<128xf32>
    %532 = vector.multi_reduction <add>, %531, %cst_105 [0] : vector<32x128xf32> to vector<128xf32>
    %533 = vector.shape_cast %532 : vector<128xf32> to vector<1x128xf32>
    %534 = math.tanh %533 : vector<1x128xf32>
    %c1_i32_106 = arith.constant 1 : i32
    %535 = tpu.dynamic_rotate %524 by %c1_i32_106 dim 1 : vector<1x128xf32>, i32 -> vector<1x128xf32>
    %c127_i32_107 = arith.constant 127 : i32
    %536 = tpu.dynamic_rotate %524 by %c127_i32_107 dim 1 : vector<1x128xf32>, i32 -> vector<1x128xf32>
    %537 = arith.select %8, %25, %535 : vector<1x128xi1>, vector<1x128xf32>
    %538 = arith.select %10, %27, %536 : vector<1x128xi1>, vector<1x128xf32>
    %539 = arith.mulf %17, %524 : vector<1x128xf32>
    %540 = arith.mulf %19, %537 : vector<1x128xf32>
    %541 = arith.addf %539, %540 : vector<1x128xf32>
    %542 = arith.mulf %19, %538 : vector<1x128xf32>
    %543 = arith.addf %539, %542 : vector<1x128xf32>
    %544 = arith.mulf %534, %23 : vector<1x128xf32>
    %cst_108 = arith.constant 0.000000e+00 : f32
    %545 = vector.broadcast %cst_108 : f32 to vector<1x128xf32>
    %546 = arith.maximumf %544, %545 : vector<1x128xf32>
    %547 = arith.addf %21, %546 : vector<1x128xf32>
    %548 = arith.mulf %541, %547 : vector<1x128xf32>
    %cst_109 = arith.constant 0.000000e+00 : f32
    %549 = vector.broadcast %cst_109 : f32 to vector<1x128xf32>
    %550 = arith.minimumf %544, %549 : vector<1x128xf32>
    %551 = arith.subf %21, %550 : vector<1x128xf32>
    %552 = arith.mulf %543, %551 : vector<1x128xf32>
    %553 = arith.addf %548, %552 : vector<1x128xf32>
    %554 = arith.mulf %553, %14 : vector<1x128xf32>
    %555 = vector.broadcast %457 : f32 to vector<1x128xf32>
    %556 = arith.mulf %555, %554 : vector<1x128xf32>
    %557 = arith.addf %456, %556 : vector<1x128xf32>
    %558 = vector.broadcast %557 : vector<1x128xf32> to vector<32x128xf32>
    %559 = arith.mulf %32, %558 : vector<32x128xf32>
    %560 = math.tanh %559 : vector<32x128xf32>
    %561 = arith.truncf %560 : vector<32x128xf32> to vector<32x128xbf16>
    %cst_110 = arith.constant dense<0.000000e+00> : vector<32x128xf32>
    %562 = tpu.matmul %33, %561, %cst_110 {dimension_numbers = #tpu.dot_dimension_numbers<[1], [0], [0], [1], [0, 0, 1, 1], [], []>} : vector<32x32xbf16>, vector<32x128xbf16>, vector<32x128xf32> -> vector<32x128xf32>
    %563 = math.tanh %562 : vector<32x128xf32>
    %564 = arith.mulf %35, %563 : vector<32x128xf32>
    %cst_111 = arith.constant dense<0.000000e+00> : vector<128xf32>
    %565 = vector.multi_reduction <add>, %564, %cst_111 [0] : vector<32x128xf32> to vector<128xf32>
    %566 = vector.shape_cast %565 : vector<128xf32> to vector<1x128xf32>
    %567 = math.tanh %566 : vector<1x128xf32>
    %c1_i32_112 = arith.constant 1 : i32
    %568 = tpu.dynamic_rotate %557 by %c1_i32_112 dim 1 : vector<1x128xf32>, i32 -> vector<1x128xf32>
    %c127_i32_113 = arith.constant 127 : i32
    %569 = tpu.dynamic_rotate %557 by %c127_i32_113 dim 1 : vector<1x128xf32>, i32 -> vector<1x128xf32>
    %570 = arith.select %8, %25, %568 : vector<1x128xi1>, vector<1x128xf32>
    %571 = arith.select %10, %27, %569 : vector<1x128xi1>, vector<1x128xf32>
    %572 = arith.mulf %17, %557 : vector<1x128xf32>
    %573 = arith.mulf %19, %570 : vector<1x128xf32>
    %574 = arith.addf %572, %573 : vector<1x128xf32>
    %575 = arith.mulf %19, %571 : vector<1x128xf32>
    %576 = arith.addf %572, %575 : vector<1x128xf32>
    %577 = arith.mulf %567, %23 : vector<1x128xf32>
    %cst_114 = arith.constant 0.000000e+00 : f32
    %578 = vector.broadcast %cst_114 : f32 to vector<1x128xf32>
    %579 = arith.maximumf %577, %578 : vector<1x128xf32>
    %580 = arith.addf %21, %579 : vector<1x128xf32>
    %581 = arith.mulf %574, %580 : vector<1x128xf32>
    %cst_115 = arith.constant 0.000000e+00 : f32
    %582 = vector.broadcast %cst_115 : f32 to vector<1x128xf32>
    %583 = arith.minimumf %577, %582 : vector<1x128xf32>
    %584 = arith.subf %21, %583 : vector<1x128xf32>
    %585 = arith.mulf %576, %584 : vector<1x128xf32>
    %586 = arith.addf %581, %585 : vector<1x128xf32>
    %587 = arith.mulf %586, %14 : vector<1x128xf32>
    %cst_116 = arith.constant 6.000000e+00 : f32
    %588 = arith.divf %457, %cst_116 : f32
    %589 = arith.addf %521, %554 : vector<1x128xf32>
    %cst_117 = arith.constant 2.000000e+00 : f32
    %590 = vector.broadcast %cst_117 : f32 to vector<1x128xf32>
    %591 = arith.mulf %590, %589 : vector<1x128xf32>
    %592 = arith.addf %488, %591 : vector<1x128xf32>
    %593 = arith.addf %592, %587 : vector<1x128xf32>
    %594 = vector.broadcast %588 : f32 to vector<1x128xf32>
    %595 = arith.mulf %594, %593 : vector<1x128xf32>
    %596 = arith.addf %456, %595 : vector<1x128xf32>
    %c4_118 = arith.constant 4 : index
    %597 = memref.load %arg5[%c4_118] : memref<7xf32, #tpu.memory_space<smem>>
    %cst_119 = arith.constant 5.000000e-01 : f32
    %598 = arith.mulf %cst_119, %597 : f32
    %599 = vector.broadcast %596 : vector<1x128xf32> to vector<32x128xf32>
    %600 = arith.mulf %32, %599 : vector<32x128xf32>
    %601 = math.tanh %600 : vector<32x128xf32>
    %602 = arith.truncf %601 : vector<32x128xf32> to vector<32x128xbf16>
    %cst_120 = arith.constant dense<0.000000e+00> : vector<32x128xf32>
    %603 = tpu.matmul %33, %602, %cst_120 {dimension_numbers = #tpu.dot_dimension_numbers<[1], [0], [0], [1], [0, 0, 1, 1], [], []>} : vector<32x32xbf16>, vector<32x128xbf16>, vector<32x128xf32> -> vector<32x128xf32>
    %604 = math.tanh %603 : vector<32x128xf32>
    %605 = arith.mulf %35, %604 : vector<32x128xf32>
    %cst_121 = arith.constant dense<0.000000e+00> : vector<128xf32>
    %606 = vector.multi_reduction <add>, %605, %cst_121 [0] : vector<32x128xf32> to vector<128xf32>
    %607 = vector.shape_cast %606 : vector<128xf32> to vector<1x128xf32>
    %608 = math.tanh %607 : vector<1x128xf32>
    %c1_i32_122 = arith.constant 1 : i32
    %609 = tpu.dynamic_rotate %596 by %c1_i32_122 dim 1 : vector<1x128xf32>, i32 -> vector<1x128xf32>
    %c127_i32_123 = arith.constant 127 : i32
    %610 = tpu.dynamic_rotate %596 by %c127_i32_123 dim 1 : vector<1x128xf32>, i32 -> vector<1x128xf32>
    %611 = arith.select %8, %25, %609 : vector<1x128xi1>, vector<1x128xf32>
    %612 = arith.select %10, %27, %610 : vector<1x128xi1>, vector<1x128xf32>
    %613 = arith.mulf %17, %596 : vector<1x128xf32>
    %614 = arith.mulf %19, %611 : vector<1x128xf32>
    %615 = arith.addf %613, %614 : vector<1x128xf32>
    %616 = arith.mulf %19, %612 : vector<1x128xf32>
    %617 = arith.addf %613, %616 : vector<1x128xf32>
    %618 = arith.mulf %608, %23 : vector<1x128xf32>
    %cst_124 = arith.constant 0.000000e+00 : f32
    %619 = vector.broadcast %cst_124 : f32 to vector<1x128xf32>
    %620 = arith.maximumf %618, %619 : vector<1x128xf32>
    %621 = arith.addf %21, %620 : vector<1x128xf32>
    %622 = arith.mulf %615, %621 : vector<1x128xf32>
    %cst_125 = arith.constant 0.000000e+00 : f32
    %623 = vector.broadcast %cst_125 : f32 to vector<1x128xf32>
    %624 = arith.minimumf %618, %623 : vector<1x128xf32>
    %625 = arith.subf %21, %624 : vector<1x128xf32>
    %626 = arith.mulf %617, %625 : vector<1x128xf32>
    %627 = arith.addf %622, %626 : vector<1x128xf32>
    %628 = arith.mulf %627, %14 : vector<1x128xf32>
    %629 = vector.broadcast %598 : f32 to vector<1x128xf32>
    %630 = arith.mulf %629, %628 : vector<1x128xf32>
    %631 = arith.addf %596, %630 : vector<1x128xf32>
    %632 = vector.broadcast %631 : vector<1x128xf32> to vector<32x128xf32>
    %633 = arith.mulf %32, %632 : vector<32x128xf32>
    %634 = math.tanh %633 : vector<32x128xf32>
    %635 = arith.truncf %634 : vector<32x128xf32> to vector<32x128xbf16>
    %cst_126 = arith.constant dense<0.000000e+00> : vector<32x128xf32>
    %636 = tpu.matmul %33, %635, %cst_126 {dimension_numbers = #tpu.dot_dimension_numbers<[1], [0], [0], [1], [0, 0, 1, 1], [], []>} : vector<32x32xbf16>, vector<32x128xbf16>, vector<32x128xf32> -> vector<32x128xf32>
    %637 = math.tanh %636 : vector<32x128xf32>
    %638 = arith.mulf %35, %637 : vector<32x128xf32>
    %cst_127 = arith.constant dense<0.000000e+00> : vector<128xf32>
    %639 = vector.multi_reduction <add>, %638, %cst_127 [0] : vector<32x128xf32> to vector<128xf32>
    %640 = vector.shape_cast %639 : vector<128xf32> to vector<1x128xf32>
    %641 = math.tanh %640 : vector<1x128xf32>
    %c1_i32_128 = arith.constant 1 : i32
    %642 = tpu.dynamic_rotate %631 by %c1_i32_128 dim 1 : vector<1x128xf32>, i32 -> vector<1x128xf32>
    %c127_i32_129 = arith.constant 127 : i32
    %643 = tpu.dynamic_rotate %631 by %c127_i32_129 dim 1 : vector<1x128xf32>, i32 -> vector<1x128xf32>
    %644 = arith.select %8, %25, %642 : vector<1x128xi1>, vector<1x128xf32>
    %645 = arith.select %10, %27, %643 : vector<1x128xi1>, vector<1x128xf32>
    %646 = arith.mulf %17, %631 : vector<1x128xf32>
    %647 = arith.mulf %19, %644 : vector<1x128xf32>
    %648 = arith.addf %646, %647 : vector<1x128xf32>
    %649 = arith.mulf %19, %645 : vector<1x128xf32>
    %650 = arith.addf %646, %649 : vector<1x128xf32>
    %651 = arith.mulf %641, %23 : vector<1x128xf32>
    %cst_130 = arith.constant 0.000000e+00 : f32
    %652 = vector.broadcast %cst_130 : f32 to vector<1x128xf32>
    %653 = arith.maximumf %651, %652 : vector<1x128xf32>
    %654 = arith.addf %21, %653 : vector<1x128xf32>
    %655 = arith.mulf %648, %654 : vector<1x128xf32>
    %cst_131 = arith.constant 0.000000e+00 : f32
    %656 = vector.broadcast %cst_131 : f32 to vector<1x128xf32>
    %657 = arith.minimumf %651, %656 : vector<1x128xf32>
    %658 = arith.subf %21, %657 : vector<1x128xf32>
    %659 = arith.mulf %650, %658 : vector<1x128xf32>
    %660 = arith.addf %655, %659 : vector<1x128xf32>
    %661 = arith.mulf %660, %14 : vector<1x128xf32>
    %662 = vector.broadcast %598 : f32 to vector<1x128xf32>
    %663 = arith.mulf %662, %661 : vector<1x128xf32>
    %664 = arith.addf %596, %663 : vector<1x128xf32>
    %665 = vector.broadcast %664 : vector<1x128xf32> to vector<32x128xf32>
    %666 = arith.mulf %32, %665 : vector<32x128xf32>
    %667 = math.tanh %666 : vector<32x128xf32>
    %668 = arith.truncf %667 : vector<32x128xf32> to vector<32x128xbf16>
    %cst_132 = arith.constant dense<0.000000e+00> : vector<32x128xf32>
    %669 = tpu.matmul %33, %668, %cst_132 {dimension_numbers = #tpu.dot_dimension_numbers<[1], [0], [0], [1], [0, 0, 1, 1], [], []>} : vector<32x32xbf16>, vector<32x128xbf16>, vector<32x128xf32> -> vector<32x128xf32>
    %670 = math.tanh %669 : vector<32x128xf32>
    %671 = arith.mulf %35, %670 : vector<32x128xf32>
    %cst_133 = arith.constant dense<0.000000e+00> : vector<128xf32>
    %672 = vector.multi_reduction <add>, %671, %cst_133 [0] : vector<32x128xf32> to vector<128xf32>
    %673 = vector.shape_cast %672 : vector<128xf32> to vector<1x128xf32>
    %674 = math.tanh %673 : vector<1x128xf32>
    %c1_i32_134 = arith.constant 1 : i32
    %675 = tpu.dynamic_rotate %664 by %c1_i32_134 dim 1 : vector<1x128xf32>, i32 -> vector<1x128xf32>
    %c127_i32_135 = arith.constant 127 : i32
    %676 = tpu.dynamic_rotate %664 by %c127_i32_135 dim 1 : vector<1x128xf32>, i32 -> vector<1x128xf32>
    %677 = arith.select %8, %25, %675 : vector<1x128xi1>, vector<1x128xf32>
    %678 = arith.select %10, %27, %676 : vector<1x128xi1>, vector<1x128xf32>
    %679 = arith.mulf %17, %664 : vector<1x128xf32>
    %680 = arith.mulf %19, %677 : vector<1x128xf32>
    %681 = arith.addf %679, %680 : vector<1x128xf32>
    %682 = arith.mulf %19, %678 : vector<1x128xf32>
    %683 = arith.addf %679, %682 : vector<1x128xf32>
    %684 = arith.mulf %674, %23 : vector<1x128xf32>
    %cst_136 = arith.constant 0.000000e+00 : f32
    %685 = vector.broadcast %cst_136 : f32 to vector<1x128xf32>
    %686 = arith.maximumf %684, %685 : vector<1x128xf32>
    %687 = arith.addf %21, %686 : vector<1x128xf32>
    %688 = arith.mulf %681, %687 : vector<1x128xf32>
    %cst_137 = arith.constant 0.000000e+00 : f32
    %689 = vector.broadcast %cst_137 : f32 to vector<1x128xf32>
    %690 = arith.minimumf %684, %689 : vector<1x128xf32>
    %691 = arith.subf %21, %690 : vector<1x128xf32>
    %692 = arith.mulf %683, %691 : vector<1x128xf32>
    %693 = arith.addf %688, %692 : vector<1x128xf32>
    %694 = arith.mulf %693, %14 : vector<1x128xf32>
    %695 = vector.broadcast %597 : f32 to vector<1x128xf32>
    %696 = arith.mulf %695, %694 : vector<1x128xf32>
    %697 = arith.addf %596, %696 : vector<1x128xf32>
    %698 = vector.broadcast %697 : vector<1x128xf32> to vector<32x128xf32>
    %699 = arith.mulf %32, %698 : vector<32x128xf32>
    %700 = math.tanh %699 : vector<32x128xf32>
    %701 = arith.truncf %700 : vector<32x128xf32> to vector<32x128xbf16>
    %cst_138 = arith.constant dense<0.000000e+00> : vector<32x128xf32>
    %702 = tpu.matmul %33, %701, %cst_138 {dimension_numbers = #tpu.dot_dimension_numbers<[1], [0], [0], [1], [0, 0, 1, 1], [], []>} : vector<32x32xbf16>, vector<32x128xbf16>, vector<32x128xf32> -> vector<32x128xf32>
    %703 = math.tanh %702 : vector<32x128xf32>
    %704 = arith.mulf %35, %703 : vector<32x128xf32>
    %cst_139 = arith.constant dense<0.000000e+00> : vector<128xf32>
    %705 = vector.multi_reduction <add>, %704, %cst_139 [0] : vector<32x128xf32> to vector<128xf32>
    %706 = vector.shape_cast %705 : vector<128xf32> to vector<1x128xf32>
    %707 = math.tanh %706 : vector<1x128xf32>
    %c1_i32_140 = arith.constant 1 : i32
    %708 = tpu.dynamic_rotate %697 by %c1_i32_140 dim 1 : vector<1x128xf32>, i32 -> vector<1x128xf32>
    %c127_i32_141 = arith.constant 127 : i32
    %709 = tpu.dynamic_rotate %697 by %c127_i32_141 dim 1 : vector<1x128xf32>, i32 -> vector<1x128xf32>
    %710 = arith.select %8, %25, %708 : vector<1x128xi1>, vector<1x128xf32>
    %711 = arith.select %10, %27, %709 : vector<1x128xi1>, vector<1x128xf32>
    %712 = arith.mulf %17, %697 : vector<1x128xf32>
    %713 = arith.mulf %19, %710 : vector<1x128xf32>
    %714 = arith.addf %712, %713 : vector<1x128xf32>
    %715 = arith.mulf %19, %711 : vector<1x128xf32>
    %716 = arith.addf %712, %715 : vector<1x128xf32>
    %717 = arith.mulf %707, %23 : vector<1x128xf32>
    %cst_142 = arith.constant 0.000000e+00 : f32
    %718 = vector.broadcast %cst_142 : f32 to vector<1x128xf32>
    %719 = arith.maximumf %717, %718 : vector<1x128xf32>
    %720 = arith.addf %21, %719 : vector<1x128xf32>
    %721 = arith.mulf %714, %720 : vector<1x128xf32>
    %cst_143 = arith.constant 0.000000e+00 : f32
    %722 = vector.broadcast %cst_143 : f32 to vector<1x128xf32>
    %723 = arith.minimumf %717, %722 : vector<1x128xf32>
    %724 = arith.subf %21, %723 : vector<1x128xf32>
    %725 = arith.mulf %716, %724 : vector<1x128xf32>
    %726 = arith.addf %721, %725 : vector<1x128xf32>
    %727 = arith.mulf %726, %14 : vector<1x128xf32>
    %cst_144 = arith.constant 6.000000e+00 : f32
    %728 = arith.divf %597, %cst_144 : f32
    %729 = arith.addf %661, %694 : vector<1x128xf32>
    %cst_145 = arith.constant 2.000000e+00 : f32
    %730 = vector.broadcast %cst_145 : f32 to vector<1x128xf32>
    %731 = arith.mulf %730, %729 : vector<1x128xf32>
    %732 = arith.addf %628, %731 : vector<1x128xf32>
    %733 = arith.addf %732, %727 : vector<1x128xf32>
    %734 = vector.broadcast %728 : f32 to vector<1x128xf32>
    %735 = arith.mulf %734, %733 : vector<1x128xf32>
    %736 = arith.addf %596, %735 : vector<1x128xf32>
    %c5_146 = arith.constant 5 : index
    %737 = memref.load %arg5[%c5_146] : memref<7xf32, #tpu.memory_space<smem>>
    %cst_147 = arith.constant 5.000000e-01 : f32
    %738 = arith.mulf %cst_147, %737 : f32
    %739 = vector.broadcast %736 : vector<1x128xf32> to vector<32x128xf32>
    %740 = arith.mulf %32, %739 : vector<32x128xf32>
    %741 = math.tanh %740 : vector<32x128xf32>
    %742 = arith.truncf %741 : vector<32x128xf32> to vector<32x128xbf16>
    %cst_148 = arith.constant dense<0.000000e+00> : vector<32x128xf32>
    %743 = tpu.matmul %33, %742, %cst_148 {dimension_numbers = #tpu.dot_dimension_numbers<[1], [0], [0], [1], [0, 0, 1, 1], [], []>} : vector<32x32xbf16>, vector<32x128xbf16>, vector<32x128xf32> -> vector<32x128xf32>
    %744 = math.tanh %743 : vector<32x128xf32>
    %745 = arith.mulf %35, %744 : vector<32x128xf32>
    %cst_149 = arith.constant dense<0.000000e+00> : vector<128xf32>
    %746 = vector.multi_reduction <add>, %745, %cst_149 [0] : vector<32x128xf32> to vector<128xf32>
    %747 = vector.shape_cast %746 : vector<128xf32> to vector<1x128xf32>
    %748 = math.tanh %747 : vector<1x128xf32>
    %c1_i32_150 = arith.constant 1 : i32
    %749 = tpu.dynamic_rotate %736 by %c1_i32_150 dim 1 : vector<1x128xf32>, i32 -> vector<1x128xf32>
    %c127_i32_151 = arith.constant 127 : i32
    %750 = tpu.dynamic_rotate %736 by %c127_i32_151 dim 1 : vector<1x128xf32>, i32 -> vector<1x128xf32>
    %751 = arith.select %8, %25, %749 : vector<1x128xi1>, vector<1x128xf32>
    %752 = arith.select %10, %27, %750 : vector<1x128xi1>, vector<1x128xf32>
    %753 = arith.mulf %17, %736 : vector<1x128xf32>
    %754 = arith.mulf %19, %751 : vector<1x128xf32>
    %755 = arith.addf %753, %754 : vector<1x128xf32>
    %756 = arith.mulf %19, %752 : vector<1x128xf32>
    %757 = arith.addf %753, %756 : vector<1x128xf32>
    %758 = arith.mulf %748, %23 : vector<1x128xf32>
    %cst_152 = arith.constant 0.000000e+00 : f32
    %759 = vector.broadcast %cst_152 : f32 to vector<1x128xf32>
    %760 = arith.maximumf %758, %759 : vector<1x128xf32>
    %761 = arith.addf %21, %760 : vector<1x128xf32>
    %762 = arith.mulf %755, %761 : vector<1x128xf32>
    %cst_153 = arith.constant 0.000000e+00 : f32
    %763 = vector.broadcast %cst_153 : f32 to vector<1x128xf32>
    %764 = arith.minimumf %758, %763 : vector<1x128xf32>
    %765 = arith.subf %21, %764 : vector<1x128xf32>
    %766 = arith.mulf %757, %765 : vector<1x128xf32>
    %767 = arith.addf %762, %766 : vector<1x128xf32>
    %768 = arith.mulf %767, %14 : vector<1x128xf32>
    %769 = vector.broadcast %738 : f32 to vector<1x128xf32>
    %770 = arith.mulf %769, %768 : vector<1x128xf32>
    %771 = arith.addf %736, %770 : vector<1x128xf32>
    %772 = vector.broadcast %771 : vector<1x128xf32> to vector<32x128xf32>
    %773 = arith.mulf %32, %772 : vector<32x128xf32>
    %774 = math.tanh %773 : vector<32x128xf32>
    %775 = arith.truncf %774 : vector<32x128xf32> to vector<32x128xbf16>
    %cst_154 = arith.constant dense<0.000000e+00> : vector<32x128xf32>
    %776 = tpu.matmul %33, %775, %cst_154 {dimension_numbers = #tpu.dot_dimension_numbers<[1], [0], [0], [1], [0, 0, 1, 1], [], []>} : vector<32x32xbf16>, vector<32x128xbf16>, vector<32x128xf32> -> vector<32x128xf32>
    %777 = math.tanh %776 : vector<32x128xf32>
    %778 = arith.mulf %35, %777 : vector<32x128xf32>
    %cst_155 = arith.constant dense<0.000000e+00> : vector<128xf32>
    %779 = vector.multi_reduction <add>, %778, %cst_155 [0] : vector<32x128xf32> to vector<128xf32>
    %780 = vector.shape_cast %779 : vector<128xf32> to vector<1x128xf32>
    %781 = math.tanh %780 : vector<1x128xf32>
    %c1_i32_156 = arith.constant 1 : i32
    %782 = tpu.dynamic_rotate %771 by %c1_i32_156 dim 1 : vector<1x128xf32>, i32 -> vector<1x128xf32>
    %c127_i32_157 = arith.constant 127 : i32
    %783 = tpu.dynamic_rotate %771 by %c127_i32_157 dim 1 : vector<1x128xf32>, i32 -> vector<1x128xf32>
    %784 = arith.select %8, %25, %782 : vector<1x128xi1>, vector<1x128xf32>
    %785 = arith.select %10, %27, %783 : vector<1x128xi1>, vector<1x128xf32>
    %786 = arith.mulf %17, %771 : vector<1x128xf32>
    %787 = arith.mulf %19, %784 : vector<1x128xf32>
    %788 = arith.addf %786, %787 : vector<1x128xf32>
    %789 = arith.mulf %19, %785 : vector<1x128xf32>
    %790 = arith.addf %786, %789 : vector<1x128xf32>
    %791 = arith.mulf %781, %23 : vector<1x128xf32>
    %cst_158 = arith.constant 0.000000e+00 : f32
    %792 = vector.broadcast %cst_158 : f32 to vector<1x128xf32>
    %793 = arith.maximumf %791, %792 : vector<1x128xf32>
    %794 = arith.addf %21, %793 : vector<1x128xf32>
    %795 = arith.mulf %788, %794 : vector<1x128xf32>
    %cst_159 = arith.constant 0.000000e+00 : f32
    %796 = vector.broadcast %cst_159 : f32 to vector<1x128xf32>
    %797 = arith.minimumf %791, %796 : vector<1x128xf32>
    %798 = arith.subf %21, %797 : vector<1x128xf32>
    %799 = arith.mulf %790, %798 : vector<1x128xf32>
    %800 = arith.addf %795, %799 : vector<1x128xf32>
    %801 = arith.mulf %800, %14 : vector<1x128xf32>
    %802 = vector.broadcast %738 : f32 to vector<1x128xf32>
    %803 = arith.mulf %802, %801 : vector<1x128xf32>
    %804 = arith.addf %736, %803 : vector<1x128xf32>
    %805 = vector.broadcast %804 : vector<1x128xf32> to vector<32x128xf32>
    %806 = arith.mulf %32, %805 : vector<32x128xf32>
    %807 = math.tanh %806 : vector<32x128xf32>
    %808 = arith.truncf %807 : vector<32x128xf32> to vector<32x128xbf16>
    %cst_160 = arith.constant dense<0.000000e+00> : vector<32x128xf32>
    %809 = tpu.matmul %33, %808, %cst_160 {dimension_numbers = #tpu.dot_dimension_numbers<[1], [0], [0], [1], [0, 0, 1, 1], [], []>} : vector<32x32xbf16>, vector<32x128xbf16>, vector<32x128xf32> -> vector<32x128xf32>
    %810 = math.tanh %809 : vector<32x128xf32>
    %811 = arith.mulf %35, %810 : vector<32x128xf32>
    %cst_161 = arith.constant dense<0.000000e+00> : vector<128xf32>
    %812 = vector.multi_reduction <add>, %811, %cst_161 [0] : vector<32x128xf32> to vector<128xf32>
    %813 = vector.shape_cast %812 : vector<128xf32> to vector<1x128xf32>
    %814 = math.tanh %813 : vector<1x128xf32>
    %c1_i32_162 = arith.constant 1 : i32
    %815 = tpu.dynamic_rotate %804 by %c1_i32_162 dim 1 : vector<1x128xf32>, i32 -> vector<1x128xf32>
    %c127_i32_163 = arith.constant 127 : i32
    %816 = tpu.dynamic_rotate %804 by %c127_i32_163 dim 1 : vector<1x128xf32>, i32 -> vector<1x128xf32>
    %817 = arith.select %8, %25, %815 : vector<1x128xi1>, vector<1x128xf32>
    %818 = arith.select %10, %27, %816 : vector<1x128xi1>, vector<1x128xf32>
    %819 = arith.mulf %17, %804 : vector<1x128xf32>
    %820 = arith.mulf %19, %817 : vector<1x128xf32>
    %821 = arith.addf %819, %820 : vector<1x128xf32>
    %822 = arith.mulf %19, %818 : vector<1x128xf32>
    %823 = arith.addf %819, %822 : vector<1x128xf32>
    %824 = arith.mulf %814, %23 : vector<1x128xf32>
    %cst_164 = arith.constant 0.000000e+00 : f32
    %825 = vector.broadcast %cst_164 : f32 to vector<1x128xf32>
    %826 = arith.maximumf %824, %825 : vector<1x128xf32>
    %827 = arith.addf %21, %826 : vector<1x128xf32>
    %828 = arith.mulf %821, %827 : vector<1x128xf32>
    %cst_165 = arith.constant 0.000000e+00 : f32
    %829 = vector.broadcast %cst_165 : f32 to vector<1x128xf32>
    %830 = arith.minimumf %824, %829 : vector<1x128xf32>
    %831 = arith.subf %21, %830 : vector<1x128xf32>
    %832 = arith.mulf %823, %831 : vector<1x128xf32>
    %833 = arith.addf %828, %832 : vector<1x128xf32>
    %834 = arith.mulf %833, %14 : vector<1x128xf32>
    %835 = vector.broadcast %737 : f32 to vector<1x128xf32>
    %836 = arith.mulf %835, %834 : vector<1x128xf32>
    %837 = arith.addf %736, %836 : vector<1x128xf32>
    %838 = vector.broadcast %837 : vector<1x128xf32> to vector<32x128xf32>
    %839 = arith.mulf %32, %838 : vector<32x128xf32>
    %840 = math.tanh %839 : vector<32x128xf32>
    %841 = arith.truncf %840 : vector<32x128xf32> to vector<32x128xbf16>
    %cst_166 = arith.constant dense<0.000000e+00> : vector<32x128xf32>
    %842 = tpu.matmul %33, %841, %cst_166 {dimension_numbers = #tpu.dot_dimension_numbers<[1], [0], [0], [1], [0, 0, 1, 1], [], []>} : vector<32x32xbf16>, vector<32x128xbf16>, vector<32x128xf32> -> vector<32x128xf32>
    %843 = math.tanh %842 : vector<32x128xf32>
    %844 = arith.mulf %35, %843 : vector<32x128xf32>
    %cst_167 = arith.constant dense<0.000000e+00> : vector<128xf32>
    %845 = vector.multi_reduction <add>, %844, %cst_167 [0] : vector<32x128xf32> to vector<128xf32>
    %846 = vector.shape_cast %845 : vector<128xf32> to vector<1x128xf32>
    %847 = math.tanh %846 : vector<1x128xf32>
    %c1_i32_168 = arith.constant 1 : i32
    %848 = tpu.dynamic_rotate %837 by %c1_i32_168 dim 1 : vector<1x128xf32>, i32 -> vector<1x128xf32>
    %c127_i32_169 = arith.constant 127 : i32
    %849 = tpu.dynamic_rotate %837 by %c127_i32_169 dim 1 : vector<1x128xf32>, i32 -> vector<1x128xf32>
    %850 = arith.select %8, %25, %848 : vector<1x128xi1>, vector<1x128xf32>
    %851 = arith.select %10, %27, %849 : vector<1x128xi1>, vector<1x128xf32>
    %852 = arith.mulf %17, %837 : vector<1x128xf32>
    %853 = arith.mulf %19, %850 : vector<1x128xf32>
    %854 = arith.addf %852, %853 : vector<1x128xf32>
    %855 = arith.mulf %19, %851 : vector<1x128xf32>
    %856 = arith.addf %852, %855 : vector<1x128xf32>
    %857 = arith.mulf %847, %23 : vector<1x128xf32>
    %cst_170 = arith.constant 0.000000e+00 : f32
    %858 = vector.broadcast %cst_170 : f32 to vector<1x128xf32>
    %859 = arith.maximumf %857, %858 : vector<1x128xf32>
    %860 = arith.addf %21, %859 : vector<1x128xf32>
    %861 = arith.mulf %854, %860 : vector<1x128xf32>
    %cst_171 = arith.constant 0.000000e+00 : f32
    %862 = vector.broadcast %cst_171 : f32 to vector<1x128xf32>
    %863 = arith.minimumf %857, %862 : vector<1x128xf32>
    %864 = arith.subf %21, %863 : vector<1x128xf32>
    %865 = arith.mulf %856, %864 : vector<1x128xf32>
    %866 = arith.addf %861, %865 : vector<1x128xf32>
    %867 = arith.mulf %866, %14 : vector<1x128xf32>
    %cst_172 = arith.constant 6.000000e+00 : f32
    %868 = arith.divf %737, %cst_172 : f32
    %869 = arith.addf %801, %834 : vector<1x128xf32>
    %cst_173 = arith.constant 2.000000e+00 : f32
    %870 = vector.broadcast %cst_173 : f32 to vector<1x128xf32>
    %871 = arith.mulf %870, %869 : vector<1x128xf32>
    %872 = arith.addf %768, %871 : vector<1x128xf32>
    %873 = arith.addf %872, %867 : vector<1x128xf32>
    %874 = vector.broadcast %868 : f32 to vector<1x128xf32>
    %875 = arith.mulf %874, %873 : vector<1x128xf32>
    %876 = arith.addf %736, %875 : vector<1x128xf32>
    %c6 = arith.constant 6 : index
    %877 = memref.load %arg5[%c6] : memref<7xf32, #tpu.memory_space<smem>>
    %cst_174 = arith.constant 5.000000e-01 : f32
    %878 = arith.mulf %cst_174, %877 : f32
    %879 = vector.broadcast %876 : vector<1x128xf32> to vector<32x128xf32>
    %880 = arith.mulf %32, %879 : vector<32x128xf32>
    %881 = math.tanh %880 : vector<32x128xf32>
    %882 = arith.truncf %881 : vector<32x128xf32> to vector<32x128xbf16>
    %cst_175 = arith.constant dense<0.000000e+00> : vector<32x128xf32>
    %883 = tpu.matmul %33, %882, %cst_175 {dimension_numbers = #tpu.dot_dimension_numbers<[1], [0], [0], [1], [0, 0, 1, 1], [], []>} : vector<32x32xbf16>, vector<32x128xbf16>, vector<32x128xf32> -> vector<32x128xf32>
    %884 = math.tanh %883 : vector<32x128xf32>
    %885 = arith.mulf %35, %884 : vector<32x128xf32>
    %cst_176 = arith.constant dense<0.000000e+00> : vector<128xf32>
    %886 = vector.multi_reduction <add>, %885, %cst_176 [0] : vector<32x128xf32> to vector<128xf32>
    %887 = vector.shape_cast %886 : vector<128xf32> to vector<1x128xf32>
    %888 = math.tanh %887 : vector<1x128xf32>
    %c1_i32_177 = arith.constant 1 : i32
    %889 = tpu.dynamic_rotate %876 by %c1_i32_177 dim 1 : vector<1x128xf32>, i32 -> vector<1x128xf32>
    %c127_i32_178 = arith.constant 127 : i32
    %890 = tpu.dynamic_rotate %876 by %c127_i32_178 dim 1 : vector<1x128xf32>, i32 -> vector<1x128xf32>
    %891 = arith.select %8, %25, %889 : vector<1x128xi1>, vector<1x128xf32>
    %892 = arith.select %10, %27, %890 : vector<1x128xi1>, vector<1x128xf32>
    %893 = arith.mulf %17, %876 : vector<1x128xf32>
    %894 = arith.mulf %19, %891 : vector<1x128xf32>
    %895 = arith.addf %893, %894 : vector<1x128xf32>
    %896 = arith.mulf %19, %892 : vector<1x128xf32>
    %897 = arith.addf %893, %896 : vector<1x128xf32>
    %898 = arith.mulf %888, %23 : vector<1x128xf32>
    %cst_179 = arith.constant 0.000000e+00 : f32
    %899 = vector.broadcast %cst_179 : f32 to vector<1x128xf32>
    %900 = arith.maximumf %898, %899 : vector<1x128xf32>
    %901 = arith.addf %21, %900 : vector<1x128xf32>
    %902 = arith.mulf %895, %901 : vector<1x128xf32>
    %cst_180 = arith.constant 0.000000e+00 : f32
    %903 = vector.broadcast %cst_180 : f32 to vector<1x128xf32>
    %904 = arith.minimumf %898, %903 : vector<1x128xf32>
    %905 = arith.subf %21, %904 : vector<1x128xf32>
    %906 = arith.mulf %897, %905 : vector<1x128xf32>
    %907 = arith.addf %902, %906 : vector<1x128xf32>
    %908 = arith.mulf %907, %14 : vector<1x128xf32>
    %909 = vector.broadcast %878 : f32 to vector<1x128xf32>
    %910 = arith.mulf %909, %908 : vector<1x128xf32>
    %911 = arith.addf %876, %910 : vector<1x128xf32>
    %912 = vector.broadcast %911 : vector<1x128xf32> to vector<32x128xf32>
    %913 = arith.mulf %32, %912 : vector<32x128xf32>
    %914 = math.tanh %913 : vector<32x128xf32>
    %915 = arith.truncf %914 : vector<32x128xf32> to vector<32x128xbf16>
    %cst_181 = arith.constant dense<0.000000e+00> : vector<32x128xf32>
    %916 = tpu.matmul %33, %915, %cst_181 {dimension_numbers = #tpu.dot_dimension_numbers<[1], [0], [0], [1], [0, 0, 1, 1], [], []>} : vector<32x32xbf16>, vector<32x128xbf16>, vector<32x128xf32> -> vector<32x128xf32>
    %917 = math.tanh %916 : vector<32x128xf32>
    %918 = arith.mulf %35, %917 : vector<32x128xf32>
    %cst_182 = arith.constant dense<0.000000e+00> : vector<128xf32>
    %919 = vector.multi_reduction <add>, %918, %cst_182 [0] : vector<32x128xf32> to vector<128xf32>
    %920 = vector.shape_cast %919 : vector<128xf32> to vector<1x128xf32>
    %921 = math.tanh %920 : vector<1x128xf32>
    %c1_i32_183 = arith.constant 1 : i32
    %922 = tpu.dynamic_rotate %911 by %c1_i32_183 dim 1 : vector<1x128xf32>, i32 -> vector<1x128xf32>
    %c127_i32_184 = arith.constant 127 : i32
    %923 = tpu.dynamic_rotate %911 by %c127_i32_184 dim 1 : vector<1x128xf32>, i32 -> vector<1x128xf32>
    %924 = arith.select %8, %25, %922 : vector<1x128xi1>, vector<1x128xf32>
    %925 = arith.select %10, %27, %923 : vector<1x128xi1>, vector<1x128xf32>
    %926 = arith.mulf %17, %911 : vector<1x128xf32>
    %927 = arith.mulf %19, %924 : vector<1x128xf32>
    %928 = arith.addf %926, %927 : vector<1x128xf32>
    %929 = arith.mulf %19, %925 : vector<1x128xf32>
    %930 = arith.addf %926, %929 : vector<1x128xf32>
    %931 = arith.mulf %921, %23 : vector<1x128xf32>
    %cst_185 = arith.constant 0.000000e+00 : f32
    %932 = vector.broadcast %cst_185 : f32 to vector<1x128xf32>
    %933 = arith.maximumf %931, %932 : vector<1x128xf32>
    %934 = arith.addf %21, %933 : vector<1x128xf32>
    %935 = arith.mulf %928, %934 : vector<1x128xf32>
    %cst_186 = arith.constant 0.000000e+00 : f32
    %936 = vector.broadcast %cst_186 : f32 to vector<1x128xf32>
    %937 = arith.minimumf %931, %936 : vector<1x128xf32>
    %938 = arith.subf %21, %937 : vector<1x128xf32>
    %939 = arith.mulf %930, %938 : vector<1x128xf32>
    %940 = arith.addf %935, %939 : vector<1x128xf32>
    %941 = arith.mulf %940, %14 : vector<1x128xf32>
    %942 = vector.broadcast %878 : f32 to vector<1x128xf32>
    %943 = arith.mulf %942, %941 : vector<1x128xf32>
    %944 = arith.addf %876, %943 : vector<1x128xf32>
    %945 = vector.broadcast %944 : vector<1x128xf32> to vector<32x128xf32>
    %946 = arith.mulf %32, %945 : vector<32x128xf32>
    %947 = math.tanh %946 : vector<32x128xf32>
    %948 = arith.truncf %947 : vector<32x128xf32> to vector<32x128xbf16>
    %cst_187 = arith.constant dense<0.000000e+00> : vector<32x128xf32>
    %949 = tpu.matmul %33, %948, %cst_187 {dimension_numbers = #tpu.dot_dimension_numbers<[1], [0], [0], [1], [0, 0, 1, 1], [], []>} : vector<32x32xbf16>, vector<32x128xbf16>, vector<32x128xf32> -> vector<32x128xf32>
    %950 = math.tanh %949 : vector<32x128xf32>
    %951 = arith.mulf %35, %950 : vector<32x128xf32>
    %cst_188 = arith.constant dense<0.000000e+00> : vector<128xf32>
    %952 = vector.multi_reduction <add>, %951, %cst_188 [0] : vector<32x128xf32> to vector<128xf32>
    %953 = vector.shape_cast %952 : vector<128xf32> to vector<1x128xf32>
    %954 = math.tanh %953 : vector<1x128xf32>
    %c1_i32_189 = arith.constant 1 : i32
    %955 = tpu.dynamic_rotate %944 by %c1_i32_189 dim 1 : vector<1x128xf32>, i32 -> vector<1x128xf32>
    %c127_i32_190 = arith.constant 127 : i32
    %956 = tpu.dynamic_rotate %944 by %c127_i32_190 dim 1 : vector<1x128xf32>, i32 -> vector<1x128xf32>
    %957 = arith.select %8, %25, %955 : vector<1x128xi1>, vector<1x128xf32>
    %958 = arith.select %10, %27, %956 : vector<1x128xi1>, vector<1x128xf32>
    %959 = arith.mulf %17, %944 : vector<1x128xf32>
    %960 = arith.mulf %19, %957 : vector<1x128xf32>
    %961 = arith.addf %959, %960 : vector<1x128xf32>
    %962 = arith.mulf %19, %958 : vector<1x128xf32>
    %963 = arith.addf %959, %962 : vector<1x128xf32>
    %964 = arith.mulf %954, %23 : vector<1x128xf32>
    %cst_191 = arith.constant 0.000000e+00 : f32
    %965 = vector.broadcast %cst_191 : f32 to vector<1x128xf32>
    %966 = arith.maximumf %964, %965 : vector<1x128xf32>
    %967 = arith.addf %21, %966 : vector<1x128xf32>
    %968 = arith.mulf %961, %967 : vector<1x128xf32>
    %cst_192 = arith.constant 0.000000e+00 : f32
    %969 = vector.broadcast %cst_192 : f32 to vector<1x128xf32>
    %970 = arith.minimumf %964, %969 : vector<1x128xf32>
    %971 = arith.subf %21, %970 : vector<1x128xf32>
    %972 = arith.mulf %963, %971 : vector<1x128xf32>
    %973 = arith.addf %968, %972 : vector<1x128xf32>
    %974 = arith.mulf %973, %14 : vector<1x128xf32>
    %975 = vector.broadcast %877 : f32 to vector<1x128xf32>
    %976 = arith.mulf %975, %974 : vector<1x128xf32>
    %977 = arith.addf %876, %976 : vector<1x128xf32>
    %978 = vector.broadcast %977 : vector<1x128xf32> to vector<32x128xf32>
    %979 = arith.mulf %32, %978 : vector<32x128xf32>
    %980 = math.tanh %979 : vector<32x128xf32>
    %981 = arith.truncf %980 : vector<32x128xf32> to vector<32x128xbf16>
    %cst_193 = arith.constant dense<0.000000e+00> : vector<32x128xf32>
    %982 = tpu.matmul %33, %981, %cst_193 {dimension_numbers = #tpu.dot_dimension_numbers<[1], [0], [0], [1], [0, 0, 1, 1], [], []>} : vector<32x32xbf16>, vector<32x128xbf16>, vector<32x128xf32> -> vector<32x128xf32>
    %983 = math.tanh %982 : vector<32x128xf32>
    %984 = arith.mulf %35, %983 : vector<32x128xf32>
    %cst_194 = arith.constant dense<0.000000e+00> : vector<128xf32>
    %985 = vector.multi_reduction <add>, %984, %cst_194 [0] : vector<32x128xf32> to vector<128xf32>
    %986 = vector.shape_cast %985 : vector<128xf32> to vector<1x128xf32>
    %987 = math.tanh %986 : vector<1x128xf32>
    %c1_i32_195 = arith.constant 1 : i32
    %988 = tpu.dynamic_rotate %977 by %c1_i32_195 dim 1 : vector<1x128xf32>, i32 -> vector<1x128xf32>
    %c127_i32_196 = arith.constant 127 : i32
    %989 = tpu.dynamic_rotate %977 by %c127_i32_196 dim 1 : vector<1x128xf32>, i32 -> vector<1x128xf32>
    %990 = arith.select %8, %25, %988 : vector<1x128xi1>, vector<1x128xf32>
    %991 = arith.select %10, %27, %989 : vector<1x128xi1>, vector<1x128xf32>
    %992 = arith.mulf %17, %977 : vector<1x128xf32>
    %993 = arith.mulf %19, %990 : vector<1x128xf32>
    %994 = arith.addf %992, %993 : vector<1x128xf32>
    %995 = arith.mulf %19, %991 : vector<1x128xf32>
    %996 = arith.addf %992, %995 : vector<1x128xf32>
    %997 = arith.mulf %987, %23 : vector<1x128xf32>
    %cst_197 = arith.constant 0.000000e+00 : f32
    %998 = vector.broadcast %cst_197 : f32 to vector<1x128xf32>
    %999 = arith.maximumf %997, %998 : vector<1x128xf32>
    %1000 = arith.addf %21, %999 : vector<1x128xf32>
    %1001 = arith.mulf %994, %1000 : vector<1x128xf32>
    %cst_198 = arith.constant 0.000000e+00 : f32
    %1002 = vector.broadcast %cst_198 : f32 to vector<1x128xf32>
    %1003 = arith.minimumf %997, %1002 : vector<1x128xf32>
    %1004 = arith.subf %21, %1003 : vector<1x128xf32>
    %1005 = arith.mulf %996, %1004 : vector<1x128xf32>
    %1006 = arith.addf %1001, %1005 : vector<1x128xf32>
    %1007 = arith.mulf %1006, %14 : vector<1x128xf32>
    %cst_199 = arith.constant 6.000000e+00 : f32
    %1008 = arith.divf %877, %cst_199 : f32
    %1009 = arith.addf %941, %974 : vector<1x128xf32>
    %cst_200 = arith.constant 2.000000e+00 : f32
    %1010 = vector.broadcast %cst_200 : f32 to vector<1x128xf32>
    %1011 = arith.mulf %1010, %1009 : vector<1x128xf32>
    %1012 = arith.addf %908, %1011 : vector<1x128xf32>
    %1013 = arith.addf %1012, %1007 : vector<1x128xf32>
    %1014 = vector.broadcast %1008 : f32 to vector<1x128xf32>
    %1015 = arith.mulf %1014, %1013 : vector<1x128xf32>
    %1016 = arith.addf %876, %1015 : vector<1x128xf32>
    %1017 = tpu.concatenate %36, %176, %316, %456, %596, %736, %876, %1016 in 0 : vector<1x128xf32>, vector<1x128xf32>, vector<1x128xf32>, vector<1x128xf32>, vector<1x128xf32>, vector<1x128xf32>, vector<1x128xf32>, vector<1x128xf32> -> vector<8x128xf32>
    %c0_201 = arith.constant 0 : index
    %c0_202 = arith.constant 0 : index
    %1018 = vector.load %arg6[%c0_201, %c0_202] : memref<8x128xf32, #tpu.memory_space<vmem>>, vector<8x128xf32>
    tpu.vector_store %arg6[%c0_201, %c0_202], %1017 {strides = array<i32>} : memref<8x128xf32, #tpu.memory_space<vmem>>, vector<8x128xf32>,
    return
  }
}

</mosaic_0001>

<bundles_post_ra>
// kernel: finn_burger_forward.1
= control target key start
LH: loop header
LB: loop body
LE: loop exit
PB: predicated region body
PF: predicated region fallthrough
CT: control target
= control target key end

     0   :  { %11 = vsyncpa [#allocation4], 0  ;;  %s5303_s0 = inlined_call_operand.vmem [shape: f32[1,128], index: 0, kind: input, shape index: {}]   ;;  %s5304_s1 = inlined_call_operand.vmem [shape: f32[32,1], index: 1, kind: input, shape index: {}]   ;;  %s5305_s2 = inlined_call_operand.vmem [shape: f32[32,32], index: 2, kind: input, shape index: {}]   ;;  %s5306_s3 = inlined_call_operand.vmem [shape: f32[32,1], index: 3, kind: input, shape index: {}]   ;;  %s5307_s4 = inlined_call_operand.vmem [shape: f32[6], index: 4, kind: input, shape index: {}]   ;;  %s5308_s5 = inlined_call_operand.vmem [shape: f32[7], index: 5, kind: input, shape index: {}]   ;;  %s5309_s6 = inlined_call_operand.hbm [shape: f32[8,128], index: 6, kind: output, shape index: {}]  }
   0x1   :  { %12 = vsyncpa [#allocation6], 0 }
   0x2   :  { %13 = vsyncpa [#allocation3], 0  ;;  %s28_s23 = sshll.u32 %s5307_s4, 4  ;;  %s38_s26 = sshll.u32 %s5308_s5, 4  ;;  %s29_s23 = int_to_ptr.vmem [resolvable:$true] %s28_s23  ;;  %s39_s26 = int_to_ptr.vmem [resolvable:$true] %s38_s26 }
   0x3   :  { %s4110_s27 = scalar_lea.vmem %s29_s23, 16  ;;  %p4115_p1 = scmp.lt.s32.totalorder %s29_s23, %s29_s23 }
   0x4   :  { %p4111_p0 = scmp.ne.s32.totalorder %s29_s23, %s4110_s27  ;;  %p4116_p2 = scmp.lt.s32.totalorder %s4110_s27, %s4110_s27 }
   0x6   :  { %p4117_p3 = por %p4116_p2, %p4115_p1 }
   0x8   :  { %p4118_p4 = pnand %p4117_p3, %p4111_p0 }
   0xa   :  { %4121 = shalt.err (!%p4118_p4)
}
   0xb   :  { %s4162_s28 = smov [#allocation2]   ;;  %s4122_s29 = scalar_lea.vmem %s39_s26, 16 }
   0xc   :  { %31 = dma.vmem_to_smem %s29_s23, 16, %s4162_s28, [#allocation4]  }
   0xd   :  { %p4123_p5 = scmp.ne.s32.totalorder %s39_s26, %s4122_s29  ;;  %p4127_p6 = scmp.lt.s32.totalorder %s39_s26, %s39_s26 }
   0xe   :  { %p4128_p7 = scmp.lt.s32.totalorder %s4122_s29, %s4122_s29 }
  0x10   :  { %p4129_p8 = por %p4128_p7, %p4127_p6 }
  0x12   :  { %p4130_p9 = pnand %p4129_p8, %p4123_p5 }
  0x14   :  { %4133 = shalt.err (!%p4130_p9)
}
  0x15   :  { %s4163_s4 = smov [#allocation5]  }
  0x16   :  { %41 = dma.vmem_to_smem %s39_s26, 16, %s4163_s4, [#allocation6]  }
  0x17   :  { %4156 = dma.done.wait [#allocation4], 16  }
  0x18   :  { %4157 = vsyncadd [#allocation4], 4294967280 }
  0x19   :  { %4158 = dma.done.wait [#allocation6], 16  }
  0x1a   :  { %4159 = vsyncadd [#allocation6], 4294967280 }
  0x1b   :  { %48 = sfence }
  0x1c   :  { %v71_v0 = vld [vmem:[%s5304_s1 + $0x10] sm:$0xff]  ;;  %v69_v1 = vld [vmem:[%s5304_s1] sm:$0xff]  ;;  %v4164_v2 = vmov 0   ;;  %v72_v3 = vld [vmem:[%s5304_s1 + $0x18] sm:$0xff]  ;;  %vm142_vm0 = vcmask 261120   ;;  %s4166_s26 = smov 1   ;;  %v56_v13 = vlaneseq }
  0x1d   :  { %3604 = vset.pattern.permute.xlu1 %v4164_v2  ;;  %3603 = vset.pattern.permute.xlu0 %v4164_v2  ;;  %v70_v4 = vld [vmem:[%s5304_s1 + $0x8] sm:$0xff]  ;;  %v77_v6 = vld [vmem:[%s5306_s3] sm:$0xff]  ;;  %v80_v7 = vld [vmem:[%s5306_s3 + $0x18] sm:$0xff]  ;;  %s3194_s5 = sld [smem:[#allocation2 + $0x3]]  ;;  %s3192_s30 = sld [smem:[#allocation2 + $0x1]]  ;;  %vm3161_vm4 = vcmask 1040384  }
  0x1e   :  { %93 = vperm.xlu1 %3604, %v71_v0   ;;  %83 = vperm.xlu0 %3603, %v69_v1   ;;  %v78_v5 = vld [vmem:[%s5306_s3 + $0x8] sm:$0xff]  ;;  %v79_v8 = vld [vmem:[%s5306_s3 + $0x10] sm:$0xff]  ;;  %v73_v9 = vld [vmem:[%s5305_s2] sm:$0xff]  ;;  %s4165_s3 = smov 127   ;;  %v128_v14 = vshrl.u32 %v56_v13, 7  ;;  %s3193_s7 = sld [smem:[#allocation2 + $0x2]] }
  0x1f   :  { %v74_v10 = vld [vmem:[%s5305_s2 + $0x8] sm:$0xff]  ;;  %v4245_v12 = vld [vmem:[%s5303_s0] sm:$0x1]  ;;  %v75_v31 = vld [vmem:[%s5305_s2 + $0x10] sm:$0xff]  ;;  %v4297_v59 = vand.u32 127, %v56_v13  ;;  %s3196_s8 = sld [smem:[#allocation2 + $0x5]] }
  0x20   :  { %v4240_v11 = vpack.c.bf16 %v74_v10, %v73_v9  ;;  %v4256_v15 = vsub.s32 0, %v128_v14  ;;  %v76_v32 = vld [vmem:[%s5305_s2 + $0x18] sm:$0xff]  ;;  %s3195_s2 = sld [smem:[#allocation2 + $0x4]]  ;;  %s50_s9 = sld [smem:[#allocation2]]  ;;  %vm3163_vm5 = vcmask 1041408   ;;  %vm3165_vm6 = vcmask 1042432  }
  0x21   :  { %v4278_v33 = vpack.c.bf16 %v76_v32, %v75_v31  ;;  %vm59_vm1 = vcmp.eq.s32.totalorder %v4297_v59, 48  ;;  %vm58_vm2 = vcmp.eq.s32.totalorder %v4297_v59, 0  ;;  %s4317_s10 = sld [smem:[#allocation5]]  ;;  %vm60_vm3 = vcmp.lt.s32.totalorder %v4297_v59, 49  ;;  %s4467_s13 = sld [smem:[#allocation5 + $0x1]] }
  0x22   :  { %98 = vperm.xlu1 %3604, %v72_v3   ;;  %88 = vperm.xlu0 %3603, %v70_v4   ;;  %v130_v16 = vrot.slane %v4245_v12, %v4256_v15  ;;  %s4754_s20 = sld [smem:[#allocation5 + $0x3]]  ;;  %vm3167_vm7 = vcmask 1043456   ;;  %s4896_s22 = sld [smem:[#allocation5 + $0x4]]  ;;  %vm3169_vm8 = vcmask 1044480   ;;  %vm3171_vm9 = vcmask 1045504  }
  0x23   :  { %3376 = vmatprep.mubr.msk.bf16.mxu0 %vm142_vm0, %v4240_v11  ;;  %3384 = vmatprep.mubr.msk.bf16.mxu1 %vm142_vm0, %v4240_v11  ;;  %v4303_v63 = vstv %s3194_s5  ;;  %v4305_v0 = vstv %s3192_s30  ;;  %s5038_s25 = sld [smem:[#allocation5 + $0x5]]  ;;  %s5180_s29 = sld [smem:[#allocation5 + $0x6]]  ;;  %vm3173_vm10 = vcmask 1046528  }
  0x24   :  { %v4307_v1 = vstv %s3193_s7 }
  0x25   :  { %v4315_v4 = vstv %s3196_s8 }
  0x26   :  { %110 = vperm.xlu1 %3604, %v78_v5   ;;  %105 = vperm.xlu0 %3603, %v77_v6   ;;  %v4300_v61 = vstv %s3195_s2  ;;  %v222_v5 = vmul.f32 %v4245_v12, %v4305_v0  ;;  %v4324_v10 = vstv %s50_s9 }
  0x27   :  { %s125_s11 = smul.f32 0.5, %s4317_s10 }
  0x28   :  { %s555_s12 = smul.f32 0.16666667, %s4317_s10 }
  0x29   :  { %s564_s14 = smul.f32 0.5, %s4467_s13 }
  0x2a   :  { %120 = vperm.xlu1 %3604, %v80_v7   ;;  %115 = vperm.xlu0 %3603, %v79_v8   ;;  %s987_s15 = smul.f32 0.16666667, %s4467_s13 }
  0x2b   :  { %s1428_s1 = smul.f32 0.5, %s4754_s20 }
  0x2c   :  { %s1851_s21 = smul.f32 0.16666667, %s4754_s20 }
  0x2d   :  { %s1860_s23 = smul.f32 0.5, %s4896_s22 }
  0x2e   :  { %218 = vrot.lane.b32.xlu1 %v4245_v12, %s4165_s3  ;;  %216 = vrot.lane.b32.xlu0 %v4245_v12, %s4166_s26  ;;  %s2283_s24 = smul.f32 0.16666667, %s4896_s22 }
  0x2f   :  { %s2292_s27 = smul.f32 0.5, %s5038_s25 }
  0x30   :  { %s2715_s28 = smul.f32 0.16666667, %s5038_s25 }
  0x31   :  { %s2724_s4 = smul.f32 0.5, %s5180_s29 }
  0x9d   :  { %v4260_v17 = vpop.permute.xlu1 %93  ;;  %v4262_v18 = vpop.permute.xlu0 %83 }
  0x9e   :  { %v132_v19 = vmul.f32 %v130_v16, %v4262_v18  ;;  %v134_v20 = vmul.f32 %v130_v16, %v4260_v17 }
  0xa0   :  { %3605 = vtanh.f32 %v132_v19 }
  0xa1   :  { %v4266_v21 = vpop.permute.xlu1 %98  ;;  %v4268_v22 = vpop.permute.xlu0 %88  ;;  %3607 = vtanh.f32 %v134_v20 }
  0xa2   :  { %v133_v23 = vmul.f32 %v130_v16, %v4268_v22  ;;  %v135_v24 = vmul.f32 %v130_v16, %v4266_v21 }
  0xa4   :  { %3609 = vtanh.f32 %v133_v23 }
  0xa5   :  { %3611 = vtanh.f32 %v135_v24  ;;  %v4284_v38 = vpop.permute.xlu0 %105  ;;  %v4286_v40 = vpop.permute.xlu1 %110 }
  0xa9   :  { %v4290_v46 = vpop.permute.xlu0 %115  ;;  %v4293_v49 = vpop.permute.xlu1 %120 }
  0xaa   :  { %v3606_v25 = vpop.eup %3605 }
  0xab   :  { %v3608_v26 = vpop.eup %3607 }
  0xad   :  { %v219_v60 = vpop.permute.xlu1 %218  ;;  %v217_v62 = vpop.permute.xlu0 %216 }
  0xae   :  { %v3610_v27 = vpop.eup %3609  ;;  %v221_v2 = vsel %vm59_vm1, %v4300_v61, %v219_v60  ;;  %v220_v3 = vsel %vm58_vm2, %v4303_v63, %v217_v62 }
  0xaf   :  { %v3612_v28 = vpop.eup %3611  ;;  %v140_v29 = vpack.c.bf16 %v3610_v27, %v3606_v25  ;;  %v225_v6 = vmul.f32 %v221_v2, %v4307_v1  ;;  %v223_v7 = vmul.f32 %v220_v3, %v4307_v1 }
  0xb0   :  { %v141_v30 = vpack.c.bf16 %v3612_v28, %v3608_v26  ;;  %v4167_v26 = vmov 0.0  }
  0xb1   :  { %3372 = vmatprep.subr.bf16.mxu0 %v140_v29  ;;  %v226_v13 = vadd.f32 %v225_v6, %v222_v5  ;;  %v224_v16 = vadd.f32 %v223_v7, %v222_v5  ;;  %v4330_v27 = vsel %vm60_vm3, 1.0, %v4167_v26 }
  0xb2   :  { %3373 = vmatpush3.bf16.msra.mxu0 %v140_v29  ;;  %v4332_v29 = vstv %s125_s11 }
  0xb3   :  { %3374 = vmatprep.subr.bf16.mxu0 %v141_v30 }
  0xb6   :  { %3375 = vmatpush3.bf16.msra.mxu0 %v141_v30 }
  0xb9   :  { %3377 = vmatmul.mubr.msk.bf16.vlgmr.msra.gmra.mrb[0].mxu0 %vm142_vm0, %v4278_v33 }
  0xba   :  { %3392 = vmatprep.mubr.msk.bf16.mxu0 %vm142_vm0, %v4240_v11 }
 0x18c   :  { %v3378_v34 = vpop.f32.mrb[0].mxu0 }
 0x18d   :  { %v183_v35 = vpop.f32.mrb[1].mxu0 }
 0x18e   :  { %3613 = vtanh.f32 %v183_v35  ;;  %v3379_v36 = vpop.f32.mrb[2].mxu0 }
 0x18f   :  { %3615 = vtanh.f32 %v3378_v34  ;;  %v186_v37 = vpop.f32.mrb[3].mxu0 }
 0x190   :  { %3617 = vtanh.f32 %v186_v37 }
 0x191   :  { %3619 = vtanh.f32 %v3379_v36 }
 0x198   :  { %v3614_v39 = vpop.eup %3613 }
 0x199   :  { %v3616_v41 = vpop.eup %3615  ;;  %v202_v43 = vmul.f32 %v3614_v39, %v4284_v38 }
 0x19a   :  { %v3618_v42 = vpop.eup %3617  ;;  %v204_v47 = vmul.f32 %v3616_v41, %v4290_v46 }
 0x19b   :  { %v203_v44 = vmul.f32 %v3618_v42, %v4286_v40  ;;  %v3620_v45 = vpop.eup %3619 }
 0x19c   :  { %v205_v50 = vmul.f32 %v3620_v45, %v4293_v49 }
 0x19d   :  { %v206_v48 = vadd.f32 %v203_v44, %v202_v43 }
 0x19f   :  { %v207_v51 = vadd.f32 %v206_v48, %v204_v47 }
 0x1a1   :  { %v208_v52 = vadd.f32 %v207_v51, %v205_v50 }
 0x1a3   :  { %v209_v53 = vrot.slane %v208_v52, 4 }
 0x1a5   :  { %v210_v54 = vadd.f32 %v209_v53, %v208_v52 }
 0x1a7   :  { %v211_v55 = vrot.slane %v210_v54, 2 }
 0x1a9   :  { %v212_v56 = vadd.f32 %v211_v55, %v210_v54 }
 0x1ab   :  { %v213_v57 = vrot.slane %v212_v56, 1 }
 0x1ad   :  { %v214_v58 = vadd.f32 %v213_v57, %v212_v56 }
 0x1af   :  { %3621 = vtanh.f32 %v214_v58 }
 0x1b9   :  { %v3622_v8 = vpop.eup %3621 }
 0x1ba   :  { %v227_v9 = vmul.f32 %v3622_v8, %v4315_v4 }
 0x1bc   :  { %v231_v14 = vmin.f32 %v227_v9, 0.0  ;;  %v228_v19 = vmax.f32 %v227_v9, 0.0 }
 0x1be   :  { %v232_v20 = vsub.f32 %v4324_v10, %v231_v14  ;;  %v229_v23 = vadd.f32 %v228_v19, %v4324_v10 }
 0x1c0   :  { %v233_v24 = vmul.f32 %v232_v20, %v226_v13  ;;  %v230_v25 = vmul.f32 %v229_v23, %v224_v16 }
 0x1c2   :  { %v234_v28 = vadd.f32 %v233_v24, %v230_v25 }
 0x1c4   :  { %v4335_v30 = vmul.f32 %v4330_v27, %v234_v28 }
 0x1c6   :  { %v237_v31 = vmul.f32 %v4332_v29, %v4335_v30 }
 0x1c8   :  { %v238_v32 = vadd.f32 %v237_v31, %v4245_v12 }
 0x1ca   :  { %324 = vrot.lane.b32.xlu1 %v238_v32, %s4165_s3  ;;  %v243_v34 = vrot.slane %v238_v32, %v4256_v15  ;;  %322 = vrot.lane.b32.xlu0 %v238_v32, %s4166_s26  ;;  %v328_v31 = vmul.f32 %v238_v32, %v4305_v0 }
 0x1cc   :  { %v245_v35 = vmul.f32 %v243_v34, %v4262_v18  ;;  %v246_v36 = vmul.f32 %v243_v34, %v4268_v22  ;;  %v247_v37 = vmul.f32 %v243_v34, %v4260_v17  ;;  %v248_v39 = vmul.f32 %v243_v34, %v4266_v21 }
 0x1ce   :  { %3623 = vtanh.f32 %v245_v35 }
 0x1cf   :  { %3625 = vtanh.f32 %v246_v36 }
 0x1d0   :  { %3627 = vtanh.f32 %v247_v37 }
 0x1d1   :  { %3629 = vtanh.f32 %v248_v39 }
 0x1d8   :  { %v3624_v41 = vpop.eup %3623 }
 0x1d9   :  { %v3626_v42 = vpop.eup %3625 }
 0x1da   :  { %v3628_v43 = vpop.eup %3627  ;;  %v253_v44 = vpack.c.bf16 %v3626_v42, %v3624_v41 }
 0x1db   :  { %v3630_v45 = vpop.eup %3629 }
 0x1dc   :  { %3380 = vmatprep.subr.bf16.mxu1 %v253_v44  ;;  %v254_v47 = vpack.c.bf16 %v3630_v45, %v3628_v43 }
 0x1dd   :  { %3381 = vmatpush3.bf16.msra.mxu1 %v253_v44 }
 0x1de   :  { %3382 = vmatprep.subr.bf16.mxu1 %v254_v47 }
 0x1e1   :  { %3383 = vmatpush3.bf16.msra.mxu1 %v254_v47 }
 0x1e4   :  { %3385 = vmatmul.mubr.msk.bf16.vlgmr.msra.gmra.mrb[0].mxu1 %vm142_vm0, %v4278_v33 }
 0x1e5   :  { %3400 = vmatprep.mubr.msk.bf16.mxu1 %vm142_vm0, %v4240_v11 }
 0x23c   :  { %v325_v16 = vpop.permute.xlu1 %324  ;;  %v323_v19 = vpop.permute.xlu0 %322 }
 0x23d   :  { %v327_v20 = vsel %vm59_vm1, %v4300_v61, %v325_v16  ;;  %v326_v23 = vsel %vm58_vm2, %v4303_v63, %v323_v19 }
 0x23e   :  { %v331_v25 = vmul.f32 %v327_v20, %v4307_v1  ;;  %v329_v26 = vmul.f32 %v326_v23, %v4307_v1 }
 0x240   :  { %v332_v36 = vadd.f32 %v331_v25, %v328_v31  ;;  %v330_v37 = vadd.f32 %v329_v26, %v328_v31 }
 0x2b7   :  { %v3386_v48 = vpop.f32.mrb[0].mxu1 }
 0x2b8   :  { %v289_v50 = vpop.f32.mrb[1].mxu1 }
 0x2b9   :  { %3631 = vtanh.f32 %v289_v50  ;;  %v3387_v51 = vpop.f32.mrb[2].mxu1 }
 0x2ba   :  { %3633 = vtanh.f32 %v3386_v48  ;;  %v292_v52 = vpop.f32.mrb[3].mxu1 }
 0x2bb   :  { %3635 = vtanh.f32 %v292_v52 }
 0x2bc   :  { %3637 = vtanh.f32 %v3387_v51 }
 0x2c3   :  { %v3632_v53 = vpop.eup %3631 }
 0x2c4   :  { %v3634_v54 = vpop.eup %3633  ;;  %v308_v56 = vmul.f32 %v3632_v53, %v4284_v38 }
 0x2c5   :  { %v3636_v55 = vpop.eup %3635  ;;  %v310_v60 = vmul.f32 %v3634_v54, %v4290_v46 }
 0x2c6   :  { %v309_v57 = vmul.f32 %v3636_v55, %v4286_v40  ;;  %v3638_v58 = vpop.eup %3637 }
 0x2c7   :  { %v311_v2 = vmul.f32 %v3638_v58, %v4293_v49 }
 0x2c8   :  { %v312_v62 = vadd.f32 %v309_v57, %v308_v56 }
 0x2ca   :  { %v313_v3 = vadd.f32 %v312_v62, %v310_v60 }
 0x2cc   :  { %v314_v5 = vadd.f32 %v313_v3, %v311_v2 }
 0x2ce   :  { %v315_v6 = vrot.slane %v314_v5, 4 }
 0x2d0   :  { %v316_v7 = vadd.f32 %v315_v6, %v314_v5 }
 0x2d2   :  { %v317_v8 = vrot.slane %v316_v7, 2 }
 0x2d4   :  { %v318_v9 = vadd.f32 %v317_v8, %v316_v7 }
 0x2d6   :  { %v319_v13 = vrot.slane %v318_v9, 1 }
 0x2d8   :  { %v320_v14 = vadd.f32 %v319_v13, %v318_v9 }
 0x2da   :  { %3639 = vtanh.f32 %v320_v14 }
 0x2e4   :  { %v3640_v24 = vpop.eup %3639 }
 0x2e5   :  { %v333_v28 = vmul.f32 %v3640_v24, %v4315_v4 }
 0x2e7   :  { %v334_v34 = vmax.f32 %v333_v28, 0.0  ;;  %v337_v35 = vmin.f32 %v333_v28, 0.0 }
 0x2e9   :  { %v335_v39 = vadd.f32 %v334_v34, %v4324_v10  ;;  %v338_v41 = vsub.f32 %v4324_v10, %v337_v35 }
 0x2eb   :  { %v336_v42 = vmul.f32 %v335_v39, %v330_v37  ;;  %v339_v43 = vmul.f32 %v338_v41, %v332_v36 }
 0x2ed   :  { %v340_v44 = vadd.f32 %v339_v43, %v336_v42 }
 0x2ef   :  { %v4368_v45 = vmul.f32 %v4330_v27, %v340_v44 }
 0x2f1   :  { %v342_v47 = vmul.f32 %v4368_v45, %v4332_v29 }
 0x2f3   :  { %v343_v48 = vadd.f32 %v342_v47, %v4245_v12 }
 0x2f5   :  { %429 = vrot.lane.b32.xlu1 %v343_v48, %s4165_s3  ;;  %v348_v32 = vrot.slane %v343_v48, %v4256_v15  ;;  %427 = vrot.lane.b32.xlu0 %v343_v48, %s4166_s26  ;;  %v433_v47 = vmul.f32 %v343_v48, %v4305_v0 }
 0x2f7   :  { %v350_v50 = vmul.f32 %v348_v32, %v4262_v18  ;;  %v351_v51 = vmul.f32 %v348_v32, %v4268_v22  ;;  %v352_v52 = vmul.f32 %v348_v32, %v4260_v17  ;;  %v353_v53 = vmul.f32 %v348_v32, %v4266_v21 }
 0x2f9   :  { %3641 = vtanh.f32 %v350_v50 }
 0x2fa   :  { %3643 = vtanh.f32 %v351_v51 }
 0x2fb   :  { %3645 = vtanh.f32 %v352_v52 }
 0x2fc   :  { %3647 = vtanh.f32 %v353_v53 }
 0x303   :  { %v3642_v29 = vpop.eup %3641 }
 0x304   :  { %v3644_v54 = vpop.eup %3643 }
 0x305   :  { %v3646_v55 = vpop.eup %3645  ;;  %v358_v56 = vpack.c.bf16 %v3644_v54, %v3642_v29 }
 0x306   :  { %v3648_v57 = vpop.eup %3647 }
 0x307   :  { %3388 = vmatprep.subr.bf16.mxu0 %v358_v56  ;;  %v359_v58 = vpack.c.bf16 %v3648_v57, %v3646_v55  ;;  %v447_v57 = vstv %s4317_s10 }
 0x308   :  { %3389 = vmatpush3.bf16.msra.mxu0 %v358_v56 }
 0x309   :  { %3390 = vmatprep.subr.bf16.mxu0 %v359_v58 }
 0x30c   :  { %3391 = vmatpush3.bf16.msra.mxu0 %v359_v58 }
 0x30f   :  { %3393 = vmatmul.mubr.msk.bf16.vlgmr.msra.gmra.mrb[4].mxu0 %vm142_vm0, %v4278_v33 }
 0x310   :  { %3408 = vmatprep.mubr.msk.bf16.mxu0 %vm142_vm0, %v4240_v11 }
 0x367   :  { %v430_v35 = vpop.permute.xlu1 %429  ;;  %v428_v36 = vpop.permute.xlu0 %427 }
 0x368   :  { %v432_v37 = vsel %vm59_vm1, %v4300_v61, %v430_v35  ;;  %v431_v39 = vsel %vm58_vm2, %v4303_v63, %v428_v36 }
 0x369   :  { %v436_v42 = vmul.f32 %v432_v37, %v4307_v1  ;;  %v434_v43 = vmul.f32 %v431_v39, %v4307_v1 }
 0x36b   :  { %v437_v51 = vadd.f32 %v436_v42, %v433_v47  ;;  %v435_v52 = vadd.f32 %v434_v43, %v433_v47 }
 0x3e2   :  { %v3394_v60 = vpop.f32.mrb[4].mxu0 }
 0x3e3   :  { %v394_v62 = vpop.f32.mrb[5].mxu0 }
 0x3e4   :  { %3649 = vtanh.f32 %v394_v62  ;;  %v3395_v2 = vpop.f32.mrb[6].mxu0 }
 0x3e5   :  { %3651 = vtanh.f32 %v3394_v60  ;;  %v397_v3 = vpop.f32.mrb[7].mxu0 }
 0x3e6   :  { %3653 = vtanh.f32 %v397_v3 }
 0x3e7   :  { %3655 = vtanh.f32 %v3395_v2 }
 0x3ee   :  { %v3650_v5 = vpop.eup %3649 }
 0x3ef   :  { %v3652_v6 = vpop.eup %3651  ;;  %v413_v8 = vmul.f32 %v3650_v5, %v4284_v38 }
 0x3f0   :  { %v3654_v7 = vpop.eup %3653  ;;  %v415_v14 = vmul.f32 %v3652_v6, %v4290_v46 }
 0x3f1   :  { %v414_v9 = vmul.f32 %v3654_v7, %v4286_v40  ;;  %v3656_v13 = vpop.eup %3655 }
 0x3f2   :  { %v416_v19 = vmul.f32 %v3656_v13, %v4293_v49 }
 0x3f3   :  { %v417_v16 = vadd.f32 %v414_v9, %v413_v8 }
 0x3f5   :  { %v418_v20 = vadd.f32 %v417_v16, %v415_v14 }
 0x3f7   :  { %v419_v23 = vadd.f32 %v418_v20, %v416_v19 }
 0x3f9   :  { %v420_v24 = vrot.slane %v419_v23, 4 }
 0x3fb   :  { %v421_v25 = vadd.f32 %v420_v24, %v419_v23 }
 0x3fd   :  { %v422_v26 = vrot.slane %v421_v25, 2 }
 0x3ff   :  { %v423_v28 = vadd.f32 %v422_v26, %v421_v25 }
 0x401   :  { %v424_v31 = vrot.slane %v423_v28, 1 }
 0x403   :  { %v425_v34 = vadd.f32 %v424_v31, %v423_v28 }
 0x405   :  { %3657 = vtanh.f32 %v425_v34 }
 0x40f   :  { %v3658_v41 = vpop.eup %3657 }
 0x410   :  { %v438_v44 = vmul.f32 %v3658_v41, %v4315_v4 }
 0x412   :  { %v439_v32 = vmax.f32 %v438_v44, 0.0  ;;  %v442_v50 = vmin.f32 %v438_v44, 0.0 }
 0x414   :  { %v440_v53 = vadd.f32 %v439_v32, %v4324_v10  ;;  %v443_v29 = vsub.f32 %v4324_v10, %v442_v50 }
 0x416   :  { %v441_v54 = vmul.f32 %v440_v53, %v435_v52  ;;  %v444_v55 = vmul.f32 %v443_v29, %v437_v51 }
 0x418   :  { %v445_v56 = vadd.f32 %v444_v55, %v441_v54 }
 0x41a   :  { %v446_v58 = vmul.f32 %v4330_v27, %v445_v56 }
 0x41c   :  { %v448_v60 = vmul.f32 %v447_v57, %v446_v58 }
 0x41e   :  { %v449_v62 = vadd.f32 %v448_v60, %v4245_v12 }
 0x420   :  { %535 = vrot.lane.b32.xlu1 %v449_v62, %s4165_s3  ;;  %v454_v48 = vrot.slane %v449_v62, %v4256_v15  ;;  %533 = vrot.lane.b32.xlu0 %v449_v62, %s4166_s26 }
 0x422   :  { %v456_v2 = vmul.f32 %v454_v48, %v4262_v18  ;;  %v457_v3 = vmul.f32 %v454_v48, %v4268_v22  ;;  %v458_v5 = vmul.f32 %v454_v48, %v4260_v17  ;;  %v459_v6 = vmul.f32 %v454_v48, %v4266_v21 }
 0x423   :  { %v556_v48 = vadd.f32 %v446_v58, %v4368_v45  ;;  %v560_v45 = vstv %s555_s12 }
 0x424   :  { %3659 = vtanh.f32 %v456_v2  ;;  %v539_v2 = vmul.f32 %v449_v62, %v4305_v0 }
 0x425   :  { %3661 = vtanh.f32 %v457_v3 }
 0x426   :  { %3663 = vtanh.f32 %v458_v5 }
 0x427   :  { %3665 = vtanh.f32 %v459_v6 }
 0x42e   :  { %v3660_v7 = vpop.eup %3659 }
 0x42f   :  { %v3662_v8 = vpop.eup %3661 }
 0x430   :  { %v3664_v9 = vpop.eup %3663  ;;  %v464_v13 = vpack.c.bf16 %v3662_v8, %v3660_v7 }
 0x431   :  { %v3666_v14 = vpop.eup %3665 }
 0x432   :  { %3396 = vmatprep.subr.bf16.mxu1 %v464_v13  ;;  %v465_v16 = vpack.c.bf16 %v3666_v14, %v3664_v9 }
 0x433   :  { %3397 = vmatpush3.bf16.msra.mxu1 %v464_v13  ;;  %v557_v13 = vmul.f32 2.0, %v556_v48 }
 0x434   :  { %3398 = vmatprep.subr.bf16.mxu1 %v465_v16 }
 0x437   :  { %3399 = vmatpush3.bf16.msra.mxu1 %v465_v16 }
 0x43a   :  { %3401 = vmatmul.mubr.msk.bf16.vlgmr.msra.gmra.mrb[4].mxu1 %vm142_vm0, %v4278_v33 }
 0x43b   :  { %3416 = vmatprep.mubr.msk.bf16.mxu1 %vm142_vm0, %v4240_v11 }
 0x492   :  { %v536_v52 = vpop.permute.xlu1 %535  ;;  %v534_v53 = vpop.permute.xlu0 %533 }
 0x493   :  { %v538_v29 = vsel %vm59_vm1, %v4300_v61, %v536_v52  ;;  %v537_v54 = vsel %vm58_vm2, %v4303_v63, %v534_v53 }
 0x494   :  { %v542_v56 = vmul.f32 %v538_v29, %v4307_v1  ;;  %v540_v57 = vmul.f32 %v537_v54, %v4307_v1 }
 0x496   :  { %v543_v6 = vadd.f32 %v542_v56, %v539_v2  ;;  %v541_v7 = vadd.f32 %v540_v57, %v539_v2 }
 0x50d   :  { %v3402_v19 = vpop.f32.mrb[4].mxu1 }
 0x50e   :  { %v500_v20 = vpop.f32.mrb[5].mxu1 }
 0x50f   :  { %3667 = vtanh.f32 %v500_v20  ;;  %v3403_v23 = vpop.f32.mrb[6].mxu1  ;;  %v558_v20 = vadd.f32 %v557_v13, %v4335_v30 }
 0x510   :  { %3669 = vtanh.f32 %v3402_v19  ;;  %v503_v24 = vpop.f32.mrb[7].mxu1 }
 0x511   :  { %3671 = vtanh.f32 %v503_v24 }
 0x512   :  { %3673 = vtanh.f32 %v3403_v23 }
 0x519   :  { %v3668_v25 = vpop.eup %3667 }
 0x51a   :  { %v3670_v26 = vpop.eup %3669  ;;  %v519_v31 = vmul.f32 %v3668_v25, %v4284_v38 }
 0x51b   :  { %v3672_v28 = vpop.eup %3671  ;;  %v521_v36 = vmul.f32 %v3670_v26, %v4290_v46 }
 0x51c   :  { %v520_v34 = vmul.f32 %v3672_v28, %v4286_v40  ;;  %v3674_v35 = vpop.eup %3673 }
 0x51d   :  { %v522_v39 = vmul.f32 %v3674_v35, %v4293_v49 }
 0x51e   :  { %v523_v37 = vadd.f32 %v520_v34, %v519_v31 }
 0x520   :  { %v524_v41 = vadd.f32 %v523_v37, %v521_v36 }
 0x522   :  { %v525_v42 = vadd.f32 %v524_v41, %v522_v39 }
 0x524   :  { %v526_v43 = vrot.slane %v525_v42, 4 }
 0x526   :  { %v527_v44 = vadd.f32 %v526_v43, %v525_v42 }
 0x528   :  { %v528_v47 = vrot.slane %v527_v44, 2 }
 0x52a   :  { %v529_v32 = vadd.f32 %v528_v47, %v527_v44 }
 0x52c   :  { %v530_v50 = vrot.slane %v529_v32, 1 }
 0x52e   :  { %v531_v51 = vadd.f32 %v530_v50, %v529_v32 }
 0x530   :  { %3675 = vtanh.f32 %v531_v51 }
 0x53a   :  { %v3676_v55 = vpop.eup %3675 }
 0x53b   :  { %v544_v60 = vmul.f32 %v3676_v55, %v4315_v4 }
 0x53d   :  { %v545_v3 = vmax.f32 %v544_v60, 0.0  ;;  %v548_v5 = vmin.f32 %v544_v60, 0.0 }
 0x53f   :  { %v546_v8 = vadd.f32 %v545_v3, %v4324_v10  ;;  %v549_v9 = vsub.f32 %v4324_v10, %v548_v5 }
 0x541   :  { %v547_v14 = vmul.f32 %v546_v8, %v541_v7  ;;  %v550_v16 = vmul.f32 %v549_v9, %v543_v6 }
 0x543   :  { %v551_v19 = vadd.f32 %v550_v16, %v547_v14 }
 0x545   :  { %v552_v23 = vmul.f32 %v4330_v27, %v551_v19 }
 0x547   :  { %v559_v58 = vadd.f32 %v558_v20, %v552_v23 }
 0x549   :  { %v561_v62 = vmul.f32 %v560_v45, %v559_v58 }
 0x54b   :  { %v4435_v24 = vadd.f32 %v561_v62, %v4245_v12 }
 0x54d   :  { %650 = vrot.lane.b32.xlu1 %v4435_v24, %s4165_s3  ;;  %648 = vrot.lane.b32.xlu0 %v4435_v24, %s4166_s26  ;;  %v4443_v25 = vrot.slane %v4435_v24, %v4256_v15  ;;  %v654_v23 = vmul.f32 %v4435_v24, %v4305_v0 }
 0x54f   :  { %v571_v30 = vmul.f32 %v4443_v25, %v4262_v18  ;;  %v572_v26 = vmul.f32 %v4443_v25, %v4268_v22  ;;  %v573_v12 = vmul.f32 %v4443_v25, %v4260_v17  ;;  %v574_v28 = vmul.f32 %v4443_v25, %v4266_v21 }
 0x551   :  { %3677 = vtanh.f32 %v571_v30 }
 0x552   :  { %3679 = vtanh.f32 %v572_v26 }
 0x553   :  { %3681 = vtanh.f32 %v573_v12 }
 0x554   :  { %3683 = vtanh.f32 %v574_v28 }
 0x55b   :  { %v3678_v31 = vpop.eup %3677 }
 0x55c   :  { %v3680_v34 = vpop.eup %3679 }
 0x55d   :  { %v3682_v35 = vpop.eup %3681  ;;  %v579_v36 = vpack.c.bf16 %v3680_v34, %v3678_v31 }
 0x55e   :  { %v3684_v37 = vpop.eup %3683 }
 0x55f   :  { %3404 = vmatprep.subr.bf16.mxu0 %v579_v36  ;;  %v580_v39 = vpack.c.bf16 %v3684_v37, %v3682_v35  ;;  %v4477_v35 = vstv %s564_s14 }
 0x560   :  { %3405 = vmatpush3.bf16.msra.mxu0 %v579_v36 }
 0x561   :  { %3406 = vmatprep.subr.bf16.mxu0 %v580_v39 }
 0x564   :  { %3407 = vmatpush3.bf16.msra.mxu0 %v580_v39 }
 0x567   :  { %3409 = vmatmul.mubr.msk.bf16.vlgmr.msra.gmra.mrb[8].mxu0 %vm142_vm0, %v4278_v33 }
 0x568   :  { %3424 = vmatprep.mubr.msk.bf16.mxu0 %vm142_vm0, %v4240_v11 }
 0x5bf   :  { %v651_v7 = vpop.permute.xlu1 %650  ;;  %v649_v8 = vpop.permute.xlu0 %648 }
 0x5c0   :  { %v653_v9 = vsel %vm59_vm1, %v4300_v61, %v651_v7  ;;  %v652_v13 = vsel %vm58_vm2, %v4303_v63, %v649_v8 }
 0x5c1   :  { %v657_v16 = vmul.f32 %v653_v9, %v4307_v1  ;;  %v655_v19 = vmul.f32 %v652_v13, %v4307_v1 }
 0x5c3   :  { %v658_v62 = vadd.f32 %v657_v16, %v654_v23  ;;  %v656_v30 = vadd.f32 %v655_v19, %v654_v23 }
 0x63a   :  { %v3410_v41 = vpop.f32.mrb[8].mxu0 }
 0x63b   :  { %v615_v42 = vpop.f32.mrb[9].mxu0 }
 0x63c   :  { %3685 = vtanh.f32 %v615_v42  ;;  %v3411_v43 = vpop.f32.mrb[10].mxu0 }
 0x63d   :  { %3687 = vtanh.f32 %v3410_v41  ;;  %v618_v44 = vpop.f32.mrb[11].mxu0 }
 0x63e   :  { %3689 = vtanh.f32 %v618_v44 }
 0x63f   :  { %3691 = vtanh.f32 %v3411_v43 }
 0x646   :  { %v3686_v47 = vpop.eup %3685 }
 0x647   :  { %v3688_v32 = vpop.eup %3687  ;;  %v634_v51 = vmul.f32 %v3686_v47, %v4284_v38 }
 0x648   :  { %v3690_v50 = vpop.eup %3689  ;;  %v636_v29 = vmul.f32 %v3688_v32, %v4290_v46 }
 0x649   :  { %v635_v52 = vmul.f32 %v3690_v50, %v4286_v40  ;;  %v3692_v53 = vpop.eup %3691 }
 0x64a   :  { %v637_v55 = vmul.f32 %v3692_v53, %v4293_v49 }
 0x64b   :  { %v638_v54 = vadd.f32 %v635_v52, %v634_v51 }
 0x64d   :  { %v639_v56 = vadd.f32 %v638_v54, %v636_v29 }
 0x64f   :  { %v640_v57 = vadd.f32 %v639_v56, %v637_v55 }
 0x651   :  { %v641_v60 = vrot.slane %v640_v57, 4 }
 0x653   :  { %v642_v48 = vadd.f32 %v641_v60, %v640_v57 }
 0x655   :  { %v643_v2 = vrot.slane %v642_v48, 2 }
 0x657   :  { %v644_v3 = vadd.f32 %v643_v2, %v642_v48 }
 0x659   :  { %v645_v5 = vrot.slane %v644_v3, 1 }
 0x65b   :  { %v646_v6 = vadd.f32 %v645_v5, %v644_v3 }
 0x65d   :  { %3693 = vtanh.f32 %v646_v6 }
 0x667   :  { %v3694_v14 = vpop.eup %3693 }
 0x668   :  { %v659_v20 = vmul.f32 %v3694_v14, %v4315_v4 }
 0x66a   :  { %v660_v45 = vmax.f32 %v659_v20, 0.0  ;;  %v663_v58 = vmin.f32 %v659_v20, 0.0 }
 0x66c   :  { %v661_v26 = vadd.f32 %v660_v45, %v4324_v10  ;;  %v664_v12 = vsub.f32 %v4324_v10, %v663_v58 }
 0x66e   :  { %v662_v28 = vmul.f32 %v661_v26, %v656_v30  ;;  %v665_v31 = vmul.f32 %v664_v12, %v658_v62 }
 0x670   :  { %v666_v34 = vadd.f32 %v665_v31, %v662_v28 }
 0x672   :  { %v4480_v36 = vmul.f32 %v4330_v27, %v666_v34 }
 0x674   :  { %v669_v37 = vmul.f32 %v4477_v35, %v4480_v36 }
 0x676   :  { %v670_v39 = vadd.f32 %v669_v37, %v4435_v24 }
 0x678   :  { %756 = vrot.lane.b32.xlu1 %v670_v39, %s4165_s3  ;;  %v675_v41 = vrot.slane %v670_v39, %v4256_v15  ;;  %754 = vrot.lane.b32.xlu0 %v670_v39, %s4166_s26 }
 0x67a   :  { %v677_v42 = vmul.f32 %v675_v41, %v4262_v18  ;;  %v678_v43 = vmul.f32 %v675_v41, %v4268_v22  ;;  %v679_v44 = vmul.f32 %v675_v41, %v4260_v17  ;;  %v680_v47 = vmul.f32 %v675_v41, %v4266_v21 }
 0x67b   :  { %v760_v41 = vmul.f32 %v670_v39, %v4305_v0 }
 0x67c   :  { %3695 = vtanh.f32 %v677_v42 }
 0x67d   :  { %3697 = vtanh.f32 %v678_v43 }
 0x67e   :  { %3699 = vtanh.f32 %v679_v44 }
 0x67f   :  { %3701 = vtanh.f32 %v680_v47 }
 0x686   :  { %v3696_v32 = vpop.eup %3695 }
 0x687   :  { %v3698_v50 = vpop.eup %3697 }
 0x688   :  { %v3700_v51 = vpop.eup %3699  ;;  %v685_v52 = vpack.c.bf16 %v3698_v50, %v3696_v32 }
 0x689   :  { %v3702_v53 = vpop.eup %3701 }
 0x68a   :  { %3412 = vmatprep.subr.bf16.mxu1 %v685_v52  ;;  %v686_v29 = vpack.c.bf16 %v3702_v53, %v3700_v51 }
 0x68b   :  { %3413 = vmatpush3.bf16.msra.mxu1 %v685_v52 }
 0x68c   :  { %3414 = vmatprep.subr.bf16.mxu1 %v686_v29 }
 0x68f   :  { %3415 = vmatpush3.bf16.msra.mxu1 %v686_v29 }
 0x692   :  { %3417 = vmatmul.mubr.msk.bf16.vlgmr.msra.gmra.mrb[8].mxu1 %vm142_vm0, %v4278_v33 }
 0x693   :  { %3432 = vmatprep.mubr.msk.bf16.mxu1 %vm142_vm0, %v4240_v11 }
 0x6ea   :  { %v757_v62 = vpop.permute.xlu1 %756  ;;  %v755_v30 = vpop.permute.xlu0 %754 }
 0x6eb   :  { %v759_v26 = vsel %vm59_vm1, %v4300_v61, %v757_v62  ;;  %v758_v12 = vsel %vm58_vm2, %v4303_v63, %v755_v30 }
 0x6ec   :  { %v763_v31 = vmul.f32 %v759_v26, %v4307_v1  ;;  %v761_v34 = vmul.f32 %v758_v12, %v4307_v1 }
 0x6ee   :  { %v764_v44 = vadd.f32 %v763_v31, %v760_v41  ;;  %v762_v47 = vadd.f32 %v761_v34, %v760_v41 }
 0x765   :  { %v3418_v54 = vpop.f32.mrb[8].mxu1 }
 0x766   :  { %v721_v55 = vpop.f32.mrb[9].mxu1 }
 0x767   :  { %3703 = vtanh.f32 %v721_v55  ;;  %v3419_v56 = vpop.f32.mrb[10].mxu1 }
 0x768   :  { %3705 = vtanh.f32 %v3418_v54  ;;  %v724_v57 = vpop.f32.mrb[11].mxu1 }
 0x769   :  { %3707 = vtanh.f32 %v724_v57 }
 0x76a   :  { %3709 = vtanh.f32 %v3419_v56 }
 0x771   :  { %v3704_v60 = vpop.eup %3703 }
 0x772   :  { %v3706_v48 = vpop.eup %3705  ;;  %v740_v3 = vmul.f32 %v3704_v60, %v4284_v38 }
 0x773   :  { %v3708_v2 = vpop.eup %3707  ;;  %v742_v7 = vmul.f32 %v3706_v48, %v4290_v46 }
 0x774   :  { %v741_v5 = vmul.f32 %v3708_v2, %v4286_v40  ;;  %v3710_v6 = vpop.eup %3709 }
 0x775   :  { %v743_v9 = vmul.f32 %v3710_v6, %v4293_v49 }
 0x776   :  { %v744_v8 = vadd.f32 %v741_v5, %v740_v3 }
 0x778   :  { %v745_v13 = vadd.f32 %v744_v8, %v742_v7 }
 0x77a   :  { %v746_v14 = vadd.f32 %v745_v13, %v743_v9 }
 0x77c   :  { %v747_v16 = vrot.slane %v746_v14, 4 }
 0x77e   :  { %v748_v19 = vadd.f32 %v747_v16, %v746_v14 }
 0x780   :  { %v749_v20 = vrot.slane %v748_v19, 2 }
 0x782   :  { %v750_v23 = vadd.f32 %v749_v20, %v748_v19 }
 0x784   :  { %v751_v45 = vrot.slane %v750_v23, 1 }
 0x786   :  { %v752_v58 = vadd.f32 %v751_v45, %v750_v23 }
 0x788   :  { %3711 = vtanh.f32 %v752_v58 }
 0x792   :  { %v3712_v28 = vpop.eup %3711 }
 0x793   :  { %v765_v37 = vmul.f32 %v3712_v28, %v4315_v4 }
 0x795   :  { %v766_v42 = vmax.f32 %v765_v37, 0.0  ;;  %v769_v43 = vmin.f32 %v765_v37, 0.0 }
 0x797   :  { %v767_v32 = vadd.f32 %v766_v42, %v4324_v10  ;;  %v770_v50 = vsub.f32 %v4324_v10, %v769_v43 }
 0x799   :  { %v768_v51 = vmul.f32 %v767_v32, %v762_v47  ;;  %v771_v52 = vmul.f32 %v770_v50, %v764_v44 }
 0x79b   :  { %v772_v53 = vadd.f32 %v771_v52, %v768_v51 }
 0x79d   :  { %v4513_v29 = vmul.f32 %v4330_v27, %v772_v53 }
 0x79f   :  { %v774_v54 = vmul.f32 %v4513_v29, %v4477_v35 }
 0x7a1   :  { %v775_v55 = vadd.f32 %v774_v54, %v4435_v24 }
 0x7a3   :  { %861 = vrot.lane.b32.xlu1 %v775_v55, %s4165_s3  ;;  %v780_v39 = vrot.slane %v775_v55, %v4256_v15  ;;  %859 = vrot.lane.b32.xlu0 %v775_v55, %s4166_s26 }
 0x7a5   :  { %v782_v56 = vmul.f32 %v780_v39, %v4262_v18  ;;  %v783_v57 = vmul.f32 %v780_v39, %v4268_v22  ;;  %v784_v60 = vmul.f32 %v780_v39, %v4260_v17  ;;  %v785_v48 = vmul.f32 %v780_v39, %v4266_v21 }
 0x7a6   :  { %v865_v39 = vmul.f32 %v775_v55, %v4305_v0 }
 0x7a7   :  { %3713 = vtanh.f32 %v782_v56 }
 0x7a8   :  { %3715 = vtanh.f32 %v783_v57 }
 0x7a9   :  { %3717 = vtanh.f32 %v784_v60 }
 0x7aa   :  { %3719 = vtanh.f32 %v785_v48 }
 0x7b1   :  { %v3714_v35 = vpop.eup %3713 }
 0x7b2   :  { %v3716_v2 = vpop.eup %3715 }
 0x7b3   :  { %v3718_v3 = vpop.eup %3717  ;;  %v790_v5 = vpack.c.bf16 %v3716_v2, %v3714_v35 }
 0x7b4   :  { %v3720_v6 = vpop.eup %3719 }
 0x7b5   :  { %3420 = vmatprep.subr.bf16.mxu0 %v790_v5  ;;  %v791_v7 = vpack.c.bf16 %v3720_v6, %v3718_v3 }
 0x7b6   :  { %3421 = vmatpush3.bf16.msra.mxu0 %v790_v5 }
 0x7b7   :  { %3422 = vmatprep.subr.bf16.mxu0 %v791_v7 }
 0x7ba   :  { %3423 = vmatpush3.bf16.msra.mxu0 %v791_v7  ;;  %v879_v7 = vstv %s4467_s13 }
 0x7bd   :  { %3425 = vmatmul.mubr.msk.bf16.vlgmr.msra.gmra.mrb[12].mxu0 %vm142_vm0, %v4278_v33 }
 0x7be   :  { %3440 = vmatprep.mubr.msk.bf16.mxu0 %vm142_vm0, %v4240_v11 }
 0x815   :  { %v862_v44 = vpop.permute.xlu1 %861  ;;  %v860_v47 = vpop.permute.xlu0 %859 }
 0x816   :  { %v864_v32 = vsel %vm59_vm1, %v4300_v61, %v862_v44  ;;  %v863_v50 = vsel %vm58_vm2, %v4303_v63, %v860_v47 }
 0x817   :  { %v868_v52 = vmul.f32 %v864_v32, %v4307_v1  ;;  %v866_v53 = vmul.f32 %v863_v50, %v4307_v1 }
 0x819   :  { %v869_v60 = vadd.f32 %v868_v52, %v865_v39  ;;  %v867_v48 = vadd.f32 %v866_v53, %v865_v39 }
 0x890   :  { %v3426_v8 = vpop.f32.mrb[12].mxu0 }
 0x891   :  { %v826_v9 = vpop.f32.mrb[13].mxu0 }
 0x892   :  { %3721 = vtanh.f32 %v826_v9  ;;  %v3427_v13 = vpop.f32.mrb[14].mxu0 }
 0x893   :  { %3723 = vtanh.f32 %v3426_v8  ;;  %v829_v14 = vpop.f32.mrb[15].mxu0 }
 0x894   :  { %3725 = vtanh.f32 %v829_v14 }
 0x895   :  { %3727 = vtanh.f32 %v3427_v13 }
 0x89c   :  { %v3722_v16 = vpop.eup %3721 }
 0x89d   :  { %v3724_v19 = vpop.eup %3723  ;;  %v845_v23 = vmul.f32 %v3722_v16, %v4284_v38 }
 0x89e   :  { %v3726_v20 = vpop.eup %3725  ;;  %v847_v62 = vmul.f32 %v3724_v19, %v4290_v46 }
 0x89f   :  { %v846_v45 = vmul.f32 %v3726_v20, %v4286_v40  ;;  %v3728_v58 = vpop.eup %3727 }
 0x8a0   :  { %v848_v26 = vmul.f32 %v3728_v58, %v4293_v49 }
 0x8a1   :  { %v849_v30 = vadd.f32 %v846_v45, %v845_v23 }
 0x8a3   :  { %v850_v12 = vadd.f32 %v849_v30, %v847_v62 }
 0x8a5   :  { %v851_v28 = vadd.f32 %v850_v12, %v848_v26 }
 0x8a7   :  { %v852_v31 = vrot.slane %v851_v28, 4 }
 0x8a9   :  { %v853_v34 = vadd.f32 %v852_v31, %v851_v28 }
 0x8ab   :  { %v854_v37 = vrot.slane %v853_v34, 2 }
 0x8ad   :  { %v855_v41 = vadd.f32 %v854_v37, %v853_v34 }
 0x8af   :  { %v856_v42 = vrot.slane %v855_v41, 1 }
 0x8b1   :  { %v857_v43 = vadd.f32 %v856_v42, %v855_v41 }
 0x8b3   :  { %3729 = vtanh.f32 %v857_v43 }
 0x8bd   :  { %v3730_v51 = vpop.eup %3729 }
 0x8be   :  { %v870_v54 = vmul.f32 %v3730_v51, %v4315_v4 }
 0x8c0   :  { %v871_v56 = vmax.f32 %v870_v54, 0.0  ;;  %v874_v57 = vmin.f32 %v870_v54, 0.0 }
 0x8c2   :  { %v872_v35 = vadd.f32 %v871_v56, %v4324_v10  ;;  %v875_v2 = vsub.f32 %v4324_v10, %v874_v57 }
 0x8c4   :  { %v873_v3 = vmul.f32 %v872_v35, %v867_v48  ;;  %v876_v5 = vmul.f32 %v875_v2, %v869_v60 }
 0x8c6   :  { %v877_v6 = vadd.f32 %v876_v5, %v873_v3 }
 0x8c8   :  { %v878_v8 = vmul.f32 %v4330_v27, %v877_v6 }
 0x8ca   :  { %v880_v9 = vmul.f32 %v879_v7, %v878_v8 }
 0x8cc   :  { %v881_v13 = vadd.f32 %v880_v9, %v4435_v24 }
 0x8ce   :  { %967 = vrot.lane.b32.xlu1 %v881_v13, %s4165_s3  ;;  %v886_v55 = vrot.slane %v881_v13, %v4256_v15  ;;  %965 = vrot.lane.b32.xlu0 %v881_v13, %s4166_s26 }
 0x8d0   :  { %v888_v14 = vmul.f32 %v886_v55, %v4262_v18  ;;  %v889_v16 = vmul.f32 %v886_v55, %v4268_v22  ;;  %v890_v19 = vmul.f32 %v886_v55, %v4260_v17  ;;  %v891_v20 = vmul.f32 %v886_v55, %v4266_v21 }
 0x8d2   :  { %3731 = vtanh.f32 %v888_v14  ;;  %v988_v14 = vadd.f32 %v878_v8, %v4513_v29  ;;  %v992_v29 = vstv %s987_s15 }
 0x8d3   :  { %3733 = vtanh.f32 %v889_v16  ;;  %v971_v16 = vmul.f32 %v881_v13, %v4305_v0 }
 0x8d4   :  { %3735 = vtanh.f32 %v890_v19 }
 0x8d5   :  { %3737 = vtanh.f32 %v891_v20 }
 0x8dc   :  { %v3732_v23 = vpop.eup %3731 }
 0x8dd   :  { %v3734_v45 = vpop.eup %3733 }
 0x8de   :  { %v3736_v58 = vpop.eup %3735  ;;  %v896_v62 = vpack.c.bf16 %v3734_v45, %v3732_v23 }
 0x8df   :  { %v3738_v30 = vpop.eup %3737 }
 0x8e0   :  { %3428 = vmatprep.subr.bf16.mxu1 %v896_v62  ;;  %v897_v26 = vpack.c.bf16 %v3738_v30, %v3736_v58  ;;  %v989_v30 = vmul.f32 2.0, %v988_v14 }
 0x8e1   :  { %3429 = vmatpush3.bf16.msra.mxu1 %v896_v62 }
 0x8e2   :  { %3430 = vmatprep.subr.bf16.mxu1 %v897_v26 }
 0x8e5   :  { %3431 = vmatpush3.bf16.msra.mxu1 %v897_v26 }
 0x8e8   :  { %3433 = vmatmul.mubr.msk.bf16.vlgmr.msra.gmra.mrb[12].mxu1 %vm142_vm0, %v4278_v33 }
 0x8e9   :  { %3448 = vmatprep.mubr.msk.bf16.mxu1 %vm142_vm0, %v4240_v11 }
 0x940   :  { %v968_v35 = vpop.permute.xlu1 %967  ;;  %v966_v2 = vpop.permute.xlu0 %965 }
 0x941   :  { %v970_v3 = vsel %vm59_vm1, %v4300_v61, %v968_v35  ;;  %v969_v5 = vsel %vm58_vm2, %v4303_v63, %v966_v2 }
 0x942   :  { %v974_v7 = vmul.f32 %v970_v3, %v4307_v1  ;;  %v972_v9 = vmul.f32 %v969_v5, %v4307_v1 }
 0x944   :  { %v975_v23 = vadd.f32 %v974_v7, %v971_v16  ;;  %v973_v45 = vadd.f32 %v972_v9, %v971_v16 }
 0x9bb   :  { %v3434_v12 = vpop.f32.mrb[12].mxu1 }
 0x9bc   :  { %v932_v28 = vpop.f32.mrb[13].mxu1 }
 0x9bd   :  { %3739 = vtanh.f32 %v932_v28  ;;  %v3435_v31 = vpop.f32.mrb[14].mxu1 }
 0x9be   :  { %3741 = vtanh.f32 %v3434_v12  ;;  %v935_v34 = vpop.f32.mrb[15].mxu1 }
 0x9bf   :  { %3743 = vtanh.f32 %v935_v34 }
 0x9c0   :  { %3745 = vtanh.f32 %v3435_v31  ;;  %v990_v31 = vadd.f32 %v989_v30, %v4480_v36 }
 0x9c7   :  { %v3740_v37 = vpop.eup %3739 }
 0x9c8   :  { %v3742_v41 = vpop.eup %3741  ;;  %v951_v43 = vmul.f32 %v3740_v37, %v4284_v38 }
 0x9c9   :  { %v3744_v42 = vpop.eup %3743  ;;  %v953_v32 = vmul.f32 %v3742_v41, %v4290_v46 }
 0x9ca   :  { %v952_v44 = vmul.f32 %v3744_v42, %v4286_v40  ;;  %v3746_v47 = vpop.eup %3745 }
 0x9cb   :  { %v954_v51 = vmul.f32 %v3746_v47, %v4293_v49 }
 0x9cc   :  { %v955_v50 = vadd.f32 %v952_v44, %v951_v43 }
 0x9ce   :  { %v956_v52 = vadd.f32 %v955_v50, %v953_v32 }
 0x9d0   :  { %v957_v53 = vadd.f32 %v956_v52, %v954_v51 }
 0x9d2   :  { %v958_v54 = vrot.slane %v957_v53, 4 }
 0x9d4   :  { %v959_v39 = vadd.f32 %v958_v54, %v957_v53 }
 0x9d6   :  { %v960_v56 = vrot.slane %v959_v39, 2 }
 0x9d8   :  { %v961_v57 = vadd.f32 %v960_v56, %v959_v39 }
 0x9da   :  { %v962_v60 = vrot.slane %v961_v57, 1 }
 0x9dc   :  { %v963_v48 = vadd.f32 %v962_v60, %v961_v57 }
 0x9de   :  { %3747 = vtanh.f32 %v963_v48 }
 0x9e8   :  { %v3748_v6 = vpop.eup %3747 }
 0x9e9   :  { %v976_v55 = vmul.f32 %v3748_v6, %v4315_v4 }
 0x9eb   :  { %v977_v19 = vmax.f32 %v976_v55, 0.0  ;;  %v980_v20 = vmin.f32 %v976_v55, 0.0 }
 0x9ed   :  { %v978_v58 = vadd.f32 %v977_v19, %v4324_v10  ;;  %v981_v62 = vsub.f32 %v4324_v10, %v980_v20 }
 0x9ef   :  { %v979_v26 = vmul.f32 %v978_v58, %v973_v45  ;;  %v982_v12 = vmul.f32 %v981_v62, %v975_v23 }
 0x9f1   :  { %v983_v28 = vadd.f32 %v982_v12, %v979_v26 }
 0x9f3   :  { %v984_v34 = vmul.f32 %v4330_v27, %v983_v28 }
 0x9f5   :  { %v991_v8 = vadd.f32 %v990_v31, %v984_v34 }
 0x9f7   :  { %v993_v13 = vmul.f32 %v992_v29, %v991_v8 }
 0x9f9   :  { %v4580_v37 = vadd.f32 %v993_v13, %v4435_v24  ;;  %v4109_v24 = vld [vmem:[%s5303_s0] sm:$0x1]  ;;  %s4612_s0 = sld [smem:[#allocation5 + $0x2]] }
 0x9fa   :  { %v3162_v44 = vsel %vm3161_vm4, %v4109_v24, %v4443_v25 }
 0x9fb   :  { %1082 = vrot.lane.b32.xlu1 %v4580_v37, %s4165_s3  ;;  %1080 = vrot.lane.b32.xlu0 %v4580_v37, %s4166_s26  ;;  %v1001_v41 = vrot.slane %v4580_v37, %v4256_v15  ;;  %v1086_v13 = vmul.f32 %v4580_v37, %v4305_v0 }
 0x9fd   :  { %v1003_v36 = vmul.f32 %v1001_v41, %v4262_v18  ;;  %v1004_v42 = vmul.f32 %v1001_v41, %v4268_v22  ;;  %v1005_v43 = vmul.f32 %v1001_v41, %v4260_v17  ;;  %v1006_v47 = vmul.f32 %v1001_v41, %v4266_v21 }
 0x9fe   :  { %v4596_v32 = vsel %vm3163_vm5, %v3162_v44, %v1001_v41 }
 0x9ff   :  { %3749 = vtanh.f32 %v1003_v36  ;;  %s996_s18 = smul.f32 0.5, %s4612_s0 }
 0xa00   :  { %3751 = vtanh.f32 %v1004_v42  ;;  %s1419_s19 = smul.f32 0.16666667, %s4612_s0 }
 0xa01   :  { %3753 = vtanh.f32 %v1005_v43 }
 0xa02   :  { %3755 = vtanh.f32 %v1006_v47 }
 0xa09   :  { %v3750_v50 = vpop.eup %3749 }
 0xa0a   :  { %v3752_v51 = vpop.eup %3751 }
 0xa0b   :  { %v3754_v52 = vpop.eup %3753  ;;  %v1011_v53 = vpack.c.bf16 %v3752_v51, %v3750_v50 }
 0xa0c   :  { %v3756_v54 = vpop.eup %3755 }
 0xa0d   :  { %3436 = vmatprep.subr.bf16.mxu0 %v1011_v53  ;;  %v1012_v39 = vpack.c.bf16 %v3756_v54, %v3754_v52  ;;  %v4622_v52 = vstv %s996_s18 }
 0xa0e   :  { %3437 = vmatpush3.bf16.msra.mxu0 %v1011_v53 }
 0xa0f   :  { %3438 = vmatprep.subr.bf16.mxu0 %v1012_v39 }
 0xa12   :  { %3439 = vmatpush3.bf16.msra.mxu0 %v1012_v39 }
 0xa15   :  { %3441 = vmatmul.mubr.msk.bf16.vlgmr.msra.gmra.mrb[16].mxu0 %vm142_vm0, %v4278_v33 }
 0xa16   :  { %3456 = vmatprep.mubr.msk.bf16.mxu0 %vm142_vm0, %v4240_v11 }
 0xa6d   :  { %v1083_v30 = vpop.permute.xlu1 %1082  ;;  %v1081_v26 = vpop.permute.xlu0 %1080 }
 0xa6e   :  { %v1085_v12 = vsel %vm59_vm1, %v4300_v61, %v1083_v30  ;;  %v1084_v28 = vsel %vm58_vm2, %v4303_v63, %v1081_v26 }
 0xa6f   :  { %v1089_v34 = vmul.f32 %v1085_v12, %v4307_v1  ;;  %v1087_v29 = vmul.f32 %v1084_v28, %v4307_v1 }
 0xa71   :  { %v1090_v42 = vadd.f32 %v1089_v34, %v1086_v13  ;;  %v1088_v43 = vadd.f32 %v1087_v29, %v1086_v13 }
 0xae8   :  { %v3442_v25 = vpop.f32.mrb[16].mxu0 }
 0xae9   :  { %v1047_v56 = vpop.f32.mrb[17].mxu0 }
 0xaea   :  { %3757 = vtanh.f32 %v1047_v56  ;;  %v3443_v57 = vpop.f32.mrb[18].mxu0 }
 0xaeb   :  { %3759 = vtanh.f32 %v3442_v25  ;;  %v1050_v60 = vpop.f32.mrb[19].mxu0 }
 0xaec   :  { %3761 = vtanh.f32 %v1050_v60 }
 0xaed   :  { %3763 = vtanh.f32 %v3443_v57 }
 0xaf4   :  { %v3758_v48 = vpop.eup %3757 }
 0xaf5   :  { %v3760_v35 = vpop.eup %3759  ;;  %v1066_v3 = vmul.f32 %v3758_v48, %v4284_v38 }
 0xaf6   :  { %v3762_v2 = vpop.eup %3761  ;;  %v1068_v7 = vmul.f32 %v3760_v35, %v4290_v46 }
 0xaf7   :  { %v1067_v5 = vmul.f32 %v3762_v2, %v4286_v40  ;;  %v3764_v6 = vpop.eup %3763 }
 0xaf8   :  { %v1069_v55 = vmul.f32 %v3764_v6, %v4293_v49 }
 0xaf9   :  { %v1070_v9 = vadd.f32 %v1067_v5, %v1066_v3 }
 0xafb   :  { %v1071_v14 = vadd.f32 %v1070_v9, %v1068_v7 }
 0xafd   :  { %v1072_v16 = vadd.f32 %v1071_v14, %v1069_v55 }
 0xaff   :  { %v1073_v19 = vrot.slane %v1072_v16, 4 }
 0xb01   :  { %v1074_v20 = vadd.f32 %v1073_v19, %v1072_v16 }
 0xb03   :  { %v1075_v23 = vrot.slane %v1074_v20, 2 }
 0xb05   :  { %v1076_v45 = vadd.f32 %v1075_v23, %v1074_v20 }
 0xb07   :  { %v1077_v58 = vrot.slane %v1076_v45, 1 }
 0xb09   :  { %v1078_v62 = vadd.f32 %v1077_v58, %v1076_v45 }
 0xb0b   :  { %3765 = vtanh.f32 %v1078_v62 }
 0xb15   :  { %v3766_v31 = vpop.eup %3765 }
 0xb16   :  { %v1091_v8 = vmul.f32 %v3766_v31, %v4315_v4 }
 0xb18   :  { %v1092_v41 = vmax.f32 %v1091_v8, 0.0  ;;  %v1095_v36 = vmin.f32 %v1091_v8, 0.0 }
 0xb1a   :  { %v1093_v24 = vadd.f32 %v1092_v41, %v4324_v10  ;;  %v1096_v44 = vsub.f32 %v4324_v10, %v1095_v36 }
 0xb1c   :  { %v1094_v47 = vmul.f32 %v1093_v24, %v1088_v43  ;;  %v1097_v50 = vmul.f32 %v1096_v44, %v1090_v42 }
 0xb1e   :  { %v1098_v51 = vadd.f32 %v1097_v50, %v1094_v47 }
 0xb20   :  { %v4625_v53 = vmul.f32 %v4330_v27, %v1098_v51 }
 0xb22   :  { %v1101_v54 = vmul.f32 %v4622_v52, %v4625_v53 }
 0xb24   :  { %v1102_v39 = vadd.f32 %v1101_v54, %v4580_v37 }
 0xb26   :  { %1188 = vrot.lane.b32.xlu1 %v1102_v39, %s4165_s3  ;;  %v1107_v25 = vrot.slane %v1102_v39, %v4256_v15  ;;  %1186 = vrot.lane.b32.xlu0 %v1102_v39, %s4166_s26 }
 0xb28   :  { %v1109_v56 = vmul.f32 %v1107_v25, %v4262_v18  ;;  %v1110_v57 = vmul.f32 %v1107_v25, %v4268_v22  ;;  %v1111_v60 = vmul.f32 %v1107_v25, %v4260_v17  ;;  %v1112_v48 = vmul.f32 %v1107_v25, %v4266_v21 }
 0xb29   :  { %v1192_v25 = vmul.f32 %v1102_v39, %v4305_v0 }
 0xb2a   :  { %3767 = vtanh.f32 %v1109_v56 }
 0xb2b   :  { %3769 = vtanh.f32 %v1110_v57 }
 0xb2c   :  { %3771 = vtanh.f32 %v1111_v60 }
 0xb2d   :  { %3773 = vtanh.f32 %v1112_v48 }
 0xb34   :  { %v3768_v35 = vpop.eup %3767 }
 0xb35   :  { %v3770_v2 = vpop.eup %3769 }
 0xb36   :  { %v3772_v3 = vpop.eup %3771  ;;  %v1117_v5 = vpack.c.bf16 %v3770_v2, %v3768_v35 }
 0xb37   :  { %v3774_v6 = vpop.eup %3773 }
 0xb38   :  { %3444 = vmatprep.subr.bf16.mxu1 %v1117_v5  ;;  %v1118_v7 = vpack.c.bf16 %v3774_v6, %v3772_v3 }
 0xb39   :  { %3445 = vmatpush3.bf16.msra.mxu1 %v1117_v5 }
 0xb3a   :  { %3446 = vmatprep.subr.bf16.mxu1 %v1118_v7 }
 0xb3d   :  { %3447 = vmatpush3.bf16.msra.mxu1 %v1118_v7 }
 0xb40   :  { %3449 = vmatmul.mubr.msk.bf16.vlgmr.msra.gmra.mrb[16].mxu1 %vm142_vm0, %v4278_v33 }
 0xb41   :  { %3464 = vmatprep.mubr.msk.bf16.mxu1 %vm142_vm0, %v4240_v11 }
 0xb98   :  { %v1189_v42 = vpop.permute.xlu1 %1188  ;;  %v1187_v43 = vpop.permute.xlu0 %1186 }
 0xb99   :  { %v1191_v24 = vsel %vm59_vm1, %v4300_v61, %v1189_v42  ;;  %v1190_v44 = vsel %vm58_vm2, %v4303_v63, %v1187_v43 }
 0xb9a   :  { %v1195_v50 = vmul.f32 %v1191_v24, %v4307_v1  ;;  %v1193_v51 = vmul.f32 %v1190_v44, %v4307_v1 }
 0xb9c   :  { %v1196_v60 = vadd.f32 %v1195_v50, %v1192_v25  ;;  %v1194_v48 = vadd.f32 %v1193_v51, %v1192_v25 }
 0xc13   :  { %v3450_v9 = vpop.f32.mrb[16].mxu1 }
 0xc14   :  { %v1153_v55 = vpop.f32.mrb[17].mxu1 }
 0xc15   :  { %3775 = vtanh.f32 %v1153_v55  ;;  %v3451_v14 = vpop.f32.mrb[18].mxu1 }
 0xc16   :  { %3777 = vtanh.f32 %v3450_v9  ;;  %v1156_v16 = vpop.f32.mrb[19].mxu1 }
 0xc17   :  { %3779 = vtanh.f32 %v1156_v16 }
 0xc18   :  { %3781 = vtanh.f32 %v3451_v14 }
 0xc1f   :  { %v3776_v19 = vpop.eup %3775 }
 0xc20   :  { %v3778_v20 = vpop.eup %3777  ;;  %v1172_v45 = vmul.f32 %v3776_v19, %v4284_v38 }
 0xc21   :  { %v3780_v23 = vpop.eup %3779  ;;  %v1174_v30 = vmul.f32 %v3778_v20, %v4290_v46 }
 0xc22   :  { %v1173_v58 = vmul.f32 %v3780_v23, %v4286_v40  ;;  %v3782_v62 = vpop.eup %3781 }
 0xc23   :  { %v1175_v12 = vmul.f32 %v3782_v62, %v4293_v49 }
 0xc24   :  { %v1176_v26 = vadd.f32 %v1173_v58, %v1172_v45 }
 0xc26   :  { %v1177_v28 = vadd.f32 %v1176_v26, %v1174_v30 }
 0xc28   :  { %v1178_v31 = vadd.f32 %v1177_v28, %v1175_v12 }
 0xc2a   :  { %v1179_v34 = vrot.slane %v1178_v31, 4 }
 0xc2c   :  { %v1180_v29 = vadd.f32 %v1179_v34, %v1178_v31 }
 0xc2e   :  { %v1181_v8 = vrot.slane %v1180_v29, 2 }
 0xc30   :  { %v1182_v13 = vadd.f32 %v1181_v8, %v1180_v29 }
 0xc32   :  { %v1183_v41 = vrot.slane %v1182_v13, 1 }
 0xc34   :  { %v1184_v36 = vadd.f32 %v1183_v41, %v1182_v13 }
 0xc36   :  { %3783 = vtanh.f32 %v1184_v36 }
 0xc40   :  { %v3784_v47 = vpop.eup %3783 }
 0xc41   :  { %v1197_v54 = vmul.f32 %v3784_v47, %v4315_v4 }
 0xc43   :  { %v1198_v56 = vmax.f32 %v1197_v54, 0.0  ;;  %v1201_v57 = vmin.f32 %v1197_v54, 0.0 }
 0xc45   :  { %v1199_v35 = vadd.f32 %v1198_v56, %v4324_v10  ;;  %v1202_v2 = vsub.f32 %v4324_v10, %v1201_v57 }
 0xc47   :  { %v1200_v3 = vmul.f32 %v1199_v35, %v1194_v48  ;;  %v1203_v5 = vmul.f32 %v1202_v2, %v1196_v60 }
 0xc49   :  { %v1204_v6 = vadd.f32 %v1203_v5, %v1200_v3 }
 0xc4b   :  { %v4658_v7 = vmul.f32 %v4330_v27, %v1204_v6 }
 0xc4d   :  { %v1206_v9 = vmul.f32 %v4658_v7, %v4622_v52 }
 0xc4f   :  { %v1207_v55 = vadd.f32 %v1206_v9, %v4580_v37 }
 0xc51   :  { %1293 = vrot.lane.b32.xlu1 %v1207_v55, %s4165_s3  ;;  %v1212_v39 = vrot.slane %v1207_v55, %v4256_v15  ;;  %1291 = vrot.lane.b32.xlu0 %v1207_v55, %s4166_s26 }
 0xc53   :  { %v1214_v14 = vmul.f32 %v1212_v39, %v4262_v18  ;;  %v1215_v16 = vmul.f32 %v1212_v39, %v4268_v22  ;;  %v1216_v19 = vmul.f32 %v1212_v39, %v4260_v17  ;;  %v1217_v20 = vmul.f32 %v1212_v39, %v4266_v21 }
 0xc54   :  { %v1297_v39 = vmul.f32 %v1207_v55, %v4305_v0 }
 0xc55   :  { %3785 = vtanh.f32 %v1214_v14 }
 0xc56   :  { %3787 = vtanh.f32 %v1215_v16 }
 0xc57   :  { %3789 = vtanh.f32 %v1216_v19 }
 0xc58   :  { %3791 = vtanh.f32 %v1217_v20 }
 0xc5f   :  { %v3786_v52 = vpop.eup %3785 }
 0xc60   :  { %v3788_v23 = vpop.eup %3787 }
 0xc61   :  { %v3790_v45 = vpop.eup %3789  ;;  %v1222_v58 = vpack.c.bf16 %v3788_v23, %v3786_v52 }
 0xc62   :  { %v3792_v62 = vpop.eup %3791 }
 0xc63   :  { %3452 = vmatprep.subr.bf16.mxu0 %v1222_v58  ;;  %v1223_v30 = vpack.c.bf16 %v3792_v62, %v3790_v45 }
 0xc64   :  { %3453 = vmatpush3.bf16.msra.mxu0 %v1222_v58 }
 0xc65   :  { %3454 = vmatprep.subr.bf16.mxu0 %v1223_v30 }
 0xc68   :  { %3455 = vmatpush3.bf16.msra.mxu0 %v1223_v30  ;;  %v1311_v30 = vstv %s4612_s0 }
 0xc6b   :  { %3457 = vmatmul.mubr.msk.bf16.vlgmr.msra.gmra.mrb[20].mxu0 %vm142_vm0, %v4278_v33 }
 0xc6c   :  { %3472 = vmatprep.mubr.msk.bf16.mxu0 %vm142_vm0, %v4240_v11 }
 0xcc3   :  { %v1294_v60 = vpop.permute.xlu1 %1293  ;;  %v1292_v48 = vpop.permute.xlu0 %1291 }
 0xcc4   :  { %v1296_v35 = vsel %vm59_vm1, %v4300_v61, %v1294_v60  ;;  %v1295_v2 = vsel %vm58_vm2, %v4303_v63, %v1292_v48 }
 0xcc5   :  { %v1300_v5 = vmul.f32 %v1296_v35, %v4307_v1  ;;  %v1298_v6 = vmul.f32 %v1295_v2, %v4307_v1 }
 0xcc7   :  { %v1301_v19 = vadd.f32 %v1300_v5, %v1297_v39  ;;  %v1299_v20 = vadd.f32 %v1298_v6, %v1297_v39 }
 0xd3e   :  { %v3458_v26 = vpop.f32.mrb[20].mxu0 }
 0xd3f   :  { %v1258_v12 = vpop.f32.mrb[21].mxu0 }
 0xd40   :  { %3793 = vtanh.f32 %v1258_v12  ;;  %v3459_v28 = vpop.f32.mrb[22].mxu0 }
 0xd41   :  { %3795 = vtanh.f32 %v3458_v26  ;;  %v1261_v31 = vpop.f32.mrb[23].mxu0 }
 0xd42   :  { %3797 = vtanh.f32 %v1261_v31 }
 0xd43   :  { %3799 = vtanh.f32 %v3459_v28 }
 0xd4a   :  { %v3794_v34 = vpop.eup %3793 }
 0xd4b   :  { %v3796_v29 = vpop.eup %3795  ;;  %v1277_v13 = vmul.f32 %v3794_v34, %v4284_v38 }
 0xd4c   :  { %v3798_v8 = vpop.eup %3797  ;;  %v1279_v42 = vmul.f32 %v3796_v29, %v4290_v46 }
 0xd4d   :  { %v1278_v41 = vmul.f32 %v3798_v8, %v4286_v40  ;;  %v3800_v36 = vpop.eup %3799 }
 0xd4e   :  { %v1280_v24 = vmul.f32 %v3800_v36, %v4293_v49 }
 0xd4f   :  { %v1281_v43 = vadd.f32 %v1278_v41, %v1277_v13 }
 0xd51   :  { %v1282_v44 = vadd.f32 %v1281_v43, %v1279_v42 }
 0xd53   :  { %v1283_v47 = vadd.f32 %v1282_v44, %v1280_v24 }
 0xd55   :  { %v1284_v50 = vrot.slane %v1283_v47, 4 }
 0xd57   :  { %v1285_v51 = vadd.f32 %v1284_v50, %v1283_v47 }
 0xd59   :  { %v1286_v54 = vrot.slane %v1285_v51, 2 }
 0xd5b   :  { %v1287_v25 = vadd.f32 %v1286_v54, %v1285_v51 }
 0xd5d   :  { %v1288_v56 = vrot.slane %v1287_v25, 1 }
 0xd5f   :  { %v1289_v57 = vadd.f32 %v1288_v56, %v1287_v25 }
 0xd61   :  { %3801 = vtanh.f32 %v1289_v57 }
 0xd6b   :  { %v3802_v3 = vpop.eup %3801 }
 0xd6c   :  { %v1302_v9 = vmul.f32 %v3802_v3, %v4315_v4 }
 0xd6e   :  { %v1303_v14 = vmax.f32 %v1302_v9, 0.0  ;;  %v1306_v16 = vmin.f32 %v1302_v9, 0.0 }
 0xd70   :  { %v1304_v52 = vadd.f32 %v1303_v14, %v4324_v10  ;;  %v1307_v23 = vsub.f32 %v4324_v10, %v1306_v16 }
 0xd72   :  { %v1305_v45 = vmul.f32 %v1304_v52, %v1299_v20  ;;  %v1308_v58 = vmul.f32 %v1307_v23, %v1301_v19 }
 0xd74   :  { %v1309_v62 = vadd.f32 %v1308_v58, %v1305_v45 }
 0xd76   :  { %v1310_v26 = vmul.f32 %v4330_v27, %v1309_v62 }
 0xd78   :  { %v1312_v12 = vmul.f32 %v1311_v30, %v1310_v26 }
 0xd7a   :  { %v1313_v28 = vadd.f32 %v1312_v12, %v4580_v37 }
 0xd7c   :  { %1399 = vrot.lane.b32.xlu1 %v1313_v28, %s4165_s3  ;;  %v1318_v55 = vrot.slane %v1313_v28, %v4256_v15  ;;  %1397 = vrot.lane.b32.xlu0 %v1313_v28, %s4166_s26 }
 0xd7e   :  { %v1320_v31 = vmul.f32 %v1318_v55, %v4262_v18  ;;  %v1321_v34 = vmul.f32 %v1318_v55, %v4268_v22  ;;  %v1322_v29 = vmul.f32 %v1318_v55, %v4260_v17  ;;  %v1323_v8 = vmul.f32 %v1318_v55, %v4266_v21 }
 0xd80   :  { %3803 = vtanh.f32 %v1320_v31  ;;  %v1420_v31 = vadd.f32 %v1310_v26, %v4658_v7  ;;  %v1424_v7 = vstv %s1419_s19 }
 0xd81   :  { %3805 = vtanh.f32 %v1321_v34  ;;  %v1403_v34 = vmul.f32 %v1313_v28, %v4305_v0 }
 0xd82   :  { %3807 = vtanh.f32 %v1322_v29 }
 0xd83   :  { %3809 = vtanh.f32 %v1323_v8 }
 0xd8a   :  { %v3804_v13 = vpop.eup %3803 }
 0xd8b   :  { %v3806_v41 = vpop.eup %3805 }
 0xd8c   :  { %v3808_v36 = vpop.eup %3807  ;;  %v1328_v42 = vpack.c.bf16 %v3806_v41, %v3804_v13 }
 0xd8d   :  { %v3810_v43 = vpop.eup %3809 }
 0xd8e   :  { %3460 = vmatprep.subr.bf16.mxu1 %v1328_v42  ;;  %v1329_v24 = vpack.c.bf16 %v3810_v43, %v3808_v36  ;;  %v1421_v43 = vmul.f32 2.0, %v1420_v31 }
 0xd8f   :  { %3461 = vmatpush3.bf16.msra.mxu1 %v1328_v42 }
 0xd90   :  { %3462 = vmatprep.subr.bf16.mxu1 %v1329_v24 }
 0xd93   :  { %3463 = vmatpush3.bf16.msra.mxu1 %v1329_v24 }
 0xd96   :  { %3465 = vmatmul.mubr.msk.bf16.vlgmr.msra.gmra.mrb[20].mxu1 %vm142_vm0, %v4278_v33 }
 0xd97   :  { %3480 = vmatprep.mubr.msk.bf16.mxu1 %vm142_vm0, %v4240_v11 }
 0xdee   :  { %v1400_v52 = vpop.permute.xlu1 %1399  ;;  %v1398_v23 = vpop.permute.xlu0 %1397 }
 0xdef   :  { %v1402_v45 = vsel %vm59_vm1, %v4300_v61, %v1400_v52  ;;  %v1401_v58 = vsel %vm58_vm2, %v4303_v63, %v1398_v23 }
 0xdf0   :  { %v1406_v30 = vmul.f32 %v1402_v45, %v4307_v1  ;;  %v1404_v12 = vmul.f32 %v1401_v58, %v4307_v1 }
 0xdf2   :  { %v1407_v13 = vadd.f32 %v1406_v30, %v1403_v34  ;;  %v1405_v41 = vadd.f32 %v1404_v12, %v1403_v34 }
 0xe69   :  { %v3466_v44 = vpop.f32.mrb[20].mxu1 }
 0xe6a   :  { %v1364_v47 = vpop.f32.mrb[21].mxu1 }
 0xe6b   :  { %3811 = vtanh.f32 %v1364_v47  ;;  %v3467_v50 = vpop.f32.mrb[22].mxu1 }
 0xe6c   :  { %3813 = vtanh.f32 %v3466_v44  ;;  %v1367_v51 = vpop.f32.mrb[23].mxu1 }
 0xe6d   :  { %3815 = vtanh.f32 %v1367_v51 }
 0xe6e   :  { %3817 = vtanh.f32 %v3467_v50  ;;  %v1422_v50 = vadd.f32 %v1421_v43, %v4625_v53 }
 0xe75   :  { %v3812_v54 = vpop.eup %3811 }
 0xe76   :  { %v3814_v25 = vpop.eup %3813  ;;  %v1383_v57 = vmul.f32 %v3812_v54, %v4284_v38 }
 0xe77   :  { %v3816_v56 = vpop.eup %3815  ;;  %v1385_v35 = vmul.f32 %v3814_v25, %v4290_v46 }
 0xe78   :  { %v1384_v60 = vmul.f32 %v3816_v56, %v4286_v40  ;;  %v3818_v48 = vpop.eup %3817 }
 0xe79   :  { %v1386_v3 = vmul.f32 %v3818_v48, %v4293_v49 }
 0xe7a   :  { %v1387_v2 = vadd.f32 %v1384_v60, %v1383_v57 }
 0xe7c   :  { %v1388_v5 = vadd.f32 %v1387_v2, %v1385_v35 }
 0xe7e   :  { %v1389_v6 = vadd.f32 %v1388_v5, %v1386_v3 }
 0xe80   :  { %v1390_v9 = vrot.slane %v1389_v6, 4 }
 0xe82   :  { %v1391_v39 = vadd.f32 %v1390_v9, %v1389_v6 }
 0xe84   :  { %v1392_v14 = vrot.slane %v1391_v39, 2 }
 0xe86   :  { %v1393_v16 = vadd.f32 %v1392_v14, %v1391_v39 }
 0xe88   :  { %v1394_v19 = vrot.slane %v1393_v16, 1 }
 0xe8a   :  { %v1395_v20 = vadd.f32 %v1394_v19, %v1393_v16 }
 0xe8c   :  { %3819 = vtanh.f32 %v1395_v20 }
 0xe96   :  { %v3820_v62 = vpop.eup %3819 }
 0xe97   :  { %v1408_v55 = vmul.f32 %v3820_v62, %v4315_v4 }
 0xe99   :  { %v1409_v29 = vmax.f32 %v1408_v55, 0.0  ;;  %v1412_v8 = vmin.f32 %v1408_v55, 0.0 }
 0xe9b   :  { %v1410_v36 = vadd.f32 %v1409_v29, %v4324_v10  ;;  %v1413_v42 = vsub.f32 %v4324_v10, %v1412_v8 }
 0xe9d   :  { %v1411_v24 = vmul.f32 %v1410_v36, %v1405_v41  ;;  %v1414_v44 = vmul.f32 %v1413_v42, %v1407_v13 }
 0xe9f   :  { %v1415_v47 = vadd.f32 %v1414_v44, %v1411_v24 }
 0xea1   :  { %v1416_v51 = vmul.f32 %v4330_v27, %v1415_v47 }
 0xea3   :  { %v1423_v26 = vadd.f32 %v1422_v50, %v1416_v51 }
 0xea5   :  { %v1425_v28 = vmul.f32 %v1424_v7, %v1423_v26 }
 0xea7   :  { %v4725_v54 = vadd.f32 %v1425_v28, %v4580_v37 }
 0xea9   :  { %1514 = vrot.lane.b32.xlu1 %v4725_v54, %s4165_s3  ;;  %1512 = vrot.lane.b32.xlu0 %v4725_v54, %s4166_s26  ;;  %v1433_v25 = vrot.slane %v4725_v54, %v4256_v15  ;;  %v1518_v7 = vmul.f32 %v4725_v54, %v4305_v0 }
 0xeab   :  { %v1435_v53 = vmul.f32 %v1433_v25, %v4262_v18  ;;  %v1436_v56 = vmul.f32 %v1433_v25, %v4268_v22  ;;  %v1437_v57 = vmul.f32 %v1433_v25, %v4260_v17  ;;  %v1438_v60 = vmul.f32 %v1433_v25, %v4266_v21 }
 0xeac   :  { %v4738_v37 = vsel %vm3165_vm6, %v4596_v32, %v1433_v25 }
 0xead   :  { %3821 = vtanh.f32 %v1435_v53 }
 0xeae   :  { %3823 = vtanh.f32 %v1436_v56 }
 0xeaf   :  { %3825 = vtanh.f32 %v1437_v57 }
 0xeb0   :  { %3827 = vtanh.f32 %v1438_v60 }
 0xeb7   :  { %v3822_v48 = vpop.eup %3821 }
 0xeb8   :  { %v3824_v35 = vpop.eup %3823 }
 0xeb9   :  { %v3826_v2 = vpop.eup %3825  ;;  %v1443_v3 = vpack.c.bf16 %v3824_v35, %v3822_v48 }
 0xeba   :  { %v3828_v5 = vpop.eup %3827 }
 0xebb   :  { %3468 = vmatprep.subr.bf16.mxu0 %v1443_v3  ;;  %v1444_v6 = vpack.c.bf16 %v3828_v5, %v3826_v2  ;;  %v4764_v2 = vstv %s1428_s1 }
 0xebc   :  { %3469 = vmatpush3.bf16.msra.mxu0 %v1443_v3 }
 0xebd   :  { %3470 = vmatprep.subr.bf16.mxu0 %v1444_v6 }
 0xec0   :  { %3471 = vmatpush3.bf16.msra.mxu0 %v1444_v6 }
 0xec3   :  { %3473 = vmatmul.mubr.msk.bf16.vlgmr.msra.gmra.mrb[24].mxu0 %vm142_vm0, %v4278_v33 }
 0xec4   :  { %3488 = vmatprep.mubr.msk.bf16.mxu0 %vm142_vm0, %v4240_v11 }
 0xf1b   :  { %v1515_v36 = vpop.permute.xlu1 %1514  ;;  %v1513_v42 = vpop.permute.xlu0 %1512 }
 0xf1c   :  { %v1517_v43 = vsel %vm59_vm1, %v4300_v61, %v1515_v36  ;;  %v1516_v24 = vsel %vm58_vm2, %v4303_v63, %v1513_v42 }
 0xf1d   :  { %v1521_v47 = vmul.f32 %v1517_v43, %v4307_v1  ;;  %v1519_v50 = vmul.f32 %v1516_v24, %v4307_v1 }
 0xf1f   :  { %v1522_v25 = vadd.f32 %v1521_v47, %v1518_v7  ;;  %v1520_v53 = vadd.f32 %v1519_v50, %v1518_v7 }
 0xf96   :  { %v3474_v32 = vpop.f32.mrb[24].mxu0 }
 0xf97   :  { %v1479_v9 = vpop.f32.mrb[25].mxu0 }
 0xf98   :  { %3829 = vtanh.f32 %v1479_v9  ;;  %v3475_v39 = vpop.f32.mrb[26].mxu0 }
 0xf99   :  { %3831 = vtanh.f32 %v3474_v32  ;;  %v1482_v14 = vpop.f32.mrb[27].mxu0 }
 0xf9a   :  { %3833 = vtanh.f32 %v1482_v14 }
 0xf9b   :  { %3835 = vtanh.f32 %v3475_v39 }
 0xfa2   :  { %v3830_v16 = vpop.eup %3829 }
 0xfa3   :  { %v3832_v19 = vpop.eup %3831  ;;  %v1498_v52 = vmul.f32 %v3830_v16, %v4284_v38 }
 0xfa4   :  { %v3834_v20 = vpop.eup %3833  ;;  %v1500_v58 = vmul.f32 %v3832_v19, %v4290_v46 }
 0xfa5   :  { %v1499_v23 = vmul.f32 %v3834_v20, %v4286_v40  ;;  %v3836_v45 = vpop.eup %3835 }
 0xfa6   :  { %v1501_v30 = vmul.f32 %v3836_v45, %v4293_v49 }
 0xfa7   :  { %v1502_v62 = vadd.f32 %v1499_v23, %v1498_v52 }
 0xfa9   :  { %v1503_v12 = vadd.f32 %v1502_v62, %v1500_v58 }
 0xfab   :  { %v1504_v55 = vadd.f32 %v1503_v12, %v1501_v30 }
 0xfad   :  { %v1505_v31 = vrot.slane %v1504_v55, 4 }
 0xfaf   :  { %v1506_v34 = vadd.f32 %v1505_v31, %v1504_v55 }
 0xfb1   :  { %v1507_v29 = vrot.slane %v1506_v34, 2 }
 0xfb3   :  { %v1508_v8 = vadd.f32 %v1507_v29, %v1506_v34 }
 0xfb5   :  { %v1509_v13 = vrot.slane %v1508_v8, 1 }
 0xfb7   :  { %v1510_v41 = vadd.f32 %v1509_v13, %v1508_v8 }
 0xfb9   :  { %3837 = vtanh.f32 %v1510_v41 }
 0xfc3   :  { %v3838_v44 = vpop.eup %3837 }
 0xfc4   :  { %v1523_v51 = vmul.f32 %v3838_v44, %v4315_v4 }
 0xfc6   :  { %v1524_v26 = vmax.f32 %v1523_v51, 0.0  ;;  %v1527_v28 = vmin.f32 %v1523_v51, 0.0 }
 0xfc8   :  { %v1525_v56 = vadd.f32 %v1524_v26, %v4324_v10  ;;  %v1528_v57 = vsub.f32 %v4324_v10, %v1527_v28 }
 0xfca   :  { %v1526_v60 = vmul.f32 %v1525_v56, %v1520_v53  ;;  %v1529_v48 = vmul.f32 %v1528_v57, %v1522_v25 }
 0xfcc   :  { %v1530_v35 = vadd.f32 %v1529_v48, %v1526_v60 }
 0xfce   :  { %v4767_v3 = vmul.f32 %v4330_v27, %v1530_v35 }
 0xfd0   :  { %v1533_v5 = vmul.f32 %v4764_v2, %v4767_v3 }
 0xfd2   :  { %v1534_v6 = vadd.f32 %v1533_v5, %v4725_v54 }
 0xfd4   :  { %1620 = vrot.lane.b32.xlu1 %v1534_v6, %s4165_s3  ;;  %v1539_v32 = vrot.slane %v1534_v6, %v4256_v15  ;;  %1618 = vrot.lane.b32.xlu0 %v1534_v6, %s4166_s26 }
 0xfd6   :  { %v1541_v9 = vmul.f32 %v1539_v32, %v4262_v18  ;;  %v1542_v39 = vmul.f32 %v1539_v32, %v4268_v22  ;;  %v1543_v14 = vmul.f32 %v1539_v32, %v4260_v17  ;;  %v1544_v16 = vmul.f32 %v1539_v32, %v4266_v21 }
 0xfd7   :  { %v1624_v32 = vmul.f32 %v1534_v6, %v4305_v0 }
 0xfd8   :  { %3839 = vtanh.f32 %v1541_v9 }
 0xfd9   :  { %3841 = vtanh.f32 %v1542_v39 }
 0xfda   :  { %3843 = vtanh.f32 %v1543_v14 }
 0xfdb   :  { %3845 = vtanh.f32 %v1544_v16 }
 0xfe2   :  { %v3840_v19 = vpop.eup %3839 }
 0xfe3   :  { %v3842_v20 = vpop.eup %3841 }
 0xfe4   :  { %v3844_v52 = vpop.eup %3843  ;;  %v1549_v23 = vpack.c.bf16 %v3842_v20, %v3840_v19 }
 0xfe5   :  { %v3846_v45 = vpop.eup %3845 }
 0xfe6   :  { %3476 = vmatprep.subr.bf16.mxu1 %v1549_v23  ;;  %v1550_v58 = vpack.c.bf16 %v3846_v45, %v3844_v52 }
 0xfe7   :  { %3477 = vmatpush3.bf16.msra.mxu1 %v1549_v23 }
 0xfe8   :  { %3478 = vmatprep.subr.bf16.mxu1 %v1550_v58 }
 0xfeb   :  { %3479 = vmatpush3.bf16.msra.mxu1 %v1550_v58 }
 0xfee   :  { %3481 = vmatmul.mubr.msk.bf16.vlgmr.msra.gmra.mrb[24].mxu1 %vm142_vm0, %v4278_v33 }
 0xfef   :  { %3496 = vmatprep.mubr.msk.bf16.mxu1 %vm142_vm0, %v4240_v11 }
0x1046   :  { %v1621_v25 = vpop.permute.xlu1 %1620  ;;  %v1619_v53 = vpop.permute.xlu0 %1618 }
0x1047   :  { %v1623_v56 = vsel %vm59_vm1, %v4300_v61, %v1621_v25  ;;  %v1622_v57 = vsel %vm58_vm2, %v4303_v63, %v1619_v53 }
0x1048   :  { %v1627_v48 = vmul.f32 %v1623_v56, %v4307_v1  ;;  %v1625_v35 = vmul.f32 %v1622_v57, %v4307_v1 }
0x104a   :  { %v1628_v14 = vadd.f32 %v1627_v48, %v1624_v32  ;;  %v1626_v16 = vadd.f32 %v1625_v35, %v1624_v32 }
0x10c1   :  { %v3482_v62 = vpop.f32.mrb[24].mxu1 }
0x10c2   :  { %v1585_v30 = vpop.f32.mrb[25].mxu1 }
0x10c3   :  { %3847 = vtanh.f32 %v1585_v30  ;;  %v3483_v12 = vpop.f32.mrb[26].mxu1 }
0x10c4   :  { %3849 = vtanh.f32 %v3482_v62  ;;  %v1588_v55 = vpop.f32.mrb[27].mxu1 }
0x10c5   :  { %3851 = vtanh.f32 %v1588_v55 }
0x10c6   :  { %3853 = vtanh.f32 %v3483_v12 }
0x10cd   :  { %v3848_v31 = vpop.eup %3847 }
0x10ce   :  { %v3850_v34 = vpop.eup %3849  ;;  %v1604_v8 = vmul.f32 %v3848_v31, %v4284_v38 }
0x10cf   :  { %v3852_v29 = vpop.eup %3851  ;;  %v1606_v36 = vmul.f32 %v3850_v34, %v4290_v46 }
0x10d0   :  { %v1605_v13 = vmul.f32 %v3852_v29, %v4286_v40  ;;  %v3854_v41 = vpop.eup %3853 }
0x10d1   :  { %v1607_v43 = vmul.f32 %v3854_v41, %v4293_v49 }
0x10d2   :  { %v1608_v42 = vadd.f32 %v1605_v13, %v1604_v8 }
0x10d4   :  { %v1609_v24 = vadd.f32 %v1608_v42, %v1606_v36 }
0x10d6   :  { %v1610_v44 = vadd.f32 %v1609_v24, %v1607_v43 }
0x10d8   :  { %v1611_v47 = vrot.slane %v1610_v44, 4 }
0x10da   :  { %v1612_v50 = vadd.f32 %v1611_v47, %v1610_v44 }
0x10dc   :  { %v1613_v51 = vrot.slane %v1612_v50, 2 }
0x10de   :  { %v1614_v7 = vadd.f32 %v1613_v51, %v1612_v50 }
0x10e0   :  { %v1615_v26 = vrot.slane %v1614_v7, 1 }
0x10e2   :  { %v1616_v28 = vadd.f32 %v1615_v26, %v1614_v7 }
0x10e4   :  { %3855 = vtanh.f32 %v1616_v28 }
0x10ee   :  { %v3856_v60 = vpop.eup %3855 }
0x10ef   :  { %v1629_v5 = vmul.f32 %v3856_v60, %v4315_v4 }
0x10f1   :  { %v1630_v9 = vmax.f32 %v1629_v5, 0.0  ;;  %v1633_v39 = vmin.f32 %v1629_v5, 0.0 }
0x10f3   :  { %v1631_v19 = vadd.f32 %v1630_v9, %v4324_v10  ;;  %v1634_v20 = vsub.f32 %v4324_v10, %v1633_v39 }
0x10f5   :  { %v1632_v52 = vmul.f32 %v1631_v19, %v1626_v16  ;;  %v1635_v23 = vmul.f32 %v1634_v20, %v1628_v14 }
0x10f7   :  { %v1636_v45 = vadd.f32 %v1635_v23, %v1632_v52 }
0x10f9   :  { %v4800_v58 = vmul.f32 %v4330_v27, %v1636_v45 }
0x10fb   :  { %v1638_v62 = vmul.f32 %v4800_v58, %v4764_v2 }
0x10fd   :  { %v1639_v30 = vadd.f32 %v1638_v62, %v4725_v54 }
0x10ff   :  { %1725 = vrot.lane.b32.xlu1 %v1639_v30, %s4165_s3  ;;  %v1644_v6 = vrot.slane %v1639_v30, %v4256_v15  ;;  %1723 = vrot.lane.b32.xlu0 %v1639_v30, %s4166_s26 }
0x1101   :  { %v1646_v12 = vmul.f32 %v1644_v6, %v4262_v18  ;;  %v1647_v55 = vmul.f32 %v1644_v6, %v4268_v22  ;;  %v1648_v31 = vmul.f32 %v1644_v6, %v4260_v17  ;;  %v1649_v34 = vmul.f32 %v1644_v6, %v4266_v21 }
0x1102   :  { %v1729_v6 = vmul.f32 %v1639_v30, %v4305_v0 }
0x1103   :  { %3857 = vtanh.f32 %v1646_v12 }
0x1104   :  { %3859 = vtanh.f32 %v1647_v55 }
0x1105   :  { %3861 = vtanh.f32 %v1648_v31 }
0x1106   :  { %3863 = vtanh.f32 %v1649_v34 }
0x110d   :  { %v3858_v2 = vpop.eup %3857 }
0x110e   :  { %v3860_v29 = vpop.eup %3859 }
0x110f   :  { %v3862_v8 = vpop.eup %3861  ;;  %v1654_v13 = vpack.c.bf16 %v3860_v29, %v3858_v2 }
0x1110   :  { %v3864_v41 = vpop.eup %3863 }
0x1111   :  { %3484 = vmatprep.subr.bf16.mxu0 %v1654_v13  ;;  %v1655_v36 = vpack.c.bf16 %v3864_v41, %v3862_v8 }
0x1112   :  { %3485 = vmatpush3.bf16.msra.mxu0 %v1654_v13 }
0x1113   :  { %3486 = vmatprep.subr.bf16.mxu0 %v1655_v36 }
0x1116   :  { %3487 = vmatpush3.bf16.msra.mxu0 %v1655_v36  ;;  %v1743_v36 = vstv %s4754_s20 }
0x1119   :  { %3489 = vmatmul.mubr.msk.bf16.vlgmr.msra.gmra.mrb[28].mxu0 %vm142_vm0, %v4278_v33 }
0x111a   :  { %3504 = vmatprep.mubr.msk.bf16.mxu0 %vm142_vm0, %v4240_v11 }
0x1171   :  { %v1726_v14 = vpop.permute.xlu1 %1725  ;;  %v1724_v16 = vpop.permute.xlu0 %1723 }
0x1172   :  { %v1728_v19 = vsel %vm59_vm1, %v4300_v61, %v1726_v14  ;;  %v1727_v20 = vsel %vm58_vm2, %v4303_v63, %v1724_v16 }
0x1173   :  { %v1732_v23 = vmul.f32 %v1728_v19, %v4307_v1  ;;  %v1730_v45 = vmul.f32 %v1727_v20, %v4307_v1 }
0x1175   :  { %v1733_v31 = vadd.f32 %v1732_v23, %v1729_v6  ;;  %v1731_v34 = vadd.f32 %v1730_v45, %v1729_v6 }
0x11ec   :  { %v3490_v42 = vpop.f32.mrb[28].mxu0 }
0x11ed   :  { %v1690_v43 = vpop.f32.mrb[29].mxu0 }
0x11ee   :  { %3865 = vtanh.f32 %v1690_v43  ;;  %v3491_v24 = vpop.f32.mrb[30].mxu0 }
0x11ef   :  { %3867 = vtanh.f32 %v3490_v42  ;;  %v1693_v44 = vpop.f32.mrb[31].mxu0 }
0x11f0   :  { %3869 = vtanh.f32 %v1693_v44 }
0x11f1   :  { %3871 = vtanh.f32 %v3491_v24 }
0x11f8   :  { %v3866_v47 = vpop.eup %3865 }
0x11f9   :  { %v3868_v50 = vpop.eup %3867  ;;  %v1709_v7 = vmul.f32 %v3866_v47, %v4284_v38 }
0x11fa   :  { %v3870_v51 = vpop.eup %3869  ;;  %v1711_v25 = vmul.f32 %v3868_v50, %v4290_v46 }
0x11fb   :  { %v1710_v26 = vmul.f32 %v3870_v51, %v4286_v40  ;;  %v3872_v28 = vpop.eup %3871 }
0x11fc   :  { %v1712_v56 = vmul.f32 %v3872_v28, %v4293_v49 }
0x11fd   :  { %v1713_v53 = vadd.f32 %v1710_v26, %v1709_v7 }
0x11ff   :  { %v1714_v57 = vadd.f32 %v1713_v53, %v1711_v25 }
0x1201   :  { %v1715_v60 = vadd.f32 %v1714_v57, %v1712_v56 }
0x1203   :  { %v1716_v48 = vrot.slane %v1715_v60, 4 }
0x1205   :  { %v1717_v35 = vadd.f32 %v1716_v48, %v1715_v60 }
0x1207   :  { %v1718_v5 = vrot.slane %v1717_v35, 2 }
0x1209   :  { %v1719_v32 = vadd.f32 %v1718_v5, %v1717_v35 }
0x120b   :  { %v1720_v9 = vrot.slane %v1719_v32, 1 }
0x120d   :  { %v1721_v39 = vadd.f32 %v1720_v9, %v1719_v32 }
0x120f   :  { %3873 = vtanh.f32 %v1721_v39 }
0x1219   :  { %v3874_v52 = vpop.eup %3873 }
0x121a   :  { %v1734_v62 = vmul.f32 %v3874_v52, %v4315_v4 }
0x121c   :  { %v1735_v12 = vmax.f32 %v1734_v62, 0.0  ;;  %v1738_v55 = vmin.f32 %v1734_v62, 0.0 }
0x121e   :  { %v1736_v2 = vadd.f32 %v1735_v12, %v4324_v10  ;;  %v1739_v29 = vsub.f32 %v4324_v10, %v1738_v55 }
0x1220   :  { %v1737_v8 = vmul.f32 %v1736_v2, %v1731_v34  ;;  %v1740_v13 = vmul.f32 %v1739_v29, %v1733_v31 }
0x1222   :  { %v1741_v41 = vadd.f32 %v1740_v13, %v1737_v8 }
0x1224   :  { %v1742_v42 = vmul.f32 %v4330_v27, %v1741_v41 }
0x1226   :  { %v1744_v43 = vmul.f32 %v1743_v36, %v1742_v42 }
0x1228   :  { %v1745_v24 = vadd.f32 %v1744_v43, %v4725_v54 }
0x122a   :  { %1831 = vrot.lane.b32.xlu1 %v1745_v24, %s4165_s3  ;;  %v1750_v30 = vrot.slane %v1745_v24, %v4256_v15  ;;  %1829 = vrot.lane.b32.xlu0 %v1745_v24, %s4166_s26 }
0x122c   :  { %v1752_v44 = vmul.f32 %v1750_v30, %v4262_v18  ;;  %v1753_v47 = vmul.f32 %v1750_v30, %v4268_v22  ;;  %v1754_v50 = vmul.f32 %v1750_v30, %v4260_v17  ;;  %v1755_v51 = vmul.f32 %v1750_v30, %v4266_v21 }
0x122e   :  { %3875 = vtanh.f32 %v1752_v44  ;;  %v1852_v44 = vadd.f32 %v1742_v42, %v4800_v58  ;;  %v1856_v58 = vstv %s1851_s21 }
0x122f   :  { %3877 = vtanh.f32 %v1753_v47  ;;  %v1835_v47 = vmul.f32 %v1745_v24, %v4305_v0 }
0x1230   :  { %3879 = vtanh.f32 %v1754_v50 }
0x1231   :  { %3881 = vtanh.f32 %v1755_v51 }
0x1238   :  { %v3876_v7 = vpop.eup %3875 }
0x1239   :  { %v3878_v26 = vpop.eup %3877 }
0x123a   :  { %v3880_v28 = vpop.eup %3879  ;;  %v1760_v25 = vpack.c.bf16 %v3878_v26, %v3876_v7 }
0x123b   :  { %v3882_v53 = vpop.eup %3881 }
0x123c   :  { %3492 = vmatprep.subr.bf16.mxu1 %v1760_v25  ;;  %v1761_v56 = vpack.c.bf16 %v3882_v53, %v3880_v28  ;;  %v1853_v53 = vmul.f32 2.0, %v1852_v44 }
0x123d   :  { %3493 = vmatpush3.bf16.msra.mxu1 %v1760_v25 }
0x123e   :  { %3494 = vmatprep.subr.bf16.mxu1 %v1761_v56 }
0x1241   :  { %3495 = vmatpush3.bf16.msra.mxu1 %v1761_v56 }
0x1244   :  { %3497 = vmatmul.mubr.msk.bf16.vlgmr.msra.gmra.mrb[28].mxu1 %vm142_vm0, %v4278_v33 }
0x1245   :  { %3512 = vmatprep.mubr.msk.bf16.mxu1 %vm142_vm0, %v4240_v11 }
0x129c   :  { %v1832_v2 = vpop.permute.xlu1 %1831  ;;  %v1830_v29 = vpop.permute.xlu0 %1829 }
0x129d   :  { %v1834_v8 = vsel %vm59_vm1, %v4300_v61, %v1832_v2  ;;  %v1833_v13 = vsel %vm58_vm2, %v4303_v63, %v1830_v29 }
0x129e   :  { %v1838_v36 = vmul.f32 %v1834_v8, %v4307_v1  ;;  %v1836_v43 = vmul.f32 %v1833_v13, %v4307_v1 }
0x12a0   :  { %v1839_v7 = vadd.f32 %v1838_v36, %v1835_v47  ;;  %v1837_v26 = vadd.f32 %v1836_v43, %v1835_v47 }
0x1317   :  { %v3498_v57 = vpop.f32.mrb[28].mxu1 }
0x1318   :  { %v1796_v60 = vpop.f32.mrb[29].mxu1 }
0x1319   :  { %3883 = vtanh.f32 %v1796_v60  ;;  %v3499_v48 = vpop.f32.mrb[30].mxu1 }
0x131a   :  { %3885 = vtanh.f32 %v3498_v57  ;;  %v1799_v35 = vpop.f32.mrb[31].mxu1 }
0x131b   :  { %3887 = vtanh.f32 %v1799_v35 }
0x131c   :  { %3889 = vtanh.f32 %v3499_v48  ;;  %v1854_v48 = vadd.f32 %v1853_v53, %v4767_v3 }
0x1323   :  { %v3884_v5 = vpop.eup %3883 }
0x1324   :  { %v3886_v32 = vpop.eup %3885  ;;  %v1815_v39 = vmul.f32 %v3884_v5, %v4284_v38 }
0x1325   :  { %v3888_v9 = vpop.eup %3887  ;;  %v1817_v19 = vmul.f32 %v3886_v32, %v4290_v46 }
0x1326   :  { %v1816_v14 = vmul.f32 %v3888_v9, %v4286_v40  ;;  %v3890_v16 = vpop.eup %3889 }
0x1327   :  { %v1818_v52 = vmul.f32 %v3890_v16, %v4293_v49 }
0x1328   :  { %v1819_v20 = vadd.f32 %v1816_v14, %v1815_v39 }
0x132a   :  { %v1820_v23 = vadd.f32 %v1819_v20, %v1817_v19 }
0x132c   :  { %v1821_v45 = vadd.f32 %v1820_v23, %v1818_v52 }
0x132e   :  { %v1822_v62 = vrot.slane %v1821_v45, 4 }
0x1330   :  { %v1823_v6 = vadd.f32 %v1822_v62, %v1821_v45 }
0x1332   :  { %v1824_v12 = vrot.slane %v1823_v6, 2 }
0x1334   :  { %v1825_v55 = vadd.f32 %v1824_v12, %v1823_v6 }
0x1336   :  { %v1826_v31 = vrot.slane %v1825_v55, 1 }
0x1338   :  { %v1827_v34 = vadd.f32 %v1826_v31, %v1825_v55 }
0x133a   :  { %3891 = vtanh.f32 %v1827_v34 }
0x1344   :  { %v3892_v41 = vpop.eup %3891 }
0x1345   :  { %v1840_v30 = vmul.f32 %v3892_v41, %v4315_v4 }
0x1347   :  { %v1841_v50 = vmax.f32 %v1840_v30, 0.0  ;;  %v1844_v51 = vmin.f32 %v1840_v30, 0.0 }
0x1349   :  { %v1842_v28 = vadd.f32 %v1841_v50, %v4324_v10  ;;  %v1845_v25 = vsub.f32 %v4324_v10, %v1844_v51 }
0x134b   :  { %v1843_v56 = vmul.f32 %v1842_v28, %v1837_v26  ;;  %v1846_v57 = vmul.f32 %v1845_v25, %v1839_v7 }
0x134d   :  { %v1847_v60 = vadd.f32 %v1846_v57, %v1843_v56 }
0x134f   :  { %v1848_v35 = vmul.f32 %v4330_v27, %v1847_v60 }
0x1351   :  { %v1855_v42 = vadd.f32 %v1854_v48, %v1848_v35 }
0x1353   :  { %v1857_v24 = vmul.f32 %v1856_v58, %v1855_v42 }
0x1355   :  { %v4867_v5 = vadd.f32 %v1857_v24, %v4725_v54 }
0x1357   :  { %1946 = vrot.lane.b32.xlu1 %v4867_v5, %s4165_s3  ;;  %1944 = vrot.lane.b32.xlu0 %v4867_v5, %s4166_s26  ;;  %v1865_v32 = vrot.slane %v4867_v5, %v4256_v15  ;;  %v1950_v58 = vmul.f32 %v4867_v5, %v4305_v0 }
0x1359   :  { %v1867_v3 = vmul.f32 %v1865_v32, %v4262_v18  ;;  %v1868_v9 = vmul.f32 %v1865_v32, %v4268_v22  ;;  %v1869_v39 = vmul.f32 %v1865_v32, %v4260_v17  ;;  %v1870_v14 = vmul.f32 %v1865_v32, %v4266_v21 }
0x135a   :  { %v4880_v54 = vsel %vm3167_vm7, %v4738_v37, %v1865_v32 }
0x135b   :  { %3893 = vtanh.f32 %v1867_v3 }
0x135c   :  { %3895 = vtanh.f32 %v1868_v9 }
0x135d   :  { %3897 = vtanh.f32 %v1869_v39 }
0x135e   :  { %3899 = vtanh.f32 %v1870_v14 }
0x1365   :  { %v3894_v16 = vpop.eup %3893 }
0x1366   :  { %v3896_v19 = vpop.eup %3895 }
0x1367   :  { %v3898_v20 = vpop.eup %3897  ;;  %v1875_v52 = vpack.c.bf16 %v3896_v19, %v3894_v16 }
0x1368   :  { %v3900_v23 = vpop.eup %3899 }
0x1369   :  { %3500 = vmatprep.subr.bf16.mxu0 %v1875_v52  ;;  %v1876_v45 = vpack.c.bf16 %v3900_v23, %v3898_v20  ;;  %v4906_v20 = vstv %s1860_s23 }
0x136a   :  { %3501 = vmatpush3.bf16.msra.mxu0 %v1875_v52 }
0x136b   :  { %3502 = vmatprep.subr.bf16.mxu0 %v1876_v45 }
0x136e   :  { %3503 = vmatpush3.bf16.msra.mxu0 %v1876_v45 }
0x1371   :  { %3505 = vmatmul.mubr.msk.bf16.vlgmr.msra.gmra.mrb[32].mxu0 %vm142_vm0, %v4278_v33 }
0x1372   :  { %3520 = vmatprep.mubr.msk.bf16.mxu0 %vm142_vm0, %v4240_v11 }
0x13c9   :  { %v1947_v28 = vpop.permute.xlu1 %1946  ;;  %v1945_v25 = vpop.permute.xlu0 %1944 }
0x13ca   :  { %v1949_v53 = vsel %vm59_vm1, %v4300_v61, %v1947_v28  ;;  %v1948_v56 = vsel %vm58_vm2, %v4303_v63, %v1945_v25 }
0x13cb   :  { %v1953_v60 = vmul.f32 %v1949_v53, %v4307_v1  ;;  %v1951_v48 = vmul.f32 %v1948_v56, %v4307_v1 }
0x13cd   :  { %v1954_v32 = vadd.f32 %v1953_v60, %v1950_v58  ;;  %v1952_v3 = vadd.f32 %v1951_v48, %v1950_v58 }
0x1444   :  { %v3506_v37 = vpop.f32.mrb[32].mxu0 }
0x1445   :  { %v1911_v62 = vpop.f32.mrb[33].mxu0 }
0x1446   :  { %3901 = vtanh.f32 %v1911_v62  ;;  %v3507_v6 = vpop.f32.mrb[34].mxu0 }
0x1447   :  { %3903 = vtanh.f32 %v3506_v37  ;;  %v1914_v12 = vpop.f32.mrb[35].mxu0 }
0x1448   :  { %3905 = vtanh.f32 %v1914_v12 }
0x1449   :  { %3907 = vtanh.f32 %v3507_v6 }
0x1450   :  { %v3902_v55 = vpop.eup %3901 }
0x1451   :  { %v3904_v31 = vpop.eup %3903  ;;  %v1930_v2 = vmul.f32 %v3902_v55, %v4284_v38 }
0x1452   :  { %v3906_v34 = vpop.eup %3905  ;;  %v1932_v13 = vmul.f32 %v3904_v31, %v4290_v46 }
0x1453   :  { %v1931_v29 = vmul.f32 %v3906_v34, %v4286_v40  ;;  %v3908_v8 = vpop.eup %3907 }
0x1454   :  { %v1933_v36 = vmul.f32 %v3908_v8, %v4293_v49 }
0x1455   :  { %v1934_v41 = vadd.f32 %v1931_v29, %v1930_v2 }
0x1457   :  { %v1935_v43 = vadd.f32 %v1934_v41, %v1932_v13 }
0x1459   :  { %v1936_v30 = vadd.f32 %v1935_v43, %v1933_v36 }
0x145b   :  { %v1937_v44 = vrot.slane %v1936_v30, 4 }
0x145d   :  { %v1938_v47 = vadd.f32 %v1937_v44, %v1936_v30 }
0x145f   :  { %v1939_v50 = vrot.slane %v1938_v47, 2 }
0x1461   :  { %v1940_v51 = vadd.f32 %v1939_v50, %v1938_v47 }
0x1463   :  { %v1941_v7 = vrot.slane %v1940_v51, 1 }
0x1465   :  { %v1942_v26 = vadd.f32 %v1941_v7, %v1940_v51 }
0x1467   :  { %3909 = vtanh.f32 %v1942_v26 }
0x1471   :  { %v3910_v57 = vpop.eup %3909 }
0x1472   :  { %v1955_v35 = vmul.f32 %v3910_v57, %v4315_v4 }
0x1474   :  { %v1956_v42 = vmax.f32 %v1955_v35, 0.0  ;;  %v1959_v24 = vmin.f32 %v1955_v35, 0.0 }
0x1476   :  { %v1957_v9 = vadd.f32 %v1956_v42, %v4324_v10  ;;  %v1960_v39 = vsub.f32 %v4324_v10, %v1959_v24 }
0x1478   :  { %v1958_v14 = vmul.f32 %v1957_v9, %v1952_v3  ;;  %v1961_v16 = vmul.f32 %v1960_v39, %v1954_v32 }
0x147a   :  { %v1962_v19 = vadd.f32 %v1961_v16, %v1958_v14 }
0x147c   :  { %v4909_v52 = vmul.f32 %v4330_v27, %v1962_v19 }
0x147e   :  { %v1965_v23 = vmul.f32 %v4906_v20, %v4909_v52 }
0x1480   :  { %v1966_v45 = vadd.f32 %v1965_v23, %v4867_v5 }
0x1482   :  { %2052 = vrot.lane.b32.xlu1 %v1966_v45, %s4165_s3  ;;  %v1971_v37 = vrot.slane %v1966_v45, %v4256_v15  ;;  %2050 = vrot.lane.b32.xlu0 %v1966_v45, %s4166_s26 }
0x1484   :  { %v1973_v62 = vmul.f32 %v1971_v37, %v4262_v18  ;;  %v1974_v6 = vmul.f32 %v1971_v37, %v4268_v22  ;;  %v1975_v12 = vmul.f32 %v1971_v37, %v4260_v17  ;;  %v1976_v55 = vmul.f32 %v1971_v37, %v4266_v21 }
0x1485   :  { %v2056_v37 = vmul.f32 %v1966_v45, %v4305_v0 }
0x1486   :  { %3911 = vtanh.f32 %v1973_v62 }
0x1487   :  { %3913 = vtanh.f32 %v1974_v6 }
0x1488   :  { %3915 = vtanh.f32 %v1975_v12 }
0x1489   :  { %3917 = vtanh.f32 %v1976_v55 }
0x1490   :  { %v3912_v31 = vpop.eup %3911 }
0x1491   :  { %v3914_v34 = vpop.eup %3913 }
0x1492   :  { %v3916_v2 = vpop.eup %3915  ;;  %v1981_v29 = vpack.c.bf16 %v3914_v34, %v3912_v31 }
0x1493   :  { %v3918_v8 = vpop.eup %3917 }
0x1494   :  { %3508 = vmatprep.subr.bf16.mxu1 %v1981_v29  ;;  %v1982_v13 = vpack.c.bf16 %v3918_v8, %v3916_v2 }
0x1495   :  { %3509 = vmatpush3.bf16.msra.mxu1 %v1981_v29 }
0x1496   :  { %3510 = vmatprep.subr.bf16.mxu1 %v1982_v13 }
0x1499   :  { %3511 = vmatpush3.bf16.msra.mxu1 %v1982_v13 }
0x149c   :  { %3513 = vmatmul.mubr.msk.bf16.vlgmr.msra.gmra.mrb[32].mxu1 %vm142_vm0, %v4278_v33 }
0x149d   :  { %3528 = vmatprep.mubr.msk.bf16.mxu1 %vm142_vm0, %v4240_v11 }
0x14f4   :  { %v2053_v32 = vpop.permute.xlu1 %2052  ;;  %v2051_v3 = vpop.permute.xlu0 %2050 }
0x14f5   :  { %v2055_v9 = vsel %vm59_vm1, %v4300_v61, %v2053_v32  ;;  %v2054_v39 = vsel %vm58_vm2, %v4303_v63, %v2051_v3 }
0x14f6   :  { %v2059_v16 = vmul.f32 %v2055_v9, %v4307_v1  ;;  %v2057_v19 = vmul.f32 %v2054_v39, %v4307_v1 }
0x14f8   :  { %v2060_v12 = vadd.f32 %v2059_v16, %v2056_v37  ;;  %v2058_v55 = vadd.f32 %v2057_v19, %v2056_v37 }
0x156f   :  { %v3514_v41 = vpop.f32.mrb[32].mxu1 }
0x1570   :  { %v2017_v36 = vpop.f32.mrb[33].mxu1 }
0x1571   :  { %3919 = vtanh.f32 %v2017_v36  ;;  %v3515_v43 = vpop.f32.mrb[34].mxu1 }
0x1572   :  { %3921 = vtanh.f32 %v3514_v41  ;;  %v2020_v30 = vpop.f32.mrb[35].mxu1 }
0x1573   :  { %3923 = vtanh.f32 %v2020_v30 }
0x1574   :  { %3925 = vtanh.f32 %v3515_v43 }
0x157b   :  { %v3920_v44 = vpop.eup %3919 }
0x157c   :  { %v3922_v47 = vpop.eup %3921  ;;  %v2036_v51 = vmul.f32 %v3920_v44, %v4284_v38 }
0x157d   :  { %v3924_v50 = vpop.eup %3923  ;;  %v2038_v28 = vmul.f32 %v3922_v47, %v4290_v46 }
0x157e   :  { %v2037_v7 = vmul.f32 %v3924_v50, %v4286_v40  ;;  %v3926_v26 = vpop.eup %3925 }
0x157f   :  { %v2039_v53 = vmul.f32 %v3926_v26, %v4293_v49 }
0x1580   :  { %v2040_v25 = vadd.f32 %v2037_v7, %v2036_v51 }
0x1582   :  { %v2041_v56 = vadd.f32 %v2040_v25, %v2038_v28 }
0x1584   :  { %v2042_v57 = vadd.f32 %v2041_v56, %v2039_v53 }
0x1586   :  { %v2043_v60 = vrot.slane %v2042_v57, 4 }
0x1588   :  { %v2044_v48 = vadd.f32 %v2043_v60, %v2042_v57 }
0x158a   :  { %v2045_v35 = vrot.slane %v2044_v48, 2 }
0x158c   :  { %v2046_v58 = vadd.f32 %v2045_v35, %v2044_v48 }
0x158e   :  { %v2047_v42 = vrot.slane %v2046_v58, 1 }
0x1590   :  { %v2048_v24 = vadd.f32 %v2047_v42, %v2046_v58 }
0x1592   :  { %3927 = vtanh.f32 %v2048_v24 }
0x159c   :  { %v3928_v14 = vpop.eup %3927 }
0x159d   :  { %v2061_v23 = vmul.f32 %v3928_v14, %v4315_v4 }
0x159f   :  { %v2062_v62 = vmax.f32 %v2061_v23, 0.0  ;;  %v2065_v6 = vmin.f32 %v2061_v23, 0.0 }
0x15a1   :  { %v2063_v31 = vadd.f32 %v2062_v62, %v4324_v10  ;;  %v2066_v34 = vsub.f32 %v4324_v10, %v2065_v6 }
0x15a3   :  { %v2064_v2 = vmul.f32 %v2063_v31, %v2058_v55  ;;  %v2067_v29 = vmul.f32 %v2066_v34, %v2060_v12 }
0x15a5   :  { %v2068_v8 = vadd.f32 %v2067_v29, %v2064_v2 }
0x15a7   :  { %v4942_v13 = vmul.f32 %v4330_v27, %v2068_v8 }
0x15a9   :  { %v2070_v41 = vmul.f32 %v4942_v13, %v4906_v20 }
0x15ab   :  { %v2071_v36 = vadd.f32 %v2070_v41, %v4867_v5 }
0x15ad   :  { %2157 = vrot.lane.b32.xlu1 %v2071_v36, %s4165_s3  ;;  %v2076_v45 = vrot.slane %v2071_v36, %v4256_v15  ;;  %2155 = vrot.lane.b32.xlu0 %v2071_v36, %s4166_s26 }
0x15af   :  { %v2078_v43 = vmul.f32 %v2076_v45, %v4262_v18  ;;  %v2079_v30 = vmul.f32 %v2076_v45, %v4268_v22  ;;  %v2080_v44 = vmul.f32 %v2076_v45, %v4260_v17  ;;  %v2081_v47 = vmul.f32 %v2076_v45, %v4266_v21 }
0x15b0   :  { %v2161_v45 = vmul.f32 %v2071_v36, %v4305_v0 }
0x15b1   :  { %3929 = vtanh.f32 %v2078_v43 }
0x15b2   :  { %3931 = vtanh.f32 %v2079_v30 }
0x15b3   :  { %3933 = vtanh.f32 %v2080_v44 }
0x15b4   :  { %3935 = vtanh.f32 %v2081_v47 }
0x15bb   :  { %v3930_v20 = vpop.eup %3929 }
0x15bc   :  { %v3932_v50 = vpop.eup %3931 }
0x15bd   :  { %v3934_v51 = vpop.eup %3933  ;;  %v2086_v7 = vpack.c.bf16 %v3932_v50, %v3930_v20 }
0x15be   :  { %v3936_v26 = vpop.eup %3935 }
0x15bf   :  { %3516 = vmatprep.subr.bf16.mxu0 %v2086_v7  ;;  %v2087_v28 = vpack.c.bf16 %v3936_v26, %v3934_v51 }
0x15c0   :  { %3517 = vmatpush3.bf16.msra.mxu0 %v2086_v7 }
0x15c1   :  { %3518 = vmatprep.subr.bf16.mxu0 %v2087_v28 }
0x15c4   :  { %3519 = vmatpush3.bf16.msra.mxu0 %v2087_v28  ;;  %v2175_v28 = vstv %s4896_s22 }
0x15c7   :  { %3521 = vmatmul.mubr.msk.bf16.vlgmr.msra.gmra.mrb[36].mxu0 %vm142_vm0, %v4278_v33 }
0x15c8   :  { %3536 = vmatprep.mubr.msk.bf16.mxu0 %vm142_vm0, %v4240_v11 }
0x161f   :  { %v2158_v12 = vpop.permute.xlu1 %2157  ;;  %v2156_v55 = vpop.permute.xlu0 %2155 }
0x1620   :  { %v2160_v31 = vsel %vm59_vm1, %v4300_v61, %v2158_v12  ;;  %v2159_v34 = vsel %vm58_vm2, %v4303_v63, %v2156_v55 }
0x1621   :  { %v2164_v29 = vmul.f32 %v2160_v31, %v4307_v1  ;;  %v2162_v8 = vmul.f32 %v2159_v34, %v4307_v1 }
0x1623   :  { %v2165_v44 = vadd.f32 %v2164_v29, %v2161_v45  ;;  %v2163_v47 = vadd.f32 %v2162_v8, %v2161_v45 }
0x169a   :  { %v3522_v25 = vpop.f32.mrb[36].mxu0 }
0x169b   :  { %v2122_v53 = vpop.f32.mrb[37].mxu0 }
0x169c   :  { %3937 = vtanh.f32 %v2122_v53  ;;  %v3523_v56 = vpop.f32.mrb[38].mxu0 }
0x169d   :  { %3939 = vtanh.f32 %v3522_v25  ;;  %v2125_v57 = vpop.f32.mrb[39].mxu0 }
0x169e   :  { %3941 = vtanh.f32 %v2125_v57 }
0x169f   :  { %3943 = vtanh.f32 %v3523_v56 }
0x16a6   :  { %v3938_v60 = vpop.eup %3937 }
0x16a7   :  { %v3940_v48 = vpop.eup %3939  ;;  %v2141_v58 = vmul.f32 %v3938_v60, %v4284_v38 }
0x16a8   :  { %v3942_v35 = vpop.eup %3941  ;;  %v2143_v32 = vmul.f32 %v3940_v48, %v4290_v46 }
0x16a9   :  { %v2142_v42 = vmul.f32 %v3942_v35, %v4286_v40  ;;  %v3944_v24 = vpop.eup %3943 }
0x16aa   :  { %v2144_v9 = vmul.f32 %v3944_v24, %v4293_v49 }
0x16ab   :  { %v2145_v3 = vadd.f32 %v2142_v42, %v2141_v58 }
0x16ad   :  { %v2146_v39 = vadd.f32 %v2145_v3, %v2143_v32 }
0x16af   :  { %v2147_v14 = vadd.f32 %v2146_v39, %v2144_v9 }
0x16b1   :  { %v2148_v16 = vrot.slane %v2147_v14, 4 }
0x16b3   :  { %v2149_v19 = vadd.f32 %v2148_v16, %v2147_v14 }
0x16b5   :  { %v2150_v23 = vrot.slane %v2149_v19, 2 }
0x16b7   :  { %v2151_v37 = vadd.f32 %v2150_v23, %v2149_v19 }
0x16b9   :  { %v2152_v62 = vrot.slane %v2151_v37, 1 }
0x16bb   :  { %v2153_v6 = vadd.f32 %v2152_v62, %v2151_v37 }
0x16bd   :  { %3945 = vtanh.f32 %v2153_v6 }
0x16c7   :  { %v3946_v2 = vpop.eup %3945 }
0x16c8   :  { %v2166_v41 = vmul.f32 %v3946_v2, %v4315_v4 }
0x16ca   :  { %v2167_v43 = vmax.f32 %v2166_v41, 0.0  ;;  %v2170_v30 = vmin.f32 %v2166_v41, 0.0 }
0x16cc   :  { %v2168_v20 = vadd.f32 %v2167_v43, %v4324_v10  ;;  %v2171_v50 = vsub.f32 %v4324_v10, %v2170_v30 }
0x16ce   :  { %v2169_v51 = vmul.f32 %v2168_v20, %v2163_v47  ;;  %v2172_v7 = vmul.f32 %v2171_v50, %v2165_v44 }
0x16d0   :  { %v2173_v26 = vadd.f32 %v2172_v7, %v2169_v51 }
0x16d2   :  { %v2174_v25 = vmul.f32 %v4330_v27, %v2173_v26 }
0x16d4   :  { %v2176_v53 = vmul.f32 %v2175_v28, %v2174_v25 }
0x16d6   :  { %v2177_v56 = vadd.f32 %v2176_v53, %v4867_v5 }
0x16d8   :  { %2263 = vrot.lane.b32.xlu1 %v2177_v56, %s4165_s3  ;;  %v2182_v36 = vrot.slane %v2177_v56, %v4256_v15  ;;  %2261 = vrot.lane.b32.xlu0 %v2177_v56, %s4166_s26 }
0x16da   :  { %v2184_v57 = vmul.f32 %v2182_v36, %v4262_v18  ;;  %v2185_v60 = vmul.f32 %v2182_v36, %v4268_v22  ;;  %v2186_v48 = vmul.f32 %v2182_v36, %v4260_v17  ;;  %v2187_v35 = vmul.f32 %v2182_v36, %v4266_v21 }
0x16dc   :  { %3947 = vtanh.f32 %v2184_v57  ;;  %v2284_v57 = vadd.f32 %v2174_v25, %v4942_v13  ;;  %v2288_v13 = vstv %s2283_s24 }
0x16dd   :  { %3949 = vtanh.f32 %v2185_v60  ;;  %v2267_v60 = vmul.f32 %v2177_v56, %v4305_v0 }
0x16de   :  { %3951 = vtanh.f32 %v2186_v48 }
0x16df   :  { %3953 = vtanh.f32 %v2187_v35 }
0x16e6   :  { %v3948_v58 = vpop.eup %3947 }
0x16e7   :  { %v3950_v42 = vpop.eup %3949 }
0x16e8   :  { %v3952_v24 = vpop.eup %3951  ;;  %v2192_v32 = vpack.c.bf16 %v3950_v42, %v3948_v58 }
0x16e9   :  { %v3954_v3 = vpop.eup %3953 }
0x16ea   :  { %3524 = vmatprep.subr.bf16.mxu1 %v2192_v32  ;;  %v2193_v9 = vpack.c.bf16 %v3954_v3, %v3952_v24  ;;  %v2285_v3 = vmul.f32 2.0, %v2284_v57 }
0x16eb   :  { %3525 = vmatpush3.bf16.msra.mxu1 %v2192_v32 }
0x16ec   :  { %3526 = vmatprep.subr.bf16.mxu1 %v2193_v9 }
0x16ef   :  { %3527 = vmatpush3.bf16.msra.mxu1 %v2193_v9 }
0x16f2   :  { %3529 = vmatmul.mubr.msk.bf16.vlgmr.msra.gmra.mrb[36].mxu1 %vm142_vm0, %v4278_v33 }
0x16f3   :  { %3544 = vmatprep.mubr.msk.bf16.mxu1 %vm142_vm0, %v4240_v11 }
0x174a   :  { %v2264_v20 = vpop.permute.xlu1 %2263  ;;  %v2262_v50 = vpop.permute.xlu0 %2261 }
0x174b   :  { %v2266_v51 = vsel %vm59_vm1, %v4300_v61, %v2264_v20  ;;  %v2265_v7 = vsel %vm58_vm2, %v4303_v63, %v2262_v50 }
0x174c   :  { %v2270_v28 = vmul.f32 %v2266_v51, %v4307_v1  ;;  %v2268_v53 = vmul.f32 %v2265_v7, %v4307_v1 }
0x174e   :  { %v2271_v58 = vadd.f32 %v2270_v28, %v2267_v60  ;;  %v2269_v42 = vadd.f32 %v2268_v53, %v2267_v60 }
0x17c5   :  { %v3530_v39 = vpop.f32.mrb[36].mxu1 }
0x17c6   :  { %v2228_v14 = vpop.f32.mrb[37].mxu1 }
0x17c7   :  { %3955 = vtanh.f32 %v2228_v14  ;;  %v3531_v16 = vpop.f32.mrb[38].mxu1 }
0x17c8   :  { %3957 = vtanh.f32 %v3530_v39  ;;  %v2231_v19 = vpop.f32.mrb[39].mxu1 }
0x17c9   :  { %3959 = vtanh.f32 %v2231_v19 }
0x17ca   :  { %3961 = vtanh.f32 %v3531_v16  ;;  %v2286_v16 = vadd.f32 %v2285_v3, %v4909_v52 }
0x17d1   :  { %v3956_v23 = vpop.eup %3955 }
0x17d2   :  { %v3958_v37 = vpop.eup %3957  ;;  %v2247_v6 = vmul.f32 %v3956_v23, %v4284_v38 }
0x17d3   :  { %v3960_v62 = vpop.eup %3959  ;;  %v2249_v31 = vmul.f32 %v3958_v37, %v4290_v46 }
0x17d4   :  { %v2248_v12 = vmul.f32 %v3960_v62, %v4286_v40  ;;  %v3962_v55 = vpop.eup %3961 }
0x17d5   :  { %v2250_v2 = vmul.f32 %v3962_v55, %v4293_v49 }
0x17d6   :  { %v2251_v34 = vadd.f32 %v2248_v12, %v2247_v6 }
0x17d8   :  { %v2252_v29 = vadd.f32 %v2251_v34, %v2249_v31 }
0x17da   :  { %v2253_v8 = vadd.f32 %v2252_v29, %v2250_v2 }
0x17dc   :  { %v2254_v41 = vrot.slane %v2253_v8, 4 }
0x17de   :  { %v2255_v45 = vadd.f32 %v2254_v41, %v2253_v8 }
0x17e0   :  { %v2256_v43 = vrot.slane %v2255_v45, 2 }
0x17e2   :  { %v2257_v30 = vadd.f32 %v2256_v43, %v2255_v45 }
0x17e4   :  { %v2258_v44 = vrot.slane %v2257_v30, 1 }
0x17e6   :  { %v2259_v47 = vadd.f32 %v2258_v44, %v2257_v30 }
0x17e8   :  { %3963 = vtanh.f32 %v2259_v47 }
0x17f2   :  { %v3964_v26 = vpop.eup %3963 }
0x17f3   :  { %v2272_v36 = vmul.f32 %v3964_v26, %v4315_v4 }
0x17f5   :  { %v2273_v48 = vmax.f32 %v2272_v36, 0.0  ;;  %v2276_v35 = vmin.f32 %v2272_v36, 0.0 }
0x17f7   :  { %v2274_v24 = vadd.f32 %v2273_v48, %v4324_v10  ;;  %v2277_v32 = vsub.f32 %v4324_v10, %v2276_v35 }
0x17f9   :  { %v2275_v9 = vmul.f32 %v2274_v24, %v2269_v42  ;;  %v2278_v39 = vmul.f32 %v2277_v32, %v2271_v58 }
0x17fb   :  { %v2279_v14 = vadd.f32 %v2278_v39, %v2275_v9 }
0x17fd   :  { %v2280_v19 = vmul.f32 %v4330_v27, %v2279_v14 }
0x17ff   :  { %v2287_v25 = vadd.f32 %v2286_v16, %v2280_v19 }
0x1801   :  { %v2289_v56 = vmul.f32 %v2288_v13, %v2287_v25 }
0x1803   :  { %v5009_v23 = vadd.f32 %v2289_v56, %v4867_v5 }
0x1805   :  { %2378 = vrot.lane.b32.xlu1 %v5009_v23, %s4165_s3  ;;  %2376 = vrot.lane.b32.xlu0 %v5009_v23, %s4166_s26  ;;  %v2297_v37 = vrot.slane %v5009_v23, %v4256_v15  ;;  %v2382_v13 = vmul.f32 %v5009_v23, %v4305_v0 }
0x1807   :  { %v2299_v52 = vmul.f32 %v2297_v37, %v4262_v18  ;;  %v2300_v62 = vmul.f32 %v2297_v37, %v4268_v22  ;;  %v2301_v6 = vmul.f32 %v2297_v37, %v4260_v17  ;;  %v2302_v12 = vmul.f32 %v2297_v37, %v4266_v21 }
0x1808   :  { %v5022_v5 = vsel %vm3169_vm8, %v4880_v54, %v2297_v37 }
0x1809   :  { %3965 = vtanh.f32 %v2299_v52 }
0x180a   :  { %3967 = vtanh.f32 %v2300_v62 }
0x180b   :  { %3969 = vtanh.f32 %v2301_v6 }
0x180c   :  { %3971 = vtanh.f32 %v2302_v12 }
0x1813   :  { %v3966_v55 = vpop.eup %3965 }
0x1814   :  { %v3968_v31 = vpop.eup %3967 }
0x1815   :  { %v3970_v34 = vpop.eup %3969  ;;  %v2307_v2 = vpack.c.bf16 %v3968_v31, %v3966_v55 }
0x1816   :  { %v3972_v29 = vpop.eup %3971 }
0x1817   :  { %3532 = vmatprep.subr.bf16.mxu0 %v2307_v2  ;;  %v2308_v8 = vpack.c.bf16 %v3972_v29, %v3970_v34  ;;  %v5048_v34 = vstv %s2292_s27 }
0x1818   :  { %3533 = vmatpush3.bf16.msra.mxu0 %v2307_v2 }
0x1819   :  { %3534 = vmatprep.subr.bf16.mxu0 %v2308_v8 }
0x181c   :  { %3535 = vmatpush3.bf16.msra.mxu0 %v2308_v8 }
0x181f   :  { %3537 = vmatmul.mubr.msk.bf16.vlgmr.msra.gmra.mrb[40].mxu0 %vm142_vm0, %v4278_v33 }
0x1820   :  { %3552 = vmatprep.mubr.msk.bf16.mxu0 %vm142_vm0, %v4240_v11 }
0x1877   :  { %v2379_v24 = vpop.permute.xlu1 %2378  ;;  %v2377_v32 = vpop.permute.xlu0 %2376 }
0x1878   :  { %v2381_v3 = vsel %vm59_vm1, %v4300_v61, %v2379_v24  ;;  %v2380_v9 = vsel %vm58_vm2, %v4303_v63, %v2377_v32 }
0x1879   :  { %v2385_v14 = vmul.f32 %v2381_v3, %v4307_v1  ;;  %v2383_v16 = vmul.f32 %v2380_v9, %v4307_v1 }
0x187b   :  { %v2386_v37 = vadd.f32 %v2385_v14, %v2382_v13  ;;  %v2384_v52 = vadd.f32 %v2383_v16, %v2382_v13 }
0x18f2   :  { %v3538_v54 = vpop.f32.mrb[40].mxu0 }
0x18f3   :  { %v2343_v41 = vpop.f32.mrb[41].mxu0 }
0x18f4   :  { %3973 = vtanh.f32 %v2343_v41  ;;  %v3539_v45 = vpop.f32.mrb[42].mxu0 }
0x18f5   :  { %3975 = vtanh.f32 %v3538_v54  ;;  %v2346_v43 = vpop.f32.mrb[43].mxu0 }
0x18f6   :  { %3977 = vtanh.f32 %v2346_v43 }
0x18f7   :  { %3979 = vtanh.f32 %v3539_v45 }
0x18fe   :  { %v3974_v30 = vpop.eup %3973 }
0x18ff   :  { %v3976_v44 = vpop.eup %3975  ;;  %v2362_v20 = vmul.f32 %v3974_v30, %v4284_v38 }
0x1900   :  { %v3978_v47 = vpop.eup %3977  ;;  %v2364_v7 = vmul.f32 %v3976_v44, %v4290_v46 }
0x1901   :  { %v2363_v50 = vmul.f32 %v3978_v47, %v4286_v40  ;;  %v3980_v51 = vpop.eup %3979 }
0x1902   :  { %v2365_v28 = vmul.f32 %v3980_v51, %v4293_v49 }
0x1903   :  { %v2366_v26 = vadd.f32 %v2363_v50, %v2362_v20 }
0x1905   :  { %v2367_v53 = vadd.f32 %v2366_v26, %v2364_v7 }
0x1907   :  { %v2368_v36 = vadd.f32 %v2367_v53, %v2365_v28 }
0x1909   :  { %v2369_v57 = vrot.slane %v2368_v36, 4 }
0x190b   :  { %v2370_v60 = vadd.f32 %v2369_v57, %v2368_v36 }
0x190d   :  { %v2371_v48 = vrot.slane %v2370_v60, 2 }
0x190f   :  { %v2372_v35 = vadd.f32 %v2371_v48, %v2370_v60 }
0x1911   :  { %v2373_v58 = vrot.slane %v2372_v35, 1 }
0x1913   :  { %v2374_v42 = vadd.f32 %v2373_v58, %v2372_v35 }
0x1915   :  { %3981 = vtanh.f32 %v2374_v42 }
0x191f   :  { %v3982_v39 = vpop.eup %3981 }
0x1920   :  { %v2387_v19 = vmul.f32 %v3982_v39, %v4315_v4 }
0x1922   :  { %v2388_v25 = vmax.f32 %v2387_v19, 0.0  ;;  %v2391_v56 = vmin.f32 %v2387_v19, 0.0 }
0x1924   :  { %v2389_v62 = vadd.f32 %v2388_v25, %v4324_v10  ;;  %v2392_v6 = vsub.f32 %v4324_v10, %v2391_v56 }
0x1926   :  { %v2390_v12 = vmul.f32 %v2389_v62, %v2384_v52  ;;  %v2393_v55 = vmul.f32 %v2392_v6, %v2386_v37 }
0x1928   :  { %v2394_v31 = vadd.f32 %v2393_v55, %v2390_v12 }
0x192a   :  { %v5051_v2 = vmul.f32 %v4330_v27, %v2394_v31 }
0x192c   :  { %v2397_v29 = vmul.f32 %v5048_v34, %v5051_v2 }
0x192e   :  { %v2398_v8 = vadd.f32 %v2397_v29, %v5009_v23 }
0x1930   :  { %2484 = vrot.lane.b32.xlu1 %v2398_v8, %s4165_s3  ;;  %v2403_v54 = vrot.slane %v2398_v8, %v4256_v15  ;;  %2482 = vrot.lane.b32.xlu0 %v2398_v8, %s4166_s26 }
0x1932   :  { %v2405_v41 = vmul.f32 %v2403_v54, %v4262_v18  ;;  %v2406_v45 = vmul.f32 %v2403_v54, %v4268_v22  ;;  %v2407_v43 = vmul.f32 %v2403_v54, %v4260_v17  ;;  %v2408_v30 = vmul.f32 %v2403_v54, %v4266_v21 }
0x1933   :  { %v2488_v54 = vmul.f32 %v2398_v8, %v4305_v0 }
0x1934   :  { %3983 = vtanh.f32 %v2405_v41 }
0x1935   :  { %3985 = vtanh.f32 %v2406_v45 }
0x1936   :  { %3987 = vtanh.f32 %v2407_v43 }
0x1937   :  { %3989 = vtanh.f32 %v2408_v30 }
0x193e   :  { %v3984_v44 = vpop.eup %3983 }
0x193f   :  { %v3986_v47 = vpop.eup %3985 }
0x1940   :  { %v3988_v20 = vpop.eup %3987  ;;  %v2413_v50 = vpack.c.bf16 %v3986_v47, %v3984_v44 }
0x1941   :  { %v3990_v51 = vpop.eup %3989 }
0x1942   :  { %3540 = vmatprep.subr.bf16.mxu1 %v2413_v50  ;;  %v2414_v7 = vpack.c.bf16 %v3990_v51, %v3988_v20 }
0x1943   :  { %3541 = vmatpush3.bf16.msra.mxu1 %v2413_v50 }
0x1944   :  { %3542 = vmatprep.subr.bf16.mxu1 %v2414_v7 }
0x1947   :  { %3543 = vmatpush3.bf16.msra.mxu1 %v2414_v7 }
0x194a   :  { %3545 = vmatmul.mubr.msk.bf16.vlgmr.msra.gmra.mrb[40].mxu1 %vm142_vm0, %v4278_v33 }
0x194b   :  { %3560 = vmatprep.mubr.msk.bf16.mxu1 %vm142_vm0, %v4240_v11 }
0x19a2   :  { %v2485_v37 = vpop.permute.xlu1 %2484  ;;  %v2483_v52 = vpop.permute.xlu0 %2482 }
0x19a3   :  { %v2487_v62 = vsel %vm59_vm1, %v4300_v61, %v2485_v37  ;;  %v2486_v6 = vsel %vm58_vm2, %v4303_v63, %v2483_v52 }
0x19a4   :  { %v2491_v55 = vmul.f32 %v2487_v62, %v4307_v1  ;;  %v2489_v31 = vmul.f32 %v2486_v6, %v4307_v1 }
0x19a6   :  { %v2492_v43 = vadd.f32 %v2491_v55, %v2488_v54  ;;  %v2490_v30 = vadd.f32 %v2489_v31, %v2488_v54 }
0x1a1d   :  { %v3546_v26 = vpop.f32.mrb[40].mxu1 }
0x1a1e   :  { %v2449_v28 = vpop.f32.mrb[41].mxu1 }
0x1a1f   :  { %3991 = vtanh.f32 %v2449_v28  ;;  %v3547_v53 = vpop.f32.mrb[42].mxu1 }
0x1a20   :  { %3993 = vtanh.f32 %v3546_v26  ;;  %v2452_v36 = vpop.f32.mrb[43].mxu1 }
0x1a21   :  { %3995 = vtanh.f32 %v2452_v36 }
0x1a22   :  { %3997 = vtanh.f32 %v3547_v53 }
0x1a29   :  { %v3992_v57 = vpop.eup %3991 }
0x1a2a   :  { %v3994_v60 = vpop.eup %3993  ;;  %v2468_v35 = vmul.f32 %v3992_v57, %v4284_v38 }
0x1a2b   :  { %v3996_v48 = vpop.eup %3995  ;;  %v2470_v24 = vmul.f32 %v3994_v60, %v4290_v46 }
0x1a2c   :  { %v2469_v58 = vmul.f32 %v3996_v48, %v4286_v40  ;;  %v3998_v42 = vpop.eup %3997 }
0x1a2d   :  { %v2471_v3 = vmul.f32 %v3998_v42, %v4293_v49 }
0x1a2e   :  { %v2472_v32 = vadd.f32 %v2469_v58, %v2468_v35 }
0x1a30   :  { %v2473_v9 = vadd.f32 %v2472_v32, %v2470_v24 }
0x1a32   :  { %v2474_v39 = vadd.f32 %v2473_v9, %v2471_v3 }
0x1a34   :  { %v2475_v14 = vrot.slane %v2474_v39, 4 }
0x1a36   :  { %v2476_v16 = vadd.f32 %v2475_v14, %v2474_v39 }
0x1a38   :  { %v2477_v19 = vrot.slane %v2476_v16, 2 }
0x1a3a   :  { %v2478_v13 = vadd.f32 %v2477_v19, %v2476_v16 }
0x1a3c   :  { %v2479_v25 = vrot.slane %v2478_v13, 1 }
0x1a3e   :  { %v2480_v56 = vadd.f32 %v2479_v25, %v2478_v13 }
0x1a40   :  { %3999 = vtanh.f32 %v2480_v56 }
0x1a4a   :  { %v4000_v12 = vpop.eup %3999 }
0x1a4b   :  { %v2493_v29 = vmul.f32 %v4000_v12, %v4315_v4 }
0x1a4d   :  { %v2494_v41 = vmax.f32 %v2493_v29, 0.0  ;;  %v2497_v45 = vmin.f32 %v2493_v29, 0.0 }
0x1a4f   :  { %v2495_v44 = vadd.f32 %v2494_v41, %v4324_v10  ;;  %v2498_v47 = vsub.f32 %v4324_v10, %v2497_v45 }
0x1a51   :  { %v2496_v20 = vmul.f32 %v2495_v44, %v2490_v30  ;;  %v2499_v50 = vmul.f32 %v2498_v47, %v2492_v43 }
0x1a53   :  { %v2500_v51 = vadd.f32 %v2499_v50, %v2496_v20 }
0x1a55   :  { %v5084_v7 = vmul.f32 %v4330_v27, %v2500_v51 }
0x1a57   :  { %v2502_v26 = vmul.f32 %v5084_v7, %v5048_v34 }
0x1a59   :  { %v2503_v28 = vadd.f32 %v2502_v26, %v5009_v23 }
0x1a5b   :  { %2589 = vrot.lane.b32.xlu1 %v2503_v28, %s4165_s3  ;;  %v2508_v8 = vrot.slane %v2503_v28, %v4256_v15  ;;  %2587 = vrot.lane.b32.xlu0 %v2503_v28, %s4166_s26 }
0x1a5d   :  { %v2510_v53 = vmul.f32 %v2508_v8, %v4262_v18  ;;  %v2511_v36 = vmul.f32 %v2508_v8, %v4268_v22  ;;  %v2512_v57 = vmul.f32 %v2508_v8, %v4260_v17  ;;  %v2513_v60 = vmul.f32 %v2508_v8, %v4266_v21 }
0x1a5e   :  { %v2593_v8 = vmul.f32 %v2503_v28, %v4305_v0 }
0x1a5f   :  { %4001 = vtanh.f32 %v2510_v53 }
0x1a60   :  { %4003 = vtanh.f32 %v2511_v36 }
0x1a61   :  { %4005 = vtanh.f32 %v2512_v57 }
0x1a62   :  { %4007 = vtanh.f32 %v2513_v60 }
0x1a69   :  { %v4002_v34 = vpop.eup %4001 }
0x1a6a   :  { %v4004_v48 = vpop.eup %4003 }
0x1a6b   :  { %v4006_v35 = vpop.eup %4005  ;;  %v2518_v58 = vpack.c.bf16 %v4004_v48, %v4002_v34 }
0x1a6c   :  { %v4008_v42 = vpop.eup %4007 }
0x1a6d   :  { %3548 = vmatprep.subr.bf16.mxu0 %v2518_v58  ;;  %v2519_v24 = vpack.c.bf16 %v4008_v42, %v4006_v35 }
0x1a6e   :  { %3549 = vmatpush3.bf16.msra.mxu0 %v2518_v58 }
0x1a6f   :  { %3550 = vmatprep.subr.bf16.mxu0 %v2519_v24 }
0x1a72   :  { %3551 = vmatpush3.bf16.msra.mxu0 %v2519_v24  ;;  %v2607_v24 = vstv %s5038_s25 }
0x1a75   :  { %3553 = vmatmul.mubr.msk.bf16.vlgmr.msra.gmra.mrb[44].mxu0 %vm142_vm0, %v4278_v33 }
0x1a76   :  { %3568 = vmatprep.mubr.msk.bf16.mxu0 %vm142_vm0, %v4240_v11 }
0x1acd   :  { %v2590_v43 = vpop.permute.xlu1 %2589  ;;  %v2588_v30 = vpop.permute.xlu0 %2587 }
0x1ace   :  { %v2592_v44 = vsel %vm59_vm1, %v4300_v61, %v2590_v43  ;;  %v2591_v47 = vsel %vm58_vm2, %v4303_v63, %v2588_v30 }
0x1acf   :  { %v2596_v50 = vmul.f32 %v2592_v44, %v4307_v1  ;;  %v2594_v51 = vmul.f32 %v2591_v47, %v4307_v1 }
0x1ad1   :  { %v2597_v57 = vadd.f32 %v2596_v50, %v2593_v8  ;;  %v2595_v60 = vadd.f32 %v2594_v51, %v2593_v8 }
0x1b48   :  { %v3554_v32 = vpop.f32.mrb[44].mxu0 }
0x1b49   :  { %v2554_v3 = vpop.f32.mrb[45].mxu0 }
0x1b4a   :  { %4009 = vtanh.f32 %v2554_v3  ;;  %v3555_v9 = vpop.f32.mrb[46].mxu0 }
0x1b4b   :  { %4011 = vtanh.f32 %v3554_v32  ;;  %v2557_v39 = vpop.f32.mrb[47].mxu0 }
0x1b4c   :  { %4013 = vtanh.f32 %v2557_v39 }
0x1b4d   :  { %4015 = vtanh.f32 %v3555_v9 }
0x1b54   :  { %v4010_v14 = vpop.eup %4009 }
0x1b55   :  { %v4012_v16 = vpop.eup %4011  ;;  %v2573_v13 = vmul.f32 %v4010_v14, %v4284_v38 }
0x1b56   :  { %v4014_v19 = vpop.eup %4013  ;;  %v2575_v37 = vmul.f32 %v4012_v16, %v4290_v46 }
0x1b57   :  { %v2574_v25 = vmul.f32 %v4014_v19, %v4286_v40  ;;  %v4016_v56 = vpop.eup %4015 }
0x1b58   :  { %v2576_v62 = vmul.f32 %v4016_v56, %v4293_v49 }
0x1b59   :  { %v2577_v52 = vadd.f32 %v2574_v25, %v2573_v13 }
0x1b5b   :  { %v2578_v6 = vadd.f32 %v2577_v52, %v2575_v37 }
0x1b5d   :  { %v2579_v12 = vadd.f32 %v2578_v6, %v2576_v62 }
0x1b5f   :  { %v2580_v55 = vrot.slane %v2579_v12, 4 }
0x1b61   :  { %v2581_v31 = vadd.f32 %v2580_v55, %v2579_v12 }
0x1b63   :  { %v2582_v29 = vrot.slane %v2581_v31, 2 }
0x1b65   :  { %v2583_v54 = vadd.f32 %v2582_v29, %v2581_v31 }
0x1b67   :  { %v2584_v41 = vrot.slane %v2583_v54, 1 }
0x1b69   :  { %v2585_v45 = vadd.f32 %v2584_v41, %v2583_v54 }
0x1b6b   :  { %4017 = vtanh.f32 %v2585_v45 }
0x1b75   :  { %v4018_v20 = vpop.eup %4017 }
0x1b76   :  { %v2598_v26 = vmul.f32 %v4018_v20, %v4315_v4 }
0x1b78   :  { %v2599_v53 = vmax.f32 %v2598_v26, 0.0  ;;  %v2602_v36 = vmin.f32 %v2598_v26, 0.0 }
0x1b7a   :  { %v2600_v34 = vadd.f32 %v2599_v53, %v4324_v10  ;;  %v2603_v48 = vsub.f32 %v4324_v10, %v2602_v36 }
0x1b7c   :  { %v2601_v35 = vmul.f32 %v2600_v34, %v2595_v60  ;;  %v2604_v58 = vmul.f32 %v2603_v48, %v2597_v57 }
0x1b7e   :  { %v2605_v42 = vadd.f32 %v2604_v58, %v2601_v35 }
0x1b80   :  { %v2606_v32 = vmul.f32 %v4330_v27, %v2605_v42 }
0x1b82   :  { %v2608_v3 = vmul.f32 %v2607_v24, %v2606_v32 }
0x1b84   :  { %v2609_v9 = vadd.f32 %v2608_v3, %v5009_v23 }
0x1b86   :  { %2695 = vrot.lane.b32.xlu1 %v2609_v9, %s4165_s3  ;;  %v2614_v28 = vrot.slane %v2609_v9, %v4256_v15  ;;  %2693 = vrot.lane.b32.xlu0 %v2609_v9, %s4166_s26 }
0x1b88   :  { %v2616_v39 = vmul.f32 %v2614_v28, %v4262_v18  ;;  %v2617_v14 = vmul.f32 %v2614_v28, %v4268_v22  ;;  %v2618_v16 = vmul.f32 %v2614_v28, %v4260_v17  ;;  %v2619_v19 = vmul.f32 %v2614_v28, %v4266_v21 }
0x1b8a   :  { %4019 = vtanh.f32 %v2616_v39  ;;  %v2716_v39 = vadd.f32 %v2606_v32, %v5084_v7  ;;  %v2720_v7 = vstv %s2715_s28 }
0x1b8b   :  { %4021 = vtanh.f32 %v2617_v14  ;;  %v2699_v14 = vmul.f32 %v2609_v9, %v4305_v0 }
0x1b8c   :  { %4023 = vtanh.f32 %v2618_v16 }
0x1b8d   :  { %4025 = vtanh.f32 %v2619_v19 }
0x1b94   :  { %v4020_v13 = vpop.eup %4019 }
0x1b95   :  { %v4022_v25 = vpop.eup %4021 }
0x1b96   :  { %v4024_v56 = vpop.eup %4023  ;;  %v2624_v37 = vpack.c.bf16 %v4022_v25, %v4020_v13 }
0x1b97   :  { %v4026_v52 = vpop.eup %4025 }
0x1b98   :  { %3556 = vmatprep.subr.bf16.mxu1 %v2624_v37  ;;  %v2625_v62 = vpack.c.bf16 %v4026_v52, %v4024_v56  ;;  %v2717_v52 = vmul.f32 2.0, %v2716_v39 }
0x1b99   :  { %3557 = vmatpush3.bf16.msra.mxu1 %v2624_v37 }
0x1b9a   :  { %3558 = vmatprep.subr.bf16.mxu1 %v2625_v62 }
0x1b9d   :  { %3559 = vmatpush3.bf16.msra.mxu1 %v2625_v62 }
0x1ba0   :  { %3561 = vmatmul.mubr.msk.bf16.vlgmr.msra.gmra.mrb[44].mxu1 %vm142_vm0, %v4278_v33 }
0x1ba1   :  { %3576 = vmatprep.mubr.msk.bf16.mxu1 %vm142_vm0, %v4240_v11 }
0x1bf8   :  { %v2696_v34 = vpop.permute.xlu1 %2695  ;;  %v2694_v48 = vpop.permute.xlu0 %2693 }
0x1bf9   :  { %v2698_v35 = vsel %vm59_vm1, %v4300_v61, %v2696_v34  ;;  %v2697_v58 = vsel %vm58_vm2, %v4303_v63, %v2694_v48 }
0x1bfa   :  { %v2702_v24 = vmul.f32 %v2698_v35, %v4307_v1  ;;  %v2700_v3 = vmul.f32 %v2697_v58, %v4307_v1 }
0x1bfc   :  { %v2703_v13 = vadd.f32 %v2702_v24, %v2699_v14  ;;  %v2701_v25 = vadd.f32 %v2700_v3, %v2699_v14 }
0x1c73   :  { %v3562_v6 = vpop.f32.mrb[44].mxu1 }
0x1c74   :  { %v2660_v12 = vpop.f32.mrb[45].mxu1 }
0x1c75   :  { %4027 = vtanh.f32 %v2660_v12  ;;  %v3563_v55 = vpop.f32.mrb[46].mxu1 }
0x1c76   :  { %4029 = vtanh.f32 %v3562_v6  ;;  %v2663_v31 = vpop.f32.mrb[47].mxu1 }
0x1c77   :  { %4031 = vtanh.f32 %v2663_v31 }
0x1c78   :  { %4033 = vtanh.f32 %v3563_v55  ;;  %v2718_v55 = vadd.f32 %v2717_v52, %v5051_v2 }
0x1c7f   :  { %v4028_v29 = vpop.eup %4027 }
0x1c80   :  { %v4030_v54 = vpop.eup %4029  ;;  %v2679_v45 = vmul.f32 %v4028_v29, %v4284_v38 }
0x1c81   :  { %v4032_v41 = vpop.eup %4031  ;;  %v2681_v44 = vmul.f32 %v4030_v54, %v4290_v46 }
0x1c82   :  { %v2680_v43 = vmul.f32 %v4032_v41, %v4286_v40  ;;  %v4034_v30 = vpop.eup %4033 }
0x1c83   :  { %v2682_v20 = vmul.f32 %v4034_v30, %v4293_v49 }
0x1c84   :  { %v2683_v47 = vadd.f32 %v2680_v43, %v2679_v45 }
0x1c86   :  { %v2684_v50 = vadd.f32 %v2683_v47, %v2681_v44 }
0x1c88   :  { %v2685_v51 = vadd.f32 %v2684_v50, %v2682_v20 }
0x1c8a   :  { %v2686_v26 = vrot.slane %v2685_v51, 4 }
0x1c8c   :  { %v2687_v8 = vadd.f32 %v2686_v26, %v2685_v51 }
0x1c8e   :  { %v2688_v53 = vrot.slane %v2687_v8, 2 }
0x1c90   :  { %v2689_v36 = vadd.f32 %v2688_v53, %v2687_v8 }
0x1c92   :  { %v2690_v57 = vrot.slane %v2689_v36, 1 }
0x1c94   :  { %v2691_v60 = vadd.f32 %v2690_v57, %v2689_v36 }
0x1c96   :  { %4035 = vtanh.f32 %v2691_v60 }
0x1ca0   :  { %v4036_v42 = vpop.eup %4035 }
0x1ca1   :  { %v2704_v28 = vmul.f32 %v4036_v42, %v4315_v4 }
0x1ca3   :  { %v2705_v16 = vmax.f32 %v2704_v28, 0.0  ;;  %v2708_v19 = vmin.f32 %v2704_v28, 0.0 }
0x1ca5   :  { %v2706_v56 = vadd.f32 %v2705_v16, %v4324_v10  ;;  %v2709_v37 = vsub.f32 %v4324_v10, %v2708_v19 }
0x1ca7   :  { %v2707_v62 = vmul.f32 %v2706_v56, %v2701_v25  ;;  %v2710_v6 = vmul.f32 %v2709_v37, %v2703_v13 }
0x1ca9   :  { %v2711_v12 = vadd.f32 %v2710_v6, %v2707_v62 }
0x1cab   :  { %v2712_v31 = vmul.f32 %v4330_v27, %v2711_v12 }
0x1cad   :  { %v2719_v32 = vadd.f32 %v2718_v55, %v2712_v31 }
0x1caf   :  { %v2721_v9 = vmul.f32 %v2720_v7, %v2719_v32 }
0x1cb1   :  { %v5151_v29 = vadd.f32 %v2721_v9, %v5009_v23 }
0x1cb3   :  { %2810 = vrot.lane.b32.xlu1 %v5151_v29, %s4165_s3  ;;  %2808 = vrot.lane.b32.xlu0 %v5151_v29, %s4166_s26  ;;  %v2729_v54 = vrot.slane %v5151_v29, %v4256_v15  ;;  %v2814_v7 = vmul.f32 %v5151_v29, %v4305_v0 }
0x1cb5   :  { %v2731_v2 = vmul.f32 %v2729_v54, %v4262_v18  ;;  %v2732_v41 = vmul.f32 %v2729_v54, %v4268_v22  ;;  %v2733_v45 = vmul.f32 %v2729_v54, %v4260_v17  ;;  %v2734_v43 = vmul.f32 %v2729_v54, %v4266_v21 }
0x1cb6   :  { %v5164_v23 = vsel %vm3171_vm9, %v5022_v5, %v2729_v54 }
0x1cb7   :  { %4037 = vtanh.f32 %v2731_v2 }
0x1cb8   :  { %4039 = vtanh.f32 %v2732_v41 }
0x1cb9   :  { %4041 = vtanh.f32 %v2733_v45 }
0x1cba   :  { %4043 = vtanh.f32 %v2734_v43 }
0x1cc1   :  { %v4038_v30 = vpop.eup %4037 }
0x1cc2   :  { %v4040_v44 = vpop.eup %4039 }
0x1cc3   :  { %v4042_v47 = vpop.eup %4041  ;;  %v2739_v20 = vpack.c.bf16 %v4040_v44, %v4038_v30 }
0x1cc4   :  { %v4044_v50 = vpop.eup %4043 }
0x1cc5   :  { %3564 = vmatprep.subr.bf16.mxu0 %v2739_v20  ;;  %v2740_v51 = vpack.c.bf16 %v4044_v50, %v4042_v47  ;;  %v5190_v47 = vstv %s2724_s4 }
0x1cc6   :  { %3565 = vmatpush3.bf16.msra.mxu0 %v2739_v20 }
0x1cc7   :  { %3566 = vmatprep.subr.bf16.mxu0 %v2740_v51 }
0x1cca   :  { %3567 = vmatpush3.bf16.msra.mxu0 %v2740_v51 }
0x1ccd   :  { %3569 = vmatmul.mubr.msk.bf16.vlgmr.msra.gmra.mrb[48].mxu0 %vm142_vm0, %v4278_v33 }
0x1cce   :  { %3584 = vmatprep.mubr.msk.bf16.mxu0 %vm142_vm0, %v4240_v11 }
0x1d25   :  { %v2811_v56 = vpop.permute.xlu1 %2810  ;;  %v2809_v37 = vpop.permute.xlu0 %2808 }
0x1d26   :  { %v2813_v52 = vsel %vm59_vm1, %v4300_v61, %v2811_v56  ;;  %v2812_v62 = vsel %vm58_vm2, %v4303_v63, %v2809_v37 }
0x1d27   :  { %v2817_v12 = vmul.f32 %v2813_v52, %v4307_v1  ;;  %v2815_v55 = vmul.f32 %v2812_v62, %v4307_v1 }
0x1d29   :  { %v2818_v54 = vadd.f32 %v2817_v12, %v2814_v7  ;;  %v2816_v2 = vadd.f32 %v2815_v55, %v2814_v7 }
0x1da0   :  { %v3570_v5 = vpop.f32.mrb[48].mxu0 }
0x1da1   :  { %v2775_v26 = vpop.f32.mrb[49].mxu0 }
0x1da2   :  { %4045 = vtanh.f32 %v2775_v26  ;;  %v3571_v8 = vpop.f32.mrb[50].mxu0 }
0x1da3   :  { %4047 = vtanh.f32 %v3570_v5  ;;  %v2778_v53 = vpop.f32.mrb[51].mxu0 }
0x1da4   :  { %4049 = vtanh.f32 %v2778_v53 }
0x1da5   :  { %4051 = vtanh.f32 %v3571_v8 }
0x1dac   :  { %v4046_v36 = vpop.eup %4045 }
0x1dad   :  { %v4048_v57 = vpop.eup %4047  ;;  %v2794_v34 = vmul.f32 %v4046_v36, %v4284_v38 }
0x1dae   :  { %v4050_v60 = vpop.eup %4049  ;;  %v2796_v58 = vmul.f32 %v4048_v57, %v4290_v46 }
0x1daf   :  { %v2795_v48 = vmul.f32 %v4050_v60, %v4286_v40  ;;  %v4052_v35 = vpop.eup %4051 }
0x1db0   :  { %v2797_v24 = vmul.f32 %v4052_v35, %v4293_v49 }
0x1db1   :  { %v2798_v42 = vadd.f32 %v2795_v48, %v2794_v34 }
0x1db3   :  { %v2799_v3 = vadd.f32 %v2798_v42, %v2796_v58 }
0x1db5   :  { %v2800_v28 = vadd.f32 %v2799_v3, %v2797_v24 }
0x1db7   :  { %v2801_v39 = vrot.slane %v2800_v28, 4 }
0x1db9   :  { %v2802_v14 = vadd.f32 %v2801_v39, %v2800_v28 }
0x1dbb   :  { %v2803_v16 = vrot.slane %v2802_v14, 2 }
0x1dbd   :  { %v2804_v19 = vadd.f32 %v2803_v16, %v2802_v14 }
0x1dbf   :  { %v2805_v13 = vrot.slane %v2804_v19, 1 }
0x1dc1   :  { %v2806_v25 = vadd.f32 %v2805_v13, %v2804_v19 }
0x1dc3   :  { %4053 = vtanh.f32 %v2806_v25 }
0x1dcd   :  { %v4054_v6 = vpop.eup %4053 }
0x1dce   :  { %v2819_v31 = vmul.f32 %v4054_v6, %v4315_v4 }
0x1dd0   :  { %v2820_v32 = vmax.f32 %v2819_v31, 0.0  ;;  %v2823_v9 = vmin.f32 %v2819_v31, 0.0 }
0x1dd2   :  { %v2821_v41 = vadd.f32 %v2820_v32, %v4324_v10  ;;  %v2824_v45 = vsub.f32 %v4324_v10, %v2823_v9 }
0x1dd4   :  { %v2822_v43 = vmul.f32 %v2821_v41, %v2816_v2  ;;  %v2825_v30 = vmul.f32 %v2824_v45, %v2818_v54 }
0x1dd6   :  { %v2826_v44 = vadd.f32 %v2825_v30, %v2822_v43 }
0x1dd8   :  { %v5193_v20 = vmul.f32 %v4330_v27, %v2826_v44 }
0x1dda   :  { %v2829_v50 = vmul.f32 %v5190_v47, %v5193_v20 }
0x1ddc   :  { %v2830_v51 = vadd.f32 %v2829_v50, %v5151_v29 }
0x1dde   :  { %2916 = vrot.lane.b32.xlu1 %v2830_v51, %s4165_s3  ;;  %v2835_v5 = vrot.slane %v2830_v51, %v4256_v15  ;;  %2914 = vrot.lane.b32.xlu0 %v2830_v51, %s4166_s26  ;;  %v2920_v50 = vmul.f32 %v2830_v51, %v4305_v0 }
0x1de0   :  { %v2837_v26 = vmul.f32 %v2835_v5, %v4262_v18  ;;  %v2838_v8 = vmul.f32 %v2835_v5, %v4268_v22  ;;  %v2839_v53 = vmul.f32 %v2835_v5, %v4260_v17  ;;  %v2840_v36 = vmul.f32 %v2835_v5, %v4266_v21 }
0x1de2   :  { %4055 = vtanh.f32 %v2837_v26 }
0x1de3   :  { %4057 = vtanh.f32 %v2838_v8 }
0x1de4   :  { %4059 = vtanh.f32 %v2839_v53 }
0x1de5   :  { %4061 = vtanh.f32 %v2840_v36 }
0x1dec   :  { %v4056_v57 = vpop.eup %4055 }
0x1ded   :  { %v4058_v60 = vpop.eup %4057 }
0x1dee   :  { %v4060_v34 = vpop.eup %4059  ;;  %v2845_v48 = vpack.c.bf16 %v4058_v60, %v4056_v57 }
0x1def   :  { %v4062_v35 = vpop.eup %4061 }
0x1df0   :  { %3572 = vmatprep.subr.bf16.mxu1 %v2845_v48  ;;  %v2846_v58 = vpack.c.bf16 %v4062_v35, %v4060_v34 }
0x1df1   :  { %3573 = vmatpush3.bf16.msra.mxu1 %v2845_v48 }
0x1df2   :  { %3574 = vmatprep.subr.bf16.mxu1 %v2846_v58 }
0x1df5   :  { %3575 = vmatpush3.bf16.msra.mxu1 %v2846_v58 }
0x1df8   :  { %3577 = vmatmul.mubr.msk.bf16.vlgmr.msra.gmra.mrb[48].mxu1 %vm142_vm0, %v4278_v33 }
0x1df9   :  { %3592 = vmatprep.mubr.msk.bf16.mxu1 %vm142_vm0, %v4240_v11 }
0x1e50   :  { %v2917_v9 = vpop.permute.xlu1 %2916  ;;  %v2915_v54 = vpop.permute.xlu0 %2914 }
0x1e51   :  { %v2919_v2 = vsel %vm59_vm1, %v4300_v61, %v2917_v9  ;;  %v2918_v41 = vsel %vm58_vm2, %v4303_v63, %v2915_v54 }
0x1e52   :  { %v2923_v43 = vmul.f32 %v2919_v2, %v4307_v1  ;;  %v2921_v30 = vmul.f32 %v2918_v41, %v4307_v1 }
0x1e54   :  { %v2924_v8 = vadd.f32 %v2923_v43, %v2920_v50  ;;  %v2922_v53 = vadd.f32 %v2921_v30, %v2920_v50 }
0x1ecb   :  { %v3578_v42 = vpop.f32.mrb[48].mxu1 }
0x1ecc   :  { %v2881_v24 = vpop.f32.mrb[49].mxu1 }
0x1ecd   :  { %4063 = vtanh.f32 %v2881_v24  ;;  %v3579_v3 = vpop.f32.mrb[50].mxu1 }
0x1ece   :  { %4065 = vtanh.f32 %v3578_v42  ;;  %v2884_v28 = vpop.f32.mrb[51].mxu1 }
0x1ecf   :  { %4067 = vtanh.f32 %v2884_v28 }
0x1ed0   :  { %4069 = vtanh.f32 %v3579_v3 }
0x1ed7   :  { %v4064_v39 = vpop.eup %4063 }
0x1ed8   :  { %v4066_v14 = vpop.eup %4065  ;;  %v2900_v19 = vmul.f32 %v4064_v39, %v4284_v38 }
0x1ed9   :  { %v4068_v16 = vpop.eup %4067  ;;  %v2902_v56 = vmul.f32 %v4066_v14, %v4290_v46 }
0x1eda   :  { %v2901_v13 = vmul.f32 %v4068_v16, %v4286_v40  ;;  %v4070_v25 = vpop.eup %4069 }
0x1edb   :  { %v2903_v11 = vmul.f32 %v4070_v25, %v4293_v49 }
0x1edc   :  { %v2904_v37 = vadd.f32 %v2901_v13, %v2900_v19 }
0x1ede   :  { %v2905_v52 = vadd.f32 %v2904_v37, %v2902_v56 }
0x1ee0   :  { %v2906_v62 = vadd.f32 %v2905_v52, %v2903_v11 }
0x1ee2   :  { %v2907_v6 = vrot.slane %v2906_v62, 4 }
0x1ee4   :  { %v2908_v12 = vadd.f32 %v2907_v6, %v2906_v62 }
0x1ee6   :  { %v2909_v55 = vrot.slane %v2908_v12, 2 }
0x1ee8   :  { %v2910_v31 = vadd.f32 %v2909_v55, %v2908_v12 }
0x1eea   :  { %v2911_v7 = vrot.slane %v2910_v31, 1 }
0x1eec   :  { %v2912_v32 = vadd.f32 %v2911_v7, %v2910_v31 }
0x1eee   :  { %4071 = vtanh.f32 %v2912_v32 }
0x1ef8   :  { %v4072_v45 = vpop.eup %4071 }
0x1ef9   :  { %v2925_v44 = vmul.f32 %v4072_v45, %v4315_v4 }
0x1efb   :  { %v2926_v5 = vmax.f32 %v2925_v44, 0.0  ;;  %v2929_v26 = vmin.f32 %v2925_v44, 0.0 }
0x1efd   :  { %v2927_v36 = vadd.f32 %v2926_v5, %v4324_v10  ;;  %v2930_v57 = vsub.f32 %v4324_v10, %v2929_v26 }
0x1eff   :  { %v2928_v60 = vmul.f32 %v2927_v36, %v2922_v53  ;;  %v2931_v34 = vmul.f32 %v2930_v57, %v2924_v8 }
0x1f01   :  { %v2932_v48 = vadd.f32 %v2931_v34, %v2928_v60 }
0x1f03   :  { %v5226_v35 = vmul.f32 %v4330_v27, %v2932_v48 }
0x1f05   :  { %v2934_v58 = vmul.f32 %v5226_v35, %v5190_v47 }
0x1f07   :  { %v2935_v42 = vadd.f32 %v2934_v58, %v5151_v29 }
0x1f09   :  { %3021 = vrot.lane.b32.xlu1 %v2935_v42, %s4165_s3  ;;  %v2940_v51 = vrot.slane %v2935_v42, %v4256_v15  ;;  %3019 = vrot.lane.b32.xlu0 %v2935_v42, %s4166_s26  ;;  %v3025_v58 = vmul.f32 %v2935_v42, %v4305_v0 }
0x1f0b   :  { %v2942_v24 = vmul.f32 %v2940_v51, %v4262_v18  ;;  %v2943_v3 = vmul.f32 %v2940_v51, %v4268_v22  ;;  %v2944_v28 = vmul.f32 %v2940_v51, %v4260_v17  ;;  %v2945_v39 = vmul.f32 %v2940_v51, %v4266_v21 }
0x1f0d   :  { %4073 = vtanh.f32 %v2942_v24 }
0x1f0e   :  { %4075 = vtanh.f32 %v2943_v3 }
0x1f0f   :  { %4077 = vtanh.f32 %v2944_v28 }
0x1f10   :  { %4079 = vtanh.f32 %v2945_v39 }
0x1f17   :  { %v4074_v47 = vpop.eup %4073 }
0x1f18   :  { %v4076_v14 = vpop.eup %4075 }
0x1f19   :  { %v4078_v16 = vpop.eup %4077  ;;  %v2950_v19 = vpack.c.bf16 %v4076_v14, %v4074_v47 }
0x1f1a   :  { %v4080_v13 = vpop.eup %4079 }
0x1f1b   :  { %3580 = vmatprep.subr.bf16.mxu0 %v2950_v19  ;;  %v2951_v25 = vpack.c.bf16 %v4080_v13, %v4078_v16  ;;  %v3039_v13 = vstv %s5180_s29 }
0x1f1c   :  { %3581 = vmatpush3.bf16.msra.mxu0 %v2950_v19 }
0x1f1d   :  { %3582 = vmatprep.subr.bf16.mxu0 %v2951_v25 }
0x1f20   :  { %3583 = vmatpush3.bf16.msra.mxu0 %v2951_v25 }
0x1f23   :  { %3585 = vmatmul.mubr.msk.bf16.vlgmr.msra.gmra.mrb[52].mxu0 %vm142_vm0, %v4278_v33 }
0x1f7b   :  { %v3022_v26 = vpop.permute.xlu1 %3021  ;;  %v3020_v8 = vpop.permute.xlu0 %3019 }
0x1f7c   :  { %v3024_v53 = vsel %vm59_vm1, %v4300_v61, %v3022_v26  ;;  %v3023_v36 = vsel %vm58_vm2, %v4303_v63, %v3020_v8 }
0x1f7d   :  { %v3028_v60 = vmul.f32 %v3024_v53, %v4307_v1  ;;  %v3026_v34 = vmul.f32 %v3023_v36, %v4307_v1 }
0x1f7f   :  { %v3029_v3 = vadd.f32 %v3028_v60, %v3025_v58  ;;  %v3027_v28 = vadd.f32 %v3026_v34, %v3025_v58 }
0x1ff6   :  { %v3586_v56 = vpop.f32.mrb[52].mxu0 }
0x1ff7   :  { %v2986_v37 = vpop.f32.mrb[53].mxu0 }
0x1ff8   :  { %4081 = vtanh.f32 %v2986_v37  ;;  %v3587_v11 = vpop.f32.mrb[54].mxu0 }
0x1ff9   :  { %4083 = vtanh.f32 %v3586_v56  ;;  %v2989_v52 = vpop.f32.mrb[55].mxu0 }
0x1ffa   :  { %4085 = vtanh.f32 %v2989_v52 }
0x1ffb   :  { %4087 = vtanh.f32 %v3587_v11 }
0x2002   :  { %v4082_v62 = vpop.eup %4081 }
0x2003   :  { %v4084_v6 = vpop.eup %4083  ;;  %v3005_v55 = vmul.f32 %v4082_v62, %v4284_v38 }
0x2004   :  { %v4086_v12 = vpop.eup %4085  ;;  %v3007_v32 = vmul.f32 %v4084_v6, %v4290_v46 }
0x2005   :  { %v3006_v31 = vmul.f32 %v4086_v12, %v4286_v40  ;;  %v4088_v7 = vpop.eup %4087 }
0x2006   :  { %v3008_v54 = vmul.f32 %v4088_v7, %v4293_v49 }
0x2007   :  { %v3009_v9 = vadd.f32 %v3006_v31, %v3005_v55 }
0x2009   :  { %v3010_v2 = vadd.f32 %v3009_v9, %v3007_v32 }
0x200b   :  { %v3011_v41 = vadd.f32 %v3010_v2, %v3008_v54 }
0x200d   :  { %v3012_v45 = vrot.slane %v3011_v41, 4 }
0x200f   :  { %v3013_v43 = vadd.f32 %v3012_v45, %v3011_v41 }
0x2011   :  { %v3014_v30 = vrot.slane %v3013_v43, 2 }
0x2013   :  { %v3015_v44 = vadd.f32 %v3014_v30, %v3013_v43 }
0x2015   :  { %v3016_v50 = vrot.slane %v3015_v44, 1 }
0x2017   :  { %v3017_v5 = vadd.f32 %v3016_v50, %v3015_v44 }
0x2019   :  { %4089 = vtanh.f32 %v3017_v5 }
0x2023   :  { %v4090_v57 = vpop.eup %4089 }
0x2024   :  { %v3030_v48 = vmul.f32 %v4090_v57, %v4315_v4 }
0x2026   :  { %v3031_v51 = vmax.f32 %v3030_v48, 0.0  ;;  %v3034_v24 = vmin.f32 %v3030_v48, 0.0 }
0x2028   :  { %v3032_v39 = vadd.f32 %v3031_v51, %v4324_v10  ;;  %v3035_v47 = vsub.f32 %v4324_v10, %v3034_v24 }
0x202a   :  { %v3033_v14 = vmul.f32 %v3032_v39, %v3027_v28  ;;  %v3036_v16 = vmul.f32 %v3035_v47, %v3029_v3 }
0x202c   :  { %v3037_v19 = vadd.f32 %v3036_v16, %v3033_v14 }
0x202e   :  { %v3038_v25 = vmul.f32 %v4330_v27, %v3037_v19 }
0x2030   :  { %v3040_v56 = vmul.f32 %v3039_v13, %v3038_v25  ;;  %v3148_v3 = vadd.f32 %v3038_v25, %v5226_v35 }
0x2032   :  { %v3041_v37 = vadd.f32 %v3040_v56, %v5151_v29 }
0x2034   :  { %3127 = vrot.lane.b32.xlu1 %v3041_v37, %s4165_s3  ;;  %v3046_v42 = vrot.slane %v3041_v37, %v4256_v15  ;;  %3125 = vrot.lane.b32.xlu0 %v3041_v37, %s4166_s26  ;;  %v3131_v28 = vmul.f32 %v3041_v37, %v4305_v0  ;;  %s3147_s3 = smul.f32 0.16666667, %s5180_s29  ;;  %s4168_s26 = smov [#allocation7]  }
0x2035   :  { %s3182_s2 = sshll.u32 %s4168_s26, 4  ;;  %s3183_s2 = int_to_ptr.vmem [resolvable:$true] %s3182_s2 }
0x2036   :  { %v3048_v11 = vmul.f32 %v3046_v42, %v4262_v18  ;;  %v3049_v52 = vmul.f32 %v3046_v42, %v4268_v22  ;;  %v3050_v62 = vmul.f32 %v3046_v42, %v4260_v17  ;;  %v3051_v6 = vmul.f32 %v3046_v42, %v4266_v21  ;;  %s4134_s5 = scalar_lea.vmem %s3183_s2, 128  ;;  %p4139_p11 = scmp.lt.s32.totalorder %s3183_s2, %s3183_s2 }
0x2037   :  { %v3152_v35 = vstv %s3147_s3  ;;  %p4135_p10 = scmp.ne.s32.totalorder %s3183_s2, %s4134_s5  ;;  %p4140_p12 = scmp.lt.s32.totalorder %s4134_s5, %s4134_s5 }
0x2038   :  { %4091 = vtanh.f32 %v3048_v11 }
0x2039   :  { %4093 = vtanh.f32 %v3049_v52  ;;  %p4141_p13 = por %p4140_p12, %p4139_p11 }
0x203a   :  { %4095 = vtanh.f32 %v3050_v62 }
0x203b   :  { %4097 = vtanh.f32 %v3051_v6  ;;  %p4142_p0 = pnand %p4141_p13, %p4135_p10 }
0x2042   :  { %v4092_v12 = vpop.eup %4091 }
0x2043   :  { %v4094_v55 = vpop.eup %4093 }
0x2044   :  { %v4096_v31 = vpop.eup %4095  ;;  %v3056_v7 = vpack.c.bf16 %v4094_v55, %v4092_v12 }
0x2045   :  { %v4098_v32 = vpop.eup %4097 }
0x2046   :  { %3588 = vmatprep.subr.bf16.mxu1 %v3056_v7  ;;  %v3057_v9 = vpack.c.bf16 %v4098_v32, %v4096_v31 }
0x2047   :  { %3589 = vmatpush3.bf16.msra.mxu1 %v3056_v7 }
0x2048   :  { %3590 = vmatprep.subr.bf16.mxu1 %v3057_v9 }
0x204b   :  { %3591 = vmatpush3.bf16.msra.mxu1 %v3057_v9 }
0x204e   :  { %3593 = vmatmul.mubr.msk.bf16.vlgmr.msra.gmra.mrb[52].mxu1 %vm142_vm0, %v4278_v33 }
0x20a6   :  { %v3128_v48 = vpop.permute.xlu1 %3127  ;;  %v3126_v58 = vpop.permute.xlu0 %3125 }
0x2121   :  { %v3594_v17 = vpop.f32.mrb[52].mxu1 }
0x2122   :  { %v3092_v18 = vpop.f32.mrb[53].mxu1 }
0x2123   :  { %4099 = vtanh.f32 %v3092_v18  ;;  %v3595_v21 = vpop.f32.mrb[54].mxu1 }
0x2124   :  { %4101 = vtanh.f32 %v3594_v17  ;;  %v3095_v22 = vpop.f32.mrb[55].mxu1 }
0x2125   :  { %4103 = vtanh.f32 %v3095_v22 }
0x2126   :  { %4105 = vtanh.f32 %v3595_v21 }
0x212d   :  { %v4100_v54 = vpop.eup %4099 }
0x212e   :  { %v4102_v2 = vpop.eup %4101  ;;  %v3111_v45 = vmul.f32 %v4100_v54, %v4284_v38  ;;  %v3130_v38 = vsel %vm59_vm1, %v4300_v61, %v3128_v48 }
0x212f   :  { %v4104_v41 = vpop.eup %4103  ;;  %v3113_v44 = vmul.f32 %v4102_v2, %v4290_v46 }
0x2130   :  { %v3112_v43 = vmul.f32 %v4104_v41, %v4286_v40  ;;  %v4106_v30 = vpop.eup %4105  ;;  %v3129_v40 = vsel %vm58_vm2, %v4303_v63, %v3126_v58  ;;  %v3149_v63 = vmul.f32 2.0, %v3148_v3 }
0x2131   :  { %v3114_v33 = vmul.f32 %v4106_v30, %v4293_v49  ;;  %v3134_v49 = vmul.f32 %v3130_v38, %v4307_v1  ;;  %v3132_v51 = vmul.f32 %v3129_v40, %v4307_v1 }
0x2132   :  { %v3115_v50 = vadd.f32 %v3112_v43, %v3111_v45 }
0x2133   :  { %v3135_v14 = vadd.f32 %v3134_v49, %v3131_v28  ;;  %v3133_v61 = vadd.f32 %v3132_v51, %v3131_v28 }
0x2134   :  { %v3116_v5 = vadd.f32 %v3115_v50, %v3113_v44 }
0x2136   :  { %v3117_v26 = vadd.f32 %v3116_v5, %v3114_v33 }
0x2138   :  { %v3118_v8 = vrot.slane %v3117_v26, 4 }
0x213a   :  { %v3119_v53 = vadd.f32 %v3118_v8, %v3117_v26 }
0x213c   :  { %v3120_v36 = vrot.slane %v3119_v53, 2 }
0x213e   :  { %v3121_v57 = vadd.f32 %v3120_v36, %v3119_v53 }
0x2140   :  { %v3122_v60 = vrot.slane %v3121_v57, 1 }
0x2142   :  { %v3123_v34 = vadd.f32 %v3122_v60, %v3121_v57 }
0x2144   :  { %4107 = vtanh.f32 %v3123_v34 }
0x214e   :  { %v4108_v46 = vpop.eup %4107 }
0x214f   :  { %v3136_v24 = vmul.f32 %v4108_v46, %v4315_v4  ;;  %v3150_v4 = vadd.f32 %v3149_v63, %v5193_v20 }
0x2151   :  { %v3137_v39 = vmax.f32 %v3136_v24, 0.0  ;;  %v3140_v47 = vmin.f32 %v3136_v24, 0.0 }
0x2153   :  { %v3138_v16 = vadd.f32 %v3137_v39, %v4324_v10  ;;  %v3141_v59 = vsub.f32 %v4324_v10, %v3140_v47 }
0x2155   :  { %v3139_v19 = vmul.f32 %v3138_v16, %v3133_v61  ;;  %v3142_v13 = vmul.f32 %v3141_v59, %v3135_v14 }
0x2157   :  { %v3143_v56 = vadd.f32 %v3142_v13, %v3139_v19 }
0x2159   :  { %v3144_v1 = vmul.f32 %v4330_v27, %v3143_v56 }
0x215b   :  { %v3151_v25 = vadd.f32 %v3150_v4, %v3144_v1 }
0x215d   :  { %v3153_v0 = vmul.f32 %v3152_v35, %v3151_v25 }
0x215f   :  { %v3154_v37 = vadd.f32 %v3153_v0, %v5151_v29 }
0x2161   :  { %v3159_v42 = vrot.slane %v3154_v37, %v4256_v15 }
0x2163   :  { %v3174_v10 = vsel %vm3173_vm10, %v5164_v23, %v3159_v42 }
0x2164   :  { %3175 = vst [vmem:[#allocation7] sm:$0xff] %v3174_v10 }
0x2165   :  { %4145 = shalt.err (!%p4142_p0)
}
0x2166   :  { %s4146_s8 = scalar_lea.hbm %s5309_s6, 128 }
0x2167   :  { %p4147_p1 = scmp.ne.s32.totalorder %s5309_s6, %s4146_s8  ;;  %p4150_p2 = scmp.lt.u32.totalorder %s4146_s8, %s5309_s6 }
0x2169   :  { %p4152_p3 = pnand %p4150_p2, %p4147_p1 }
0x216b   :  { %4155 = shalt.err (!%p4152_p3)
}
0x216c   :  { %3185 = dma.vmem_to_hbm [thread:$0]  %s3183_s2, 128, %s5309_s6, [#allocation3]  }
0x216d   :  { %4160 = dma.done.wait [#allocation3], 128  }
0x216e   :  { %4161 = vsyncadd [#allocation3], 4294967168 }
0x216f   :  { %3189 = vsyncpa [#allocation3], 1 }
0x2170   :  { %3190 = vsyncpa [#allocation4], 1 }
0x2171   :  { %3191 = vsyncpa [#allocation6], 1 }

</bundles_post_ra>
